<compile_context>
chip_gen: v7x
topology: tpu7x:2x2x1
jax: 0.10.0
libtpu: 0.0.40
codegen_flags: <defaults>
</compile_context>

<pallas_src>
import math

import jax
import jax.numpy as jnp
from jax import lax
from jax.experimental import pallas as pl
from jax.experimental.pallas import tpu as pltpu


def _round_up(n, m):
    return ((n + m - 1) // m) * m


# ----------------------- fused Pallas conv-matmul (transposed) ---------------

def _make_fused_kernel(use_pre, use_post, post_relu):
    def kernel(*refs):
        i = 0
        x_ref = refs[i]; i += 1
        w_ref = refs[i]; i += 1
        if use_pre:
            s1_ref, b1_ref = refs[i], refs[i + 1]; i += 2
        if use_post:
            s2_ref, b2_ref = refs[i], refs[i + 1]; i += 2
        o_ref = refs[i]

        x = x_ref[...]                                   # (K, tm) bf16/f32
        if use_pre:                                      # fused BN + ReLU prologue
            x = jnp.maximum(x.astype(jnp.float32) * s1_ref[...] + b1_ref[...],
                            0.0)
        y = jnp.dot(w_ref[...], x.astype(jnp.bfloat16),  # bf16 MXU, f32 accumulate
                    preferred_element_type=jnp.float32)  # (N, K) @ (K, tm)
        if use_post:                                     # fused BN epilogue
            y = y * s2_ref[...] + b2_ref[...]
        if post_relu:
            y = jnp.maximum(y, 0.0)
        o_ref[...] = y.astype(o_ref.dtype)
    return kernel


def _choose_tm(Mp, Kb):
    # Single full-extent block by default: every matmul in this model is tiny,
    # so the ~0.35us per-grid-step cost dominates (perf-review v5e/v6e items).
    # Split 2-way only when the work is big enough to amortize on v7x's 2 TCs.
    if Mp >= 4096 and Kb >= 256 and (Mp // 2) % 128 == 0:
        return Mp // 2
    tm = Mp
    while tm * Kb * 4 > (8 << 20) and tm % 256 == 0:     # VMEM guard (never hit here)
        tm //= 2
    return tm


def fused_matmul_t(x2d, w_nk, k_valid=None, pre=None, post=None,
                   post_relu=False, out_dtype=jnp.float32):
    """Channel-major fused conv-matmul.

    x2d:(K_arr, M) activations with M on the lane axis; w_nk:(N, k_valid) f32.
    Only the first k_valid rows of x2d are read (the BlockSpec limits the DMA,
    so the growing DenseNet feature buffer is never sliced/copied in XLA).
    pre/post = per-channel (scale, shift) of folded eval-mode BatchNorm.
    """
    K_arr, M = x2d.shape
    N, Kw = w_nk.shape
    if k_valid is None:
        k_valid = Kw
    assert Kw == k_valid and k_valid <= K_arr

    # Sublane block of x: full extent, or k_valid rounded up to a multiple of 8.
    # Extra rows only ever hit zero-padded weight columns -> no contribution
    # even with a nonzero-shift BN prologue (correctness-review item 3).
    kb = K_arr if k_valid == K_arr else min(_round_up(k_valid, 8), K_arr)
    if kb > k_valid:
        w_nk = jnp.pad(w_nk, ((0, 0), (0, kb - k_valid)))

    Mp = _round_up(M, 128)
    x_p = x2d if Mp == M else jnp.pad(x2d, ((0, 0), (0, Mp - M)))
    tm = _choose_tm(Mp, kb)

    use_pre, use_post = pre is not None, post is not None
    ops = [x_p, w_nk.astype(jnp.bfloat16)]
    in_specs = [pl.BlockSpec((kb, tm), lambda i: (0, i)),
                pl.BlockSpec((N, kb), lambda i: (0, 0))]
    if use_pre:
        s1, b1 = pre
        if kb > k_valid:
            s1 = jnp.pad(s1, (0, kb - k_valid), constant_values=1.0)
            b1 = jnp.pad(b1, (0, kb - k_valid))
        ops += [s1.reshape(kb, 1).astype(jnp.float32),
                b1.reshape(kb, 1).astype(jnp.float32)]
        in_specs += [pl.BlockSpec((kb, 1), lambda i: (0, 0))] * 2
    if use_post:
        s2, b2 = post
        ops += [s2.reshape(N, 1).astype(jnp.float32),
                b2.reshape(N, 1).astype(jnp.float32)]
        in_specs += [pl.BlockSpec((N, 1), lambda i: (0, 0))] * 2

    x_bytes = int(x_p.dtype.itemsize)
    out_bytes = int(jnp.dtype(out_dtype).itemsize)
    out = pl.pallas_call(
        _make_fused_kernel(use_pre, use_post, post_relu),
        out_shape=jax.ShapeDtypeStruct((N, Mp), out_dtype),
        grid_spec=pltpu.PrefetchScalarGridSpec(
            num_scalar_prefetch=0,
            grid=(Mp // tm,),                       # one block for this model
            in_specs=in_specs,
            out_specs=pl.BlockSpec((N, tm), lambda i: (0, i))),
        compiler_params=pltpu.CompilerParams(
            dimension_semantics=("parallel",)),
        cost_estimate=pl.CostEstimate(
            flops=2 * N * kb * Mp, transcendentals=0,
            bytes_accessed=int(kb * Mp * x_bytes + N * kb * 2
                               + N * Mp * out_bytes + 2 * (kb + N) * 4)),
    )(*ops)
    return out if Mp == M else out[:, :M]


# ------------------------------ conv / pool glue -----------------------------

def im2col_cm(x, kh, kw, stride, padding):
    """Channel-major im2col: (C, B, H, W) -> (kh*kw*C, B*Ho*Wo) in bf16."""
    C, B, H, W = x.shape
    Ho = (H + 2 * padding - kh) // stride + 1
    Wo = (W + 2 * padding - kw) // stride + 1
    xp = jnp.pad(x.astype(jnp.bfloat16),
                 ((0, 0), (0, 0), (padding, padding), (padding, padding)))
    # TODO(synk): an in-kernel halo load would avoid materializing the kh*kw
    # duplicated tensor; it is < 0.6 MiB in bf16 here, so the XLA-side gather
    # is kept for lowering robustness.
    patches = [xp[:, :, i:i + stride * Ho:stride, j:j + stride * Wo:stride]
               for i in range(kh) for j in range(kw)]
    return jnp.concatenate(patches, axis=0).reshape(kh * kw * C, B * Ho * Wo)


def _conv_nk(w_oihw):
    """(Cout, Cin, kh, kw) -> (Cout, kh*kw*Cin), matching im2col_cm ordering."""
    cout, cin, kh, kw = w_oihw.shape
    return jnp.transpose(w_oihw, (0, 2, 3, 1)).reshape(cout, kh * kw * cin)


def maxpool_cm(x, k, s, p):
    init = jnp.array(-jnp.inf, dtype=x.dtype)
    return lax.reduce_window(x, init, lax.max, (1, 1, k, k), (1, 1, s, s),
                             ((0, 0), (0, 0), (p, p), (p, p)))


def avgpool_cm(x, k, s):
    init = jnp.array(0.0, dtype=x.dtype)
    out = lax.reduce_window(x, init, lax.add, (1, 1, k, k), (1, 1, s, s),
                            'VALID')
    return out / float(k * k)


# --------------------------------- SCSA --------------------------------------

def group_norm_cm(x_cbl, groups, gamma, beta, eps=1e-5):
    """GroupNorm over a channel-major (C, B, L) tensor (torch layout (B,C,L))."""
    C, B, L = x_cbl.shape
    xg = x_cbl.reshape(groups, C // groups, B, L)
    mean = xg.mean(axis=(1, 3), keepdims=True)
    var = ((xg - mean) ** 2).mean(axis=(1, 3), keepdims=True)
    xn = ((xg - mean) / jnp.sqrt(var + eps)).reshape(C, B, L)
    return xn * gamma[:, None, None] + beta[:, None, None]


def dwconv1d_packed(x_cbl, w9, b):
    """All four SCSA depthwise 1-D convs as ONE batched 9-tap conv.

    Per-group kernels (sizes 3/5/7/9, 'same' padding) are centered with zero
    padding into a single (C, 9) table — bit-identical to the four grouped
    convs, but a single dispatch chain instead of four.
    """
    C, B, L = x_cbl.shape
    xp = jnp.pad(x_cbl, ((0, 0), (0, 0), (4, 4)))
    out = jnp.zeros_like(x_cbl)
    for t in range(9):
        out = out + xp[:, :, t:t + L] * w9[:, t][:, None, None]
    return out + b[:, None, None]


def scsa_forward_cm(x, p, head_num=8, window_size=7):
    """SCSA on a channel-major (C, B, H, W) f32 tensor (tiny; plain XLA)."""
    C, B, H, W = x.shape
    head_dim = C // head_num
    scaler = head_dim ** (-0.5)

    def spatial_attn(x_cbl, gamma, beta):
        z = dwconv1d_packed(x_cbl, p['dwc_w9'], p['dwc_b'])
        return jax.nn.sigmoid(group_norm_cm(z, 4, gamma, beta))

    x_h = x.mean(axis=3)                                   # torch x.mean(dim=3)
    x_w = x.mean(axis=2)                                   # torch x.mean(dim=2)
    h_attn = spatial_attn(x_h, p['norm_h_g'], p['norm_h_b'])   # (C, B, H)
    w_attn = spatial_attn(x_w, p['norm_w_g'], p['norm_w_b'])   # (C, B, W)
    x = x * h_attn[:, :, :, None] * w_attn[:, :, None, :]

    y = avgpool_cm(x, window_size, window_size)            # down_func (avg_pool)
    _, _, h2, w2 = y.shape
    L = h2 * w2
    y = group_norm_cm(y.reshape(C, B, L), 1, p['norm_g'], p['norm_b'])

    # q/k/v are 1x1 convs with groups=dim, i.e. per-channel scales; fold them
    # directly into the attention einsums (no q/k/v tensors materialized).
    yh = y.reshape(head_num, head_dim, B, L)
    qw = p['q_w'].reshape(head_num, head_dim)
    kw = p['k_w'].reshape(head_num, head_dim)
    vw = p['v_w'].reshape(head_num, head_dim)
    gram = jnp.einsum('ndbl,nebl->bnde', yh, yh)
    attn = jax.nn.softmax(
        gram * qw[None, :, :, None] * kw[None, :, None, :] * scaler, axis=-1)
    out = jnp.einsum('bnde,nebl->bndl', attn, vw[:, :, None, None] * yh)
    gate = jax.nn.sigmoid(out.mean(axis=-1)).reshape(B, C)  # ca_gate
    return x * jnp.transpose(gate)[:, :, None, None]


# -------------------------------- DenseNet -----------------------------------

def dense_layer_forward(buf2d, c_used, bhw, p):
    B, H, W = bhw
    growth = p['conv2_w_nk'].shape[0]
    # norm1 -> relu1 -> conv1(1x1) -> norm2 -> relu2 : ONE fused Pallas call,
    # reading only the first c_used channel rows of the shared block buffer.
    mid = fused_matmul_t(buf2d, p['conv1_w_nk'], k_valid=c_used,
                         pre=(p['n1_scale'], p['n1_shift']),
                         post=(p['n2_scale'], p['n2_shift']), post_relu=True,
                         out_dtype=jnp.bfloat16)
    mid4 = mid.reshape(-1, B, H, W)
    # conv2 3x3 (input already activated; zero padding matches torch).
    a = im2col_cm(mid4, 3, 3, stride=1, padding=1)
    y = fused_matmul_t(a, p['conv2_w_nk'], out_dtype=jnp.float32)
    y = scsa_forward_cm(y.reshape(growth, B, H, W), p['scsa'], head_num=8)
    return y.reshape(growth, B * H * W).astype(jnp.bfloat16)


def dense_block_forward(x_init, block):
    C0, B, H, W = x_init.shape
    M = B * H * W
    growth = block['layers'][0]['conv2_w_nk'].shape[0]
    C_final = C0 + len(block['layers']) * growth
    # Pre-allocated per-block feature buffer: each layer writes its `growth`
    # new channel rows in place instead of re-concatenating the full tensor.
    # TODO(synk): a Pallas copy kernel with input_output_aliases would make the
    # in-place write unconditional; the static-slice .at[].set (DUS) suffices.
    buf = jnp.zeros((C_final, M), jnp.bfloat16)
    buf = buf.at[:C0, :].set(x_init.reshape(C0, M).astype(jnp.bfloat16))
    c_used = C0
    for lp in block['layers']:
        new = dense_layer_forward(buf, c_used, (B, H, W), lp)
        buf = buf.at[c_used:c_used + growth, :].set(new)
        c_used += growth
    return buf.reshape(C_final, B, H, W)


def transition_forward(x, p):
    # norm -> relu (elementwise), then 2x2 average pool, THEN the 1x1 conv:
    # pool and a 1x1 conv commute, so the Pallas matmul runs on M/4 rows.
    z = jnp.maximum(x.astype(jnp.float32) * p['n_scale'][:, None, None, None]
                    + p['n_shift'][:, None, None, None], 0.0)
    z = avgpool_cm(z, 2, 2)
    C, B, H2, W2 = z.shape
    y = fused_matmul_t(z.reshape(C, B * H2 * W2).astype(jnp.bfloat16),
                       p['conv_w_nk'], out_dtype=jnp.bfloat16)
    return y.reshape(-1, B, H2, W2)


def densenet_forward(x_nchw, params):
    B, _, H, W = x_nchw.shape
    # NCHW -> channel-major (C, B, H, W): B*H*W stays on the 128-lane axis.
    x = jnp.transpose(x_nchw, (1, 0, 2, 3)).astype(jnp.float32)

    # conv0 (7x7 / stride 2) with norm0 + relu0 fused as the matmul epilogue.
    Ho, Wo = (H + 6 - 7) // 2 + 1, (W + 6 - 7) // 2 + 1
    a = im2col_cm(x, 7, 7, stride=2, padding=3)
    y = fused_matmul_t(a, params['conv0_w_nk'],
                       post=(params['n0_scale'], params['n0_shift']),
                       post_relu=True, out_dtype=jnp.bfloat16)
    x = maxpool_cm(y.reshape(-1, B, Ho, Wo), 3, 2, 1)

    n_blocks = len(params['blocks'])
    for bi, block in enumerate(params['blocks']):
        x = dense_block_forward(x, block)
        if bi != n_blocks - 1:
            x = transition_forward(x, params['transitions'][bi])

    # norm5 + relu + global average pool + classifier: tiny -> plain XLA.
    x = jnp.maximum(x.astype(jnp.float32) * params['n5_scale'][:, None, None, None]
                    + params['n5_shift'][:, None, None, None], 0.0)
    feat = x.mean(axis=(2, 3))                               # (C, B)
    return jnp.dot(params['cls_w'], feat).T + params['cls_b'][None, :]


# ------------------------------- Param init ----------------------------------

class KeyGen:
    def __init__(self, key):
        self.key = key

    def __call__(self):
        self.key, sub = jax.random.split(self.key)
        return sub


def _kaiming_normal(key, shape):
    fan_in = 1
    for d in shape[1:]:
        fan_in *= d
    std = math.sqrt(2.0 / fan_in)
    return std * jax.random.normal(key, shape, dtype=jnp.float32)


def _bn_fold(c, eps=1e-5):
    # Eval-mode BatchNorm, fresh PyTorch stats: mean=0, var=1, gamma=1, beta=0.
    scale = jnp.full((c,), 1.0 / math.sqrt(1.0 + eps), dtype=jnp.float32)
    shift = jnp.zeros((c,), dtype=jnp.float32)
    return scale, shift


def init_scsa(kg, dim):
    gc = dim // 4
    w9 = jnp.zeros((dim, 9), jnp.float32)
    b = jnp.zeros((dim,), jnp.float32)
    for gi, ks in enumerate((3, 5, 7, 9)):
        lo = 4 - ks // 2
        w9 = w9.at[gi * gc:(gi + 1) * gc, lo:lo + ks].set(
            0.3 * jax.random.normal(kg(), (gc, ks), dtype=jnp.float32))
        b = b.at[gi * gc:(gi + 1) * gc].set(
            0.05 * jax.random.normal(kg(), (gc,), dtype=jnp.float32))
    return {'dwc_w9': w9, 'dwc_b': b,
            'norm_h_g': jnp.ones((dim,), jnp.float32),
            'norm_h_b': jnp.zeros((dim,), jnp.float32),
            'norm_w_g': jnp.ones((dim,), jnp.float32),
            'norm_w_b': jnp.zeros((dim,), jnp.float32),
            'norm_g': jnp.ones((dim,), jnp.float32),
            'norm_b': jnp.zeros((dim,), jnp.float32),
            'q_w': _kaiming_normal(kg(), (dim, 1, 1, 1)).reshape(dim),
            'k_w': _kaiming_normal(kg(), (dim, 1, 1, 1)).reshape(dim),
            'v_w': _kaiming_normal(kg(), (dim, 1, 1, 1)).reshape(dim)}


def init_dense_layer(kg, input_c, growth_rate, bn_size):
    mid = bn_size * growth_rate
    p = {}
    p['n1_scale'], p['n1_shift'] = _bn_fold(input_c)
    p['conv1_w_nk'] = _conv_nk(_kaiming_normal(kg(), (mid, input_c, 1, 1)))
    p['n2_scale'], p['n2_shift'] = _bn_fold(mid)
    p['conv2_w_nk'] = _conv_nk(_kaiming_normal(kg(), (growth_rate, mid, 3, 3)))
    p['scsa'] = init_scsa(kg, growth_rate)
    return p


def init_densenet(key, growth_rate=16, block_config=(2, 2),
                  num_init_features=16, bn_size=2, num_classes=10):
    kg = KeyGen(key)
    params = {}
    params['conv0_w_nk'] = _conv_nk(
        _kaiming_normal(kg(), (num_init_features, 3, 7, 7)))
    params['n0_scale'], params['n0_shift'] = _bn_fold(num_init_features)
    num_features = num_init_features
    blocks, transitions = [], []
    for i, num_layers in enumerate(block_config):
        layers = [init_dense_layer(kg, num_features + li * growth_rate,
                                   growth_rate, bn_size)
                  for li in range(num_layers)]
        blocks.append({'layers': layers})
        num_features += num_layers * growth_rate
        if i != len(block_config) - 1:
            out_c = num_features // 2
            t = {}
            t['n_scale'], t['n_shift'] = _bn_fold(num_features)
            t['conv_w_nk'] = _conv_nk(
                _kaiming_normal(kg(), (out_c, num_features, 1, 1)))
            transitions.append(t)
            num_features = out_c
    params['blocks'] = blocks
    params['transitions'] = transitions
    params['n5_scale'], params['n5_shift'] = _bn_fold(num_features)
    params['cls_w'] = 0.05 * jax.random.normal(
        kg(), (num_classes, num_features), dtype=jnp.float32)
    params['cls_b'] = jnp.zeros((num_classes,), jnp.float32)
    return params


# ---------------------------------- main -------------------------------------

if __name__ == "__main__":
    key = jax.random.PRNGKey(0)
    k_param, k_data = jax.random.split(key)

    # Small DenseNet-BC: growth_rate=16 (head_num=8 -> head_dim=2),
    # block_config=(2,2), num_init_features=16, bn_size=2, num_classes=10.
    params = init_densenet(k_param, growth_rate=16, block_config=(2, 2),
                           num_init_features=16, bn_size=2, num_classes=10)

    # Input (NCHW, PyTorch convention): 64x64 so SCSA's 7x7/7 avg-pool is valid
    # in every dense block (spatial 16x16 in block 1, 8x8 in block 2).
    x = jax.random.normal(k_data, (2, 3, 64, 64), dtype=jnp.float32)

    fwd = jax.jit(lambda inp: densenet_forward(inp, params))
    logits = fwd(x)
    jax.block_until_ready(logits)
    assert logits.shape == (2, 10)
    print("KERNEL_OK")
</pallas_src>

<mosaic_0001>
module attributes {stable_mosaic.version = 11 : i64} {
  func.func @kernel(%arg0: i32, %arg1: memref<147x2048xbf16, #tpu.memory_space<vmem>>, %arg2: memref<16x147xbf16, #tpu.memory_space<vmem>>, %arg3: memref<16x1xf32, #tpu.memory_space<vmem>>, %arg4: memref<16x1xf32, #tpu.memory_space<vmem>>, %arg5: memref<16x2048xbf16, #tpu.memory_space<vmem>>) attributes {dimension_semantics = [#tpu.dimension_semantics<parallel>], iteration_bounds = array<i64: 1>, scalar_prefetch = 0 : i64, scratch_operands = 0 : i64, tpu.core_type = #tpu.core_type<tc>, window_params = [{transform_indices = @transform_0, window_bounds = array<i64: 147, 2048>}, {pipeline_mode = #tpu.pipeline_mode<synchronous>, transform_indices = @transform_1, window_bounds = array<i64: 16, 147>}, {pipeline_mode = #tpu.pipeline_mode<synchronous>, transform_indices = @transform_2, window_bounds = array<i64: 16, 1>}, {pipeline_mode = #tpu.pipeline_mode<synchronous>, transform_indices = @transform_3, window_bounds = array<i64: 16, 1>}, {transform_indices = @transform_4, window_bounds = array<i64: 16, 2048>}]} {
    %c0 = arith.constant 0 : index
    %c0_0 = arith.constant 0 : index
    %0 = vector.load %arg1[%c0, %c0_0] : memref<147x2048xbf16, #tpu.memory_space<vmem>>, vector<147x2048xbf16>
    %c0_1 = arith.constant 0 : index
    %c0_2 = arith.constant 0 : index
    %1 = vector.load %arg2[%c0_1, %c0_2] : memref<16x147xbf16, #tpu.memory_space<vmem>>, vector<16x147xbf16>
    %cst = arith.constant dense<0.000000e+00> : vector<16x2048xf32>
    %2 = tpu.matmul %1, %0, %cst {dimension_numbers = #tpu.dot_dimension_numbers<[1], [0], [0], [1], [0, 0, 1, 1], [], []>} : vector<16x147xbf16>, vector<147x2048xbf16>, vector<16x2048xf32> -> vector<16x2048xf32>
    %c0_3 = arith.constant 0 : index
    %c0_4 = arith.constant 0 : index
    %3 = vector.load %arg3[%c0_3, %c0_4] : memref<16x1xf32, #tpu.memory_space<vmem>>, vector<16x1xf32>
    %4 = vector.broadcast %3 : vector<16x1xf32> to vector<16x2048xf32>
    %5 = arith.mulf %2, %4 : vector<16x2048xf32>
    %c0_5 = arith.constant 0 : index
    %c0_6 = arith.constant 0 : index
    %6 = vector.load %arg4[%c0_5, %c0_6] : memref<16x1xf32, #tpu.memory_space<vmem>>, vector<16x1xf32>
    %7 = vector.broadcast %6 : vector<16x1xf32> to vector<16x2048xf32>
    %8 = arith.addf %5, %7 : vector<16x2048xf32>
    %cst_7 = arith.constant 0.000000e+00 : f32
    %9 = vector.broadcast %cst_7 : f32 to vector<16x2048xf32>
    %10 = arith.maximumf %8, %9 : vector<16x2048xf32>
    %11 = arith.truncf %10 : vector<16x2048xf32> to vector<16x2048xbf16>
    %c0_8 = arith.constant 0 : index
    %c0_9 = arith.constant 0 : index
    %12 = vector.load %arg5[%c0_8, %c0_9] : memref<16x2048xbf16, #tpu.memory_space<vmem>>, vector<16x2048xbf16>
    tpu.vector_store %arg5[%c0_8, %c0_9], %11 {strides = array<i32>} : memref<16x2048xbf16, #tpu.memory_space<vmem>>, vector<16x2048xbf16>,
    return
  }
  func.func @transform_0(%arg0: i32) -> (i32, i32) {
    %c0_i32 = arith.constant 0 : i32
    %c0_i32_0 = arith.constant 0 : i32
    return %c0_i32, %arg0 : i32, i32
  }
  func.func @transform_1(%arg0: i32) -> (i32, i32) {
    %c0_i32 = arith.constant 0 : i32
    %c0_i32_0 = arith.constant 0 : i32
    %c0_i32_1 = arith.constant 0 : i32
    return %c0_i32, %c0_i32_0 : i32, i32
  }
  func.func @transform_2(%arg0: i32) -> (i32, i32) {
    %c0_i32 = arith.constant 0 : i32
    %c0_i32_0 = arith.constant 0 : i32
    %c0_i32_1 = arith.constant 0 : i32
    return %c0_i32, %c0_i32_0 : i32, i32
  }
  func.func @transform_3(%arg0: i32) -> (i32, i32) {
    %c0_i32 = arith.constant 0 : i32
    %c0_i32_0 = arith.constant 0 : i32
    %c0_i32_1 = arith.constant 0 : i32
    return %c0_i32, %c0_i32_0 : i32, i32
  }
  func.func @transform_4(%arg0: i32) -> (i32, i32) {
    %c0_i32 = arith.constant 0 : i32
    %c0_i32_0 = arith.constant 0 : i32
    return %c0_i32, %arg0 : i32, i32
  }
}

module attributes {stable_mosaic.version = 11 : i64} {
  func.func @kernel(%arg0: i32, %arg1: memref<16x512xbf16, #tpu.memory_space<vmem>>, %arg2: memref<32x16xbf16, #tpu.memory_space<vmem>>, %arg3: memref<16x1xf32, #tpu.memory_space<vmem>>, %arg4: memref<16x1xf32, #tpu.memory_space<vmem>>, %arg5: memref<32x1xf32, #tpu.memory_space<vmem>>, %arg6: memref<32x1xf32, #tpu.memory_space<vmem>>, %arg7: memref<32x512xbf16, #tpu.memory_space<vmem>>) attributes {dimension_semantics = [#tpu.dimension_semantics<parallel>], iteration_bounds = array<i64: 1>, scalar_prefetch = 0 : i64, scratch_operands = 0 : i64, tpu.core_type = #tpu.core_type<tc>, window_params = [{transform_indices = @transform_0, window_bounds = array<i64: 16, 512>}, {pipeline_mode = #tpu.pipeline_mode<synchronous>, transform_indices = @transform_1, window_bounds = array<i64: 32, 16>}, {pipeline_mode = #tpu.pipeline_mode<synchronous>, transform_indices = @transform_2, window_bounds = array<i64: 16, 1>}, {pipeline_mode = #tpu.pipeline_mode<synchronous>, transform_indices = @transform_3, window_bounds = array<i64: 16, 1>}, {pipeline_mode = #tpu.pipeline_mode<synchronous>, transform_indices = @transform_4, window_bounds = array<i64: 32, 1>}, {pipeline_mode = #tpu.pipeline_mode<synchronous>, transform_indices = @transform_5, window_bounds = array<i64: 32, 1>}, {transform_indices = @transform_6, window_bounds = array<i64: 32, 512>}]} {
    %c0 = arith.constant 0 : index
    %c0_0 = arith.constant 0 : index
    %0 = vector.load %arg1[%c0, %c0_0] : memref<16x512xbf16, #tpu.memory_space<vmem>>, vector<16x512xbf16>
    %1 = arith.extf %0 : vector<16x512xbf16> to vector<16x512xf32>
    %c0_1 = arith.constant 0 : index
    %c0_2 = arith.constant 0 : index
    %2 = vector.load %arg3[%c0_1, %c0_2] : memref<16x1xf32, #tpu.memory_space<vmem>>, vector<16x1xf32>
    %3 = vector.broadcast %2 : vector<16x1xf32> to vector<16x512xf32>
    %4 = arith.mulf %1, %3 : vector<16x512xf32>
    %c0_3 = arith.constant 0 : index
    %c0_4 = arith.constant 0 : index
    %5 = vector.load %arg4[%c0_3, %c0_4] : memref<16x1xf32, #tpu.memory_space<vmem>>, vector<16x1xf32>
    %6 = vector.broadcast %5 : vector<16x1xf32> to vector<16x512xf32>
    %7 = arith.addf %4, %6 : vector<16x512xf32>
    %cst = arith.constant 0.000000e+00 : f32
    %8 = vector.broadcast %cst : f32 to vector<16x512xf32>
    %9 = arith.maximumf %7, %8 : vector<16x512xf32>
    %c0_5 = arith.constant 0 : index
    %c0_6 = arith.constant 0 : index
    %10 = vector.load %arg2[%c0_5, %c0_6] : memref<32x16xbf16, #tpu.memory_space<vmem>>, vector<32x16xbf16>
    %11 = arith.truncf %9 : vector<16x512xf32> to vector<16x512xbf16>
    %cst_7 = arith.constant dense<0.000000e+00> : vector<32x512xf32>
    %12 = tpu.matmul %10, %11, %cst_7 {dimension_numbers = #tpu.dot_dimension_numbers<[1], [0], [0], [1], [0, 0, 1, 1], [], []>} : vector<32x16xbf16>, vector<16x512xbf16>, vector<32x512xf32> -> vector<32x512xf32>
    %c0_8 = arith.constant 0 : index
    %c0_9 = arith.constant 0 : index
    %13 = vector.load %arg5[%c0_8, %c0_9] : memref<32x1xf32, #tpu.memory_space<vmem>>, vector<32x1xf32>
    %14 = vector.broadcast %13 : vector<32x1xf32> to vector<32x512xf32>
    %15 = arith.mulf %12, %14 : vector<32x512xf32>
    %c0_10 = arith.constant 0 : index
    %c0_11 = arith.constant 0 : index
    %16 = vector.load %arg6[%c0_10, %c0_11] : memref<32x1xf32, #tpu.memory_space<vmem>>, vector<32x1xf32>
    %17 = vector.broadcast %16 : vector<32x1xf32> to vector<32x512xf32>
    %18 = arith.addf %15, %17 : vector<32x512xf32>
    %cst_12 = arith.constant 0.000000e+00 : f32
    %19 = vector.broadcast %cst_12 : f32 to vector<32x512xf32>
    %20 = arith.maximumf %18, %19 : vector<32x512xf32>
    %21 = arith.truncf %20 : vector<32x512xf32> to vector<32x512xbf16>
    %c0_13 = arith.constant 0 : index
    %c0_14 = arith.constant 0 : index
    %22 = vector.load %arg7[%c0_13, %c0_14] : memref<32x512xbf16, #tpu.memory_space<vmem>>, vector<32x512xbf16>
    tpu.vector_store %arg7[%c0_13, %c0_14], %21 {strides = array<i32>} : memref<32x512xbf16, #tpu.memory_space<vmem>>, vector<32x512xbf16>,
    return
  }
  func.func @transform_0(%arg0: i32) -> (i32, i32) {
    %c0_i32 = arith.constant 0 : i32
    %c0_i32_0 = arith.constant 0 : i32
    return %c0_i32, %arg0 : i32, i32
  }
  func.func @transform_1(%arg0: i32) -> (i32, i32) {
    %c0_i32 = arith.constant 0 : i32
    %c0_i32_0 = arith.constant 0 : i32
    %c0_i32_1 = arith.constant 0 : i32
    return %c0_i32, %c0_i32_0 : i32, i32
  }
  func.func @transform_2(%arg0: i32) -> (i32, i32) {
    %c0_i32 = arith.constant 0 : i32
    %c0_i32_0 = arith.constant 0 : i32
    %c0_i32_1 = arith.constant 0 : i32
    return %c0_i32, %c0_i32_0 : i32, i32
  }
  func.func @transform_3(%arg0: i32) -> (i32, i32) {
    %c0_i32 = arith.constant 0 : i32
    %c0_i32_0 = arith.constant 0 : i32
    %c0_i32_1 = arith.constant 0 : i32
    return %c0_i32, %c0_i32_0 : i32, i32
  }
  func.func @transform_4(%arg0: i32) -> (i32, i32) {
    %c0_i32 = arith.constant 0 : i32
    %c0_i32_0 = arith.constant 0 : i32
    %c0_i32_1 = arith.constant 0 : i32
    return %c0_i32, %c0_i32_0 : i32, i32
  }
  func.func @transform_5(%arg0: i32) -> (i32, i32) {
    %c0_i32 = arith.constant 0 : i32
    %c0_i32_0 = arith.constant 0 : i32
    %c0_i32_1 = arith.constant 0 : i32
    return %c0_i32, %c0_i32_0 : i32, i32
  }
  func.func @transform_6(%arg0: i32) -> (i32, i32) {
    %c0_i32 = arith.constant 0 : i32
    %c0_i32_0 = arith.constant 0 : i32
    return %c0_i32, %arg0 : i32, i32
  }
}

module attributes {stable_mosaic.version = 11 : i64} {
  func.func @kernel(%arg0: i32, %arg1: memref<288x512xbf16, #tpu.memory_space<vmem>>, %arg2: memref<16x288xbf16, #tpu.memory_space<vmem>>, %arg3: memref<16x512xf32, #tpu.memory_space<vmem>>) attributes {dimension_semantics = [#tpu.dimension_semantics<parallel>], iteration_bounds = array<i64: 1>, scalar_prefetch = 0 : i64, scratch_operands = 0 : i64, tpu.core_type = #tpu.core_type<tc>, window_params = [{transform_indices = @transform_0, window_bounds = array<i64: 288, 512>}, {pipeline_mode = #tpu.pipeline_mode<synchronous>, transform_indices = @transform_1, window_bounds = array<i64: 16, 288>}, {transform_indices = @transform_2, window_bounds = array<i64: 16, 512>}]} {
    %c0 = arith.constant 0 : index
    %c0_0 = arith.constant 0 : index
    %0 = vector.load %arg1[%c0, %c0_0] : memref<288x512xbf16, #tpu.memory_space<vmem>>, vector<288x512xbf16>
    %c0_1 = arith.constant 0 : index
    %c0_2 = arith.constant 0 : index
    %1 = vector.load %arg2[%c0_1, %c0_2] : memref<16x288xbf16, #tpu.memory_space<vmem>>, vector<16x288xbf16>
    %cst = arith.constant dense<0.000000e+00> : vector<16x512xf32>
    %2 = tpu.matmul %1, %0, %cst {dimension_numbers = #tpu.dot_dimension_numbers<[1], [0], [0], [1], [0, 0, 1, 1], [], []>} : vector<16x288xbf16>, vector<288x512xbf16>, vector<16x512xf32> -> vector<16x512xf32>
    %c0_3 = arith.constant 0 : index
    %c0_4 = arith.constant 0 : index
    %3 = vector.load %arg3[%c0_3, %c0_4] : memref<16x512xf32, #tpu.memory_space<vmem>>, vector<16x512xf32>
    tpu.vector_store %arg3[%c0_3, %c0_4], %2 {strides = array<i32>} : memref<16x512xf32, #tpu.memory_space<vmem>>, vector<16x512xf32>,
    return
  }
  func.func @transform_0(%arg0: i32) -> (i32, i32) {
    %c0_i32 = arith.constant 0 : i32
    %c0_i32_0 = arith.constant 0 : i32
    return %c0_i32, %arg0 : i32, i32
  }
  func.func @transform_1(%arg0: i32) -> (i32, i32) {
    %c0_i32 = arith.constant 0 : i32
    %c0_i32_0 = arith.constant 0 : i32
    %c0_i32_1 = arith.constant 0 : i32
    return %c0_i32, %c0_i32_0 : i32, i32
  }
  func.func @transform_2(%arg0: i32) -> (i32, i32) {
    %c0_i32 = arith.constant 0 : i32
    %c0_i32_0 = arith.constant 0 : i32
    return %c0_i32, %arg0 : i32, i32
  }
}

module attributes {stable_mosaic.version = 11 : i64} {
  func.func @kernel(%arg0: i32, %arg1: memref<32x512xbf16, #tpu.memory_space<vmem>>, %arg2: memref<32x32xbf16, #tpu.memory_space<vmem>>, %arg3: memref<32x1xf32, #tpu.memory_space<vmem>>, %arg4: memref<32x1xf32, #tpu.memory_space<vmem>>, %arg5: memref<32x1xf32, #tpu.memory_space<vmem>>, %arg6: memref<32x1xf32, #tpu.memory_space<vmem>>, %arg7: memref<32x512xbf16, #tpu.memory_space<vmem>>) attributes {dimension_semantics = [#tpu.dimension_semantics<parallel>], iteration_bounds = array<i64: 1>, scalar_prefetch = 0 : i64, scratch_operands = 0 : i64, tpu.core_type = #tpu.core_type<tc>, window_params = [{transform_indices = @transform_0, window_bounds = array<i64: 32, 512>}, {pipeline_mode = #tpu.pipeline_mode<synchronous>, transform_indices = @transform_1, window_bounds = array<i64: 32, 32>}, {pipeline_mode = #tpu.pipeline_mode<synchronous>, transform_indices = @transform_2, window_bounds = array<i64: 32, 1>}, {pipeline_mode = #tpu.pipeline_mode<synchronous>, transform_indices = @transform_3, window_bounds = array<i64: 32, 1>}, {pipeline_mode = #tpu.pipeline_mode<synchronous>, transform_indices = @transform_4, window_bounds = array<i64: 32, 1>}, {pipeline_mode = #tpu.pipeline_mode<synchronous>, transform_indices = @transform_5, window_bounds = array<i64: 32, 1>}, {transform_indices = @transform_6, window_bounds = array<i64: 32, 512>}]} {
    %c0 = arith.constant 0 : index
    %c0_0 = arith.constant 0 : index
    %0 = vector.load %arg1[%c0, %c0_0] : memref<32x512xbf16, #tpu.memory_space<vmem>>, vector<32x512xbf16>
    %1 = arith.extf %0 : vector<32x512xbf16> to vector<32x512xf32>
    %c0_1 = arith.constant 0 : index
    %c0_2 = arith.constant 0 : index
    %2 = vector.load %arg3[%c0_1, %c0_2] : memref<32x1xf32, #tpu.memory_space<vmem>>, vector<32x1xf32>
    %3 = vector.broadcast %2 : vector<32x1xf32> to vector<32x512xf32>
    %4 = arith.mulf %1, %3 : vector<32x512xf32>
    %c0_3 = arith.constant 0 : index
    %c0_4 = arith.constant 0 : index
    %5 = vector.load %arg4[%c0_3, %c0_4] : memref<32x1xf32, #tpu.memory_space<vmem>>, vector<32x1xf32>
    %6 = vector.broadcast %5 : vector<32x1xf32> to vector<32x512xf32>
    %7 = arith.addf %4, %6 : vector<32x512xf32>
    %cst = arith.constant 0.000000e+00 : f32
    %8 = vector.broadcast %cst : f32 to vector<32x512xf32>
    %9 = arith.maximumf %7, %8 : vector<32x512xf32>
    %c0_5 = arith.constant 0 : index
    %c0_6 = arith.constant 0 : index
    %10 = vector.load %arg2[%c0_5, %c0_6] : memref<32x32xbf16, #tpu.memory_space<vmem>>, vector<32x32xbf16>
    %11 = arith.truncf %9 : vector<32x512xf32> to vector<32x512xbf16>
    %cst_7 = arith.constant dense<0.000000e+00> : vector<32x512xf32>
    %12 = tpu.matmul %10, %11, %cst_7 {dimension_numbers = #tpu.dot_dimension_numbers<[1], [0], [0], [1], [0, 0, 1, 1], [], []>} : vector<32x32xbf16>, vector<32x512xbf16>, vector<32x512xf32> -> vector<32x512xf32>
    %c0_8 = arith.constant 0 : index
    %c0_9 = arith.constant 0 : index
    %13 = vector.load %arg5[%c0_8, %c0_9] : memref<32x1xf32, #tpu.memory_space<vmem>>, vector<32x1xf32>
    %14 = vector.broadcast %13 : vector<32x1xf32> to vector<32x512xf32>
    %15 = arith.mulf %12, %14 : vector<32x512xf32>
    %c0_10 = arith.constant 0 : index
    %c0_11 = arith.constant 0 : index
    %16 = vector.load %arg6[%c0_10, %c0_11] : memref<32x1xf32, #tpu.memory_space<vmem>>, vector<32x1xf32>
    %17 = vector.broadcast %16 : vector<32x1xf32> to vector<32x512xf32>
    %18 = arith.addf %15, %17 : vector<32x512xf32>
    %cst_12 = arith.constant 0.000000e+00 : f32
    %19 = vector.broadcast %cst_12 : f32 to vector<32x512xf32>
    %20 = arith.maximumf %18, %19 : vector<32x512xf32>
    %21 = arith.truncf %20 : vector<32x512xf32> to vector<32x512xbf16>
    %c0_13 = arith.constant 0 : index
    %c0_14 = arith.constant 0 : index
    %22 = vector.load %arg7[%c0_13, %c0_14] : memref<32x512xbf16, #tpu.memory_space<vmem>>, vector<32x512xbf16>
    tpu.vector_store %arg7[%c0_13, %c0_14], %21 {strides = array<i32>} : memref<32x512xbf16, #tpu.memory_space<vmem>>, vector<32x512xbf16>,
    return
  }
  func.func @transform_0(%arg0: i32) -> (i32, i32) {
    %c0_i32 = arith.constant 0 : i32
    %c0_i32_0 = arith.constant 0 : i32
    return %c0_i32, %arg0 : i32, i32
  }
  func.func @transform_1(%arg0: i32) -> (i32, i32) {
    %c0_i32 = arith.constant 0 : i32
    %c0_i32_0 = arith.constant 0 : i32
    %c0_i32_1 = arith.constant 0 : i32
    return %c0_i32, %c0_i32_0 : i32, i32
  }
  func.func @transform_2(%arg0: i32) -> (i32, i32) {
    %c0_i32 = arith.constant 0 : i32
    %c0_i32_0 = arith.constant 0 : i32
    %c0_i32_1 = arith.constant 0 : i32
    return %c0_i32, %c0_i32_0 : i32, i32
  }
  func.func @transform_3(%arg0: i32) -> (i32, i32) {
    %c0_i32 = arith.constant 0 : i32
    %c0_i32_0 = arith.constant 0 : i32
    %c0_i32_1 = arith.constant 0 : i32
    return %c0_i32, %c0_i32_0 : i32, i32
  }
  func.func @transform_4(%arg0: i32) -> (i32, i32) {
    %c0_i32 = arith.constant 0 : i32
    %c0_i32_0 = arith.constant 0 : i32
    %c0_i32_1 = arith.constant 0 : i32
    return %c0_i32, %c0_i32_0 : i32, i32
  }
  func.func @transform_5(%arg0: i32) -> (i32, i32) {
    %c0_i32 = arith.constant 0 : i32
    %c0_i32_0 = arith.constant 0 : i32
    %c0_i32_1 = arith.constant 0 : i32
    return %c0_i32, %c0_i32_0 : i32, i32
  }
  func.func @transform_6(%arg0: i32) -> (i32, i32) {
    %c0_i32 = arith.constant 0 : i32
    %c0_i32_0 = arith.constant 0 : i32
    return %c0_i32, %arg0 : i32, i32
  }
}

module attributes {stable_mosaic.version = 11 : i64} {
  func.func @kernel(%arg0: i32, %arg1: memref<48x128xbf16, #tpu.memory_space<vmem>>, %arg2: memref<24x48xbf16, #tpu.memory_space<vmem>>, %arg3: memref<24x128xbf16, #tpu.memory_space<vmem>>) attributes {dimension_semantics = [#tpu.dimension_semantics<parallel>], iteration_bounds = array<i64: 1>, scalar_prefetch = 0 : i64, scratch_operands = 0 : i64, tpu.core_type = #tpu.core_type<tc>, window_params = [{transform_indices = @transform_0, window_bounds = array<i64: 48, 128>}, {pipeline_mode = #tpu.pipeline_mode<synchronous>, transform_indices = @transform_1, window_bounds = array<i64: 24, 48>}, {transform_indices = @transform_2, window_bounds = array<i64: 24, 128>}]} {
    %c0 = arith.constant 0 : index
    %c0_0 = arith.constant 0 : index
    %0 = vector.load %arg1[%c0, %c0_0] : memref<48x128xbf16, #tpu.memory_space<vmem>>, vector<48x128xbf16>
    %c0_1 = arith.constant 0 : index
    %c0_2 = arith.constant 0 : index
    %1 = vector.load %arg2[%c0_1, %c0_2] : memref<24x48xbf16, #tpu.memory_space<vmem>>, vector<24x48xbf16>
    %cst = arith.constant dense<0.000000e+00> : vector<24x128xf32>
    %2 = tpu.matmul %1, %0, %cst {dimension_numbers = #tpu.dot_dimension_numbers<[1], [0], [0], [1], [0, 0, 1, 1], [], []>} : vector<24x48xbf16>, vector<48x128xbf16>, vector<24x128xf32> -> vector<24x128xf32>
    %3 = arith.truncf %2 : vector<24x128xf32> to vector<24x128xbf16>
    %c0_3 = arith.constant 0 : index
    %c0_4 = arith.constant 0 : index
    %4 = vector.load %arg3[%c0_3, %c0_4] : memref<24x128xbf16, #tpu.memory_space<vmem>>, vector<24x128xbf16>
    tpu.vector_store %arg3[%c0_3, %c0_4], %3 {strides = array<i32>} : memref<24x128xbf16, #tpu.memory_space<vmem>>, vector<24x128xbf16>,
    return
  }
  func.func @transform_0(%arg0: i32) -> (i32, i32) {
    %c0_i32 = arith.constant 0 : i32
    %c0_i32_0 = arith.constant 0 : i32
    return %c0_i32, %arg0 : i32, i32
  }
  func.func @transform_1(%arg0: i32) -> (i32, i32) {
    %c0_i32 = arith.constant 0 : i32
    %c0_i32_0 = arith.constant 0 : i32
    %c0_i32_1 = arith.constant 0 : i32
    return %c0_i32, %c0_i32_0 : i32, i32
  }
  func.func @transform_2(%arg0: i32) -> (i32, i32) {
    %c0_i32 = arith.constant 0 : i32
    %c0_i32_0 = arith.constant 0 : i32
    return %c0_i32, %arg0 : i32, i32
  }
}

module attributes {stable_mosaic.version = 11 : i64} {
  func.func @kernel(%arg0: i32, %arg1: memref<24x128xbf16, #tpu.memory_space<vmem>>, %arg2: memref<32x24xbf16, #tpu.memory_space<vmem>>, %arg3: memref<24x1xf32, #tpu.memory_space<vmem>>, %arg4: memref<24x1xf32, #tpu.memory_space<vmem>>, %arg5: memref<32x1xf32, #tpu.memory_space<vmem>>, %arg6: memref<32x1xf32, #tpu.memory_space<vmem>>, %arg7: memref<32x128xbf16, #tpu.memory_space<vmem>>) attributes {dimension_semantics = [#tpu.dimension_semantics<parallel>], iteration_bounds = array<i64: 1>, scalar_prefetch = 0 : i64, scratch_operands = 0 : i64, tpu.core_type = #tpu.core_type<tc>, window_params = [{transform_indices = @transform_0, window_bounds = array<i64: 24, 128>}, {pipeline_mode = #tpu.pipeline_mode<synchronous>, transform_indices = @transform_1, window_bounds = array<i64: 32, 24>}, {pipeline_mode = #tpu.pipeline_mode<synchronous>, transform_indices = @transform_2, window_bounds = array<i64: 24, 1>}, {pipeline_mode = #tpu.pipeline_mode<synchronous>, transform_indices = @transform_3, window_bounds = array<i64: 24, 1>}, {pipeline_mode = #tpu.pipeline_mode<synchronous>, transform_indices = @transform_4, window_bounds = array<i64: 32, 1>}, {pipeline_mode = #tpu.pipeline_mode<synchronous>, transform_indices = @transform_5, window_bounds = array<i64: 32, 1>}, {transform_indices = @transform_6, window_bounds = array<i64: 32, 128>}]} {
    %c0 = arith.constant 0 : index
    %c0_0 = arith.constant 0 : index
    %0 = vector.load %arg1[%c0, %c0_0] : memref<24x128xbf16, #tpu.memory_space<vmem>>, vector<24x128xbf16>
    %1 = arith.extf %0 : vector<24x128xbf16> to vector<24x128xf32>
    %c0_1 = arith.constant 0 : index
    %c0_2 = arith.constant 0 : index
    %2 = vector.load %arg3[%c0_1, %c0_2] : memref<24x1xf32, #tpu.memory_space<vmem>>, vector<24x1xf32>
    %3 = vector.broadcast %2 : vector<24x1xf32> to vector<24x128xf32>
    %4 = arith.mulf %1, %3 : vector<24x128xf32>
    %c0_3 = arith.constant 0 : index
    %c0_4 = arith.constant 0 : index
    %5 = vector.load %arg4[%c0_3, %c0_4] : memref<24x1xf32, #tpu.memory_space<vmem>>, vector<24x1xf32>
    %6 = vector.broadcast %5 : vector<24x1xf32> to vector<24x128xf32>
    %7 = arith.addf %4, %6 : vector<24x128xf32>
    %cst = arith.constant 0.000000e+00 : f32
    %8 = vector.broadcast %cst : f32 to vector<24x128xf32>
    %9 = arith.maximumf %7, %8 : vector<24x128xf32>
    %c0_5 = arith.constant 0 : index
    %c0_6 = arith.constant 0 : index
    %10 = vector.load %arg2[%c0_5, %c0_6] : memref<32x24xbf16, #tpu.memory_space<vmem>>, vector<32x24xbf16>
    %11 = arith.truncf %9 : vector<24x128xf32> to vector<24x128xbf16>
    %cst_7 = arith.constant dense<0.000000e+00> : vector<32x128xf32>
    %12 = tpu.matmul %10, %11, %cst_7 {dimension_numbers = #tpu.dot_dimension_numbers<[1], [0], [0], [1], [0, 0, 1, 1], [], []>} : vector<32x24xbf16>, vector<24x128xbf16>, vector<32x128xf32> -> vector<32x128xf32>
    %c0_8 = arith.constant 0 : index
    %c0_9 = arith.constant 0 : index
    %13 = vector.load %arg5[%c0_8, %c0_9] : memref<32x1xf32, #tpu.memory_space<vmem>>, vector<32x1xf32>
    %14 = vector.broadcast %13 : vector<32x1xf32> to vector<32x128xf32>
    %15 = arith.mulf %12, %14 : vector<32x128xf32>
    %c0_10 = arith.constant 0 : index
    %c0_11 = arith.constant 0 : index
    %16 = vector.load %arg6[%c0_10, %c0_11] : memref<32x1xf32, #tpu.memory_space<vmem>>, vector<32x1xf32>
    %17 = vector.broadcast %16 : vector<32x1xf32> to vector<32x128xf32>
    %18 = arith.addf %15, %17 : vector<32x128xf32>
    %cst_12 = arith.constant 0.000000e+00 : f32
    %19 = vector.broadcast %cst_12 : f32 to vector<32x128xf32>
    %20 = arith.maximumf %18, %19 : vector<32x128xf32>
    %21 = arith.truncf %20 : vector<32x128xf32> to vector<32x128xbf16>
    %c0_13 = arith.constant 0 : index
    %c0_14 = arith.constant 0 : index
    %22 = vector.load %arg7[%c0_13, %c0_14] : memref<32x128xbf16, #tpu.memory_space<vmem>>, vector<32x128xbf16>
    tpu.vector_store %arg7[%c0_13, %c0_14], %21 {strides = array<i32>} : memref<32x128xbf16, #tpu.memory_space<vmem>>, vector<32x128xbf16>,
    return
  }
  func.func @transform_0(%arg0: i32) -> (i32, i32) {
    %c0_i32 = arith.constant 0 : i32
    %c0_i32_0 = arith.constant 0 : i32
    return %c0_i32, %arg0 : i32, i32
  }
  func.func @transform_1(%arg0: i32) -> (i32, i32) {
    %c0_i32 = arith.constant 0 : i32
    %c0_i32_0 = arith.constant 0 : i32
    %c0_i32_1 = arith.constant 0 : i32
    return %c0_i32, %c0_i32_0 : i32, i32
  }
  func.func @transform_2(%arg0: i32) -> (i32, i32) {
    %c0_i32 = arith.constant 0 : i32
    %c0_i32_0 = arith.constant 0 : i32
    %c0_i32_1 = arith.constant 0 : i32
    return %c0_i32, %c0_i32_0 : i32, i32
  }
  func.func @transform_3(%arg0: i32) -> (i32, i32) {
    %c0_i32 = arith.constant 0 : i32
    %c0_i32_0 = arith.constant 0 : i32
    %c0_i32_1 = arith.constant 0 : i32
    return %c0_i32, %c0_i32_0 : i32, i32
  }
  func.func @transform_4(%arg0: i32) -> (i32, i32) {
    %c0_i32 = arith.constant 0 : i32
    %c0_i32_0 = arith.constant 0 : i32
    %c0_i32_1 = arith.constant 0 : i32
    return %c0_i32, %c0_i32_0 : i32, i32
  }
  func.func @transform_5(%arg0: i32) -> (i32, i32) {
    %c0_i32 = arith.constant 0 : i32
    %c0_i32_0 = arith.constant 0 : i32
    %c0_i32_1 = arith.constant 0 : i32
    return %c0_i32, %c0_i32_0 : i32, i32
  }
  func.func @transform_6(%arg0: i32) -> (i32, i32) {
    %c0_i32 = arith.constant 0 : i32
    %c0_i32_0 = arith.constant 0 : i32
    return %c0_i32, %arg0 : i32, i32
  }
}

module attributes {stable_mosaic.version = 11 : i64} {
  func.func @kernel(%arg0: i32, %arg1: memref<288x128xbf16, #tpu.memory_space<vmem>>, %arg2: memref<16x288xbf16, #tpu.memory_space<vmem>>, %arg3: memref<16x128xf32, #tpu.memory_space<vmem>>) attributes {dimension_semantics = [#tpu.dimension_semantics<parallel>], iteration_bounds = array<i64: 1>, scalar_prefetch = 0 : i64, scratch_operands = 0 : i64, tpu.core_type = #tpu.core_type<tc>, window_params = [{transform_indices = @transform_0, window_bounds = array<i64: 288, 128>}, {pipeline_mode = #tpu.pipeline_mode<synchronous>, transform_indices = @transform_1, window_bounds = array<i64: 16, 288>}, {transform_indices = @transform_2, window_bounds = array<i64: 16, 128>}]} {
    %c0 = arith.constant 0 : index
    %c0_0 = arith.constant 0 : index
    %0 = vector.load %arg1[%c0, %c0_0] : memref<288x128xbf16, #tpu.memory_space<vmem>>, vector<288x128xbf16>
    %c0_1 = arith.constant 0 : index
    %c0_2 = arith.constant 0 : index
    %1 = vector.load %arg2[%c0_1, %c0_2] : memref<16x288xbf16, #tpu.memory_space<vmem>>, vector<16x288xbf16>
    %cst = arith.constant dense<0.000000e+00> : vector<16x128xf32>
    %2 = tpu.matmul %1, %0, %cst {dimension_numbers = #tpu.dot_dimension_numbers<[1], [0], [0], [1], [0, 0, 1, 1], [], []>} : vector<16x288xbf16>, vector<288x128xbf16>, vector<16x128xf32> -> vector<16x128xf32>
    %c0_3 = arith.constant 0 : index
    %c0_4 = arith.constant 0 : index
    %3 = vector.load %arg3[%c0_3, %c0_4] : memref<16x128xf32, #tpu.memory_space<vmem>>, vector<16x128xf32>
    tpu.vector_store %arg3[%c0_3, %c0_4], %2 {strides = array<i32>} : memref<16x128xf32, #tpu.memory_space<vmem>>, vector<16x128xf32>,
    return
  }
  func.func @transform_0(%arg0: i32) -> (i32, i32) {
    %c0_i32 = arith.constant 0 : i32
    %c0_i32_0 = arith.constant 0 : i32
    return %c0_i32, %arg0 : i32, i32
  }
  func.func @transform_1(%arg0: i32) -> (i32, i32) {
    %c0_i32 = arith.constant 0 : i32
    %c0_i32_0 = arith.constant 0 : i32
    %c0_i32_1 = arith.constant 0 : i32
    return %c0_i32, %c0_i32_0 : i32, i32
  }
  func.func @transform_2(%arg0: i32) -> (i32, i32) {
    %c0_i32 = arith.constant 0 : i32
    %c0_i32_0 = arith.constant 0 : i32
    return %c0_i32, %arg0 : i32, i32
  }
}

module attributes {stable_mosaic.version = 11 : i64} {
  func.func @kernel(%arg0: i32, %arg1: memref<40x128xbf16, #tpu.memory_space<vmem>>, %arg2: memref<32x40xbf16, #tpu.memory_space<vmem>>, %arg3: memref<40x1xf32, #tpu.memory_space<vmem>>, %arg4: memref<40x1xf32, #tpu.memory_space<vmem>>, %arg5: memref<32x1xf32, #tpu.memory_space<vmem>>, %arg6: memref<32x1xf32, #tpu.memory_space<vmem>>, %arg7: memref<32x128xbf16, #tpu.memory_space<vmem>>) attributes {dimension_semantics = [#tpu.dimension_semantics<parallel>], iteration_bounds = array<i64: 1>, scalar_prefetch = 0 : i64, scratch_operands = 0 : i64, tpu.core_type = #tpu.core_type<tc>, window_params = [{transform_indices = @transform_0, window_bounds = array<i64: 40, 128>}, {pipeline_mode = #tpu.pipeline_mode<synchronous>, transform_indices = @transform_1, window_bounds = array<i64: 32, 40>}, {pipeline_mode = #tpu.pipeline_mode<synchronous>, transform_indices = @transform_2, window_bounds = array<i64: 40, 1>}, {pipeline_mode = #tpu.pipeline_mode<synchronous>, transform_indices = @transform_3, window_bounds = array<i64: 40, 1>}, {pipeline_mode = #tpu.pipeline_mode<synchronous>, transform_indices = @transform_4, window_bounds = array<i64: 32, 1>}, {pipeline_mode = #tpu.pipeline_mode<synchronous>, transform_indices = @transform_5, window_bounds = array<i64: 32, 1>}, {transform_indices = @transform_6, window_bounds = array<i64: 32, 128>}]} {
    %c0 = arith.constant 0 : index
    %c0_0 = arith.constant 0 : index
    %0 = vector.load %arg1[%c0, %c0_0] : memref<40x128xbf16, #tpu.memory_space<vmem>>, vector<40x128xbf16>
    %1 = arith.extf %0 : vector<40x128xbf16> to vector<40x128xf32>
    %c0_1 = arith.constant 0 : index
    %c0_2 = arith.constant 0 : index
    %2 = vector.load %arg3[%c0_1, %c0_2] : memref<40x1xf32, #tpu.memory_space<vmem>>, vector<40x1xf32>
    %3 = vector.broadcast %2 : vector<40x1xf32> to vector<40x128xf32>
    %4 = arith.mulf %1, %3 : vector<40x128xf32>
    %c0_3 = arith.constant 0 : index
    %c0_4 = arith.constant 0 : index
    %5 = vector.load %arg4[%c0_3, %c0_4] : memref<40x1xf32, #tpu.memory_space<vmem>>, vector<40x1xf32>
    %6 = vector.broadcast %5 : vector<40x1xf32> to vector<40x128xf32>
    %7 = arith.addf %4, %6 : vector<40x128xf32>
    %cst = arith.constant 0.000000e+00 : f32
    %8 = vector.broadcast %cst : f32 to vector<40x128xf32>
    %9 = arith.maximumf %7, %8 : vector<40x128xf32>
    %c0_5 = arith.constant 0 : index
    %c0_6 = arith.constant 0 : index
    %10 = vector.load %arg2[%c0_5, %c0_6] : memref<32x40xbf16, #tpu.memory_space<vmem>>, vector<32x40xbf16>
    %11 = arith.truncf %9 : vector<40x128xf32> to vector<40x128xbf16>
    %cst_7 = arith.constant dense<0.000000e+00> : vector<32x128xf32>
    %12 = tpu.matmul %10, %11, %cst_7 {dimension_numbers = #tpu.dot_dimension_numbers<[1], [0], [0], [1], [0, 0, 1, 1], [], []>} : vector<32x40xbf16>, vector<40x128xbf16>, vector<32x128xf32> -> vector<32x128xf32>
    %c0_8 = arith.constant 0 : index
    %c0_9 = arith.constant 0 : index
    %13 = vector.load %arg5[%c0_8, %c0_9] : memref<32x1xf32, #tpu.memory_space<vmem>>, vector<32x1xf32>
    %14 = vector.broadcast %13 : vector<32x1xf32> to vector<32x128xf32>
    %15 = arith.mulf %12, %14 : vector<32x128xf32>
    %c0_10 = arith.constant 0 : index
    %c0_11 = arith.constant 0 : index
    %16 = vector.load %arg6[%c0_10, %c0_11] : memref<32x1xf32, #tpu.memory_space<vmem>>, vector<32x1xf32>
    %17 = vector.broadcast %16 : vector<32x1xf32> to vector<32x128xf32>
    %18 = arith.addf %15, %17 : vector<32x128xf32>
    %cst_12 = arith.constant 0.000000e+00 : f32
    %19 = vector.broadcast %cst_12 : f32 to vector<32x128xf32>
    %20 = arith.maximumf %18, %19 : vector<32x128xf32>
    %21 = arith.truncf %20 : vector<32x128xf32> to vector<32x128xbf16>
    %c0_13 = arith.constant 0 : index
    %c0_14 = arith.constant 0 : index
    %22 = vector.load %arg7[%c0_13, %c0_14] : memref<32x128xbf16, #tpu.memory_space<vmem>>, vector<32x128xbf16>
    tpu.vector_store %arg7[%c0_13, %c0_14], %21 {strides = array<i32>} : memref<32x128xbf16, #tpu.memory_space<vmem>>, vector<32x128xbf16>,
    return
  }
  func.func @transform_0(%arg0: i32) -> (i32, i32) {
    %c0_i32 = arith.constant 0 : i32
    %c0_i32_0 = arith.constant 0 : i32
    return %c0_i32, %arg0 : i32, i32
  }
  func.func @transform_1(%arg0: i32) -> (i32, i32) {
    %c0_i32 = arith.constant 0 : i32
    %c0_i32_0 = arith.constant 0 : i32
    %c0_i32_1 = arith.constant 0 : i32
    return %c0_i32, %c0_i32_0 : i32, i32
  }
  func.func @transform_2(%arg0: i32) -> (i32, i32) {
    %c0_i32 = arith.constant 0 : i32
    %c0_i32_0 = arith.constant 0 : i32
    %c0_i32_1 = arith.constant 0 : i32
    return %c0_i32, %c0_i32_0 : i32, i32
  }
  func.func @transform_3(%arg0: i32) -> (i32, i32) {
    %c0_i32 = arith.constant 0 : i32
    %c0_i32_0 = arith.constant 0 : i32
    %c0_i32_1 = arith.constant 0 : i32
    return %c0_i32, %c0_i32_0 : i32, i32
  }
  func.func @transform_4(%arg0: i32) -> (i32, i32) {
    %c0_i32 = arith.constant 0 : i32
    %c0_i32_0 = arith.constant 0 : i32
    %c0_i32_1 = arith.constant 0 : i32
    return %c0_i32, %c0_i32_0 : i32, i32
  }
  func.func @transform_5(%arg0: i32) -> (i32, i32) {
    %c0_i32 = arith.constant 0 : i32
    %c0_i32_0 = arith.constant 0 : i32
    %c0_i32_1 = arith.constant 0 : i32
    return %c0_i32, %c0_i32_0 : i32, i32
  }
  func.func @transform_6(%arg0: i32) -> (i32, i32) {
    %c0_i32 = arith.constant 0 : i32
    %c0_i32_0 = arith.constant 0 : i32
    return %c0_i32, %arg0 : i32, i32
  }
}

</mosaic_0001>

<bundles_post_ra>
// kernel: _lambda_.11
= control target key start
LH: loop header
LB: loop body
LE: loop exit
PB: predicated region body
PF: predicated region fallthrough
CT: control target
= control target key end

     0   :  { %v398_v0 = vmov 0   ;;  %vm102_vm0 = vcmask 130048   ;;  %s524_s3 = inlined_call_operand.vmem [shape: f32[16,1], index: 3, kind: input, shape index: {}]   ;;  %s525_s2 = inlined_call_operand.vmem [shape: f32[16,1], index: 2, kind: input, shape index: {}]   ;;  %s526_s4 = inlined_call_operand.vmem [shape: f32[32,1], index: 4, kind: input, shape index: {}]   ;;  %s527_s5 = inlined_call_operand.vmem [shape: f32[32,1], index: 5, kind: input, shape index: {}]   ;;  %s528_s1 = inlined_call_operand.vmem [shape: bf16[32,16], index: 1, kind: input, shape index: {}]   ;;  %s529_s0 = inlined_call_operand.vmem [shape: bf16[48,512], index: 0, kind: input, shape index: {}]   ;;  %s530_s6 = inlined_call_operand.vmem [shape: bf16[32,512], index: 6, kind: output, shape index: {}]  }
   0x1   :  { %395 = vset.pattern.permute.xlu1 %v398_v0  ;;  %394 = vset.pattern.permute.xlu0 %v398_v0  ;;  %v56_v1 = vld [vmem:[%s524_s3] sm:$0xff]  ;;  %v57_v3 = vld [vmem:[%s524_s3 + $0x8] sm:$0xff]  ;;  %v218_v7 = vld [vmem:[%s526_s4 + $0x18] sm:$0xff] }
   0x2   :  { %v36_v2 = vld [vmem:[%s525_s2] sm:$0xff]  ;;  %60 = vperm.xlu1 %395, %v56_v1   ;;  %v37_v4 = vld [vmem:[%s525_s2 + $0x8] sm:$0xff]  ;;  %141 = vmatprep.mubr.bf16.mxu0 %v398_v0  ;;  %v217_v8 = vld [vmem:[%s526_s4 + $0x10] sm:$0xff] }
   0x3   :  { %40 = vperm.xlu0 %394, %v36_v2   ;;  %194 = vmatprep.mubr.bf16.mxu1 %v398_v0  ;;  %v216_v5 = vld [vmem:[%s526_s4 + $0x8] sm:$0xff]  ;;  %v215_v6 = vld [vmem:[%s526_s4] sm:$0xff]  ;;  %v258_v11 = vld [vmem:[%s527_s5 + $0x18] sm:$0xff] }
   0x4   :  { %v256_v9 = vld [vmem:[%s527_s5 + $0x8] sm:$0xff]  ;;  %v255_v10 = vld [vmem:[%s527_s5] sm:$0xff]  ;;  %v257_v12 = vld [vmem:[%s527_s5 + $0x10] sm:$0xff] }
   0x5   :  { %v24_v13 = vld [vmem:[%s529_s0] sm:$0xff]  ;;  %v25_v14 = vld [vmem:[%s529_s0 + $0x8] sm:$0xff]  ;;  %v26_v17 = vld [vmem:[%s529_s0 + $0x10] sm:$0xff] }
   0x6   :  { %65 = vperm.xlu1 %395, %v57_v3   ;;  %v28_v15 = vunpack.c.l.bf16 %v24_v13  ;;  %v30_v16 = vunpack.c.l.bf16 %v25_v14  ;;  %v27_v18 = vld [vmem:[%s529_s0 + $0x18] sm:$0xff]  ;;  %v29_v19 = vunpack.c.h.bf16 %v24_v13  ;;  %v31_v20 = vunpack.c.h.bf16 %v25_v14  ;;  %v396_v57 = vld [vmem:[%s528_s1] sm:$0xff]   ;;  %v397_v58 = vld [vmem:[%s528_s1 + $0x8] sm:$0xff]  }
   0x7   :  { %45 = vperm.xlu0 %394, %v37_v4   ;;  %v32_v23 = vunpack.c.l.bf16 %v26_v17  ;;  %v34_v24 = vunpack.c.l.bf16 %v27_v18  ;;  %v33_v27 = vunpack.c.h.bf16 %v26_v17  ;;  %v35_v29 = vunpack.c.h.bf16 %v27_v18 }
   0xa   :  { %226 = vperm.xlu1 %395, %v216_v5  }
   0xb   :  { %221 = vperm.xlu0 %394, %v215_v6  }
   0xe   :  { %236 = vperm.xlu1 %395, %v218_v7  }
   0xf   :  { %231 = vperm.xlu0 %394, %v217_v8  }
  0x12   :  { %266 = vperm.xlu1 %395, %v256_v9  }
  0x13   :  { %261 = vperm.xlu0 %394, %v255_v10  }
  0x16   :  { %276 = vperm.xlu1 %395, %v258_v11  }
  0x17   :  { %271 = vperm.xlu0 %394, %v257_v12  }
  0x81   :  { %v61_v21 = vpop.permute.xlu1 %60 }
  0x82   :  { %v41_v22 = vpop.permute.xlu0 %40 }
  0x83   :  { %v48_v25 = vmul.f32 %v41_v22, %v28_v15  ;;  %v50_v26 = vmul.f32 %v41_v22, %v30_v16  ;;  %v49_v28 = vmul.f32 %v41_v22, %v29_v19  ;;  %v51_v30 = vmul.f32 %v41_v22, %v31_v20 }
  0x85   :  { %v69_v32 = vadd.f32 %v61_v21, %v49_v28  ;;  %v68_v33 = vadd.f32 %v61_v21, %v48_v25  ;;  %v70_v37 = vadd.f32 %v61_v21, %v50_v26  ;;  %v66_v38 = vpop.permute.xlu1 %65  ;;  %v71_v40 = vadd.f32 %v61_v21, %v51_v30 }
  0x86   :  { %v46_v31 = vpop.permute.xlu0 %45 }
  0x87   :  { %v52_v34 = vmul.f32 %v46_v31, %v32_v23  ;;  %v54_v35 = vmul.f32 %v46_v31, %v34_v24  ;;  %v53_v36 = vmul.f32 %v46_v31, %v33_v27  ;;  %v55_v39 = vmul.f32 %v46_v31, %v35_v29 }
  0x88   :  { %v77_v44 = vmax.f32 %v69_v32, 0.0  ;;  %v76_v46 = vmax.f32 %v68_v33, 0.0  ;;  %v78_v49 = vmax.f32 %v70_v37, 0.0  ;;  %v79_v51 = vmax.f32 %v71_v40, 0.0 }
  0x89   :  { %v73_v41 = vadd.f32 %v66_v38, %v53_v36  ;;  %v72_v42 = vadd.f32 %v66_v38, %v52_v34  ;;  %v74_v43 = vadd.f32 %v66_v38, %v54_v35  ;;  %v75_v45 = vadd.f32 %v66_v38, %v55_v39  ;;  %v227_v60 = vpop.permute.xlu1 %226 }
  0x8a   :  { %v222_v59 = vpop.permute.xlu0 %221 }
  0x8b   :  { %v81_v47 = vmax.f32 %v73_v41, 0.0  ;;  %v80_v48 = vmax.f32 %v72_v42, 0.0  ;;  %v82_v50 = vmax.f32 %v74_v43, 0.0  ;;  %v83_v52 = vmax.f32 %v75_v45, 0.0 }
  0x8d   :  { %v89_v53 = vpack.c.bf16 %v81_v47, %v77_v44  ;;  %v88_v54 = vpack.c.bf16 %v80_v48, %v76_v46  ;;  %v90_v55 = vpack.c.bf16 %v82_v50, %v78_v49  ;;  %v91_v56 = vpack.c.bf16 %v83_v52, %v79_v51  ;;  %v494_v62 = vpop.permute.xlu1 %236 }
  0x8e   :  { %v232_v61 = vpop.permute.xlu0 %231 }
  0x8f   :  { %109 = vmatprep.subr.bf16.mxu0 %v89_v53  ;;  %162 = vmatprep.subr.bf16.mxu1 %v91_v56 }
  0x90   :  { %110 = vmatpush1.bf16.msra.mxu0 %v88_v54  ;;  %163 = vmatpush1.bf16.msra.mxu1 %v90_v55 }
  0x91   :  { %v267_v13 = vpop.permute.xlu1 %266 }
  0x92   :  { %v262_v63 = vpop.permute.xlu0 %261 }
  0x93   :  { %373 = vmatmul.mubr.msk.bf16.vlgmr.msra.gmra.mrb[0].mxu0 %vm102_vm0, %v396_v57  ;;  %375 = vmatmul.mubr.msk.bf16.vlgmr.msra.gmra.mrb[0].mxu1 %vm102_vm0, %v396_v57 }
  0x94   :  { %151 = vmatprep.mubr.bf16.mxu0 %v398_v0  ;;  %204 = vmatprep.mubr.bf16.mxu1 %v398_v0 }
  0x95   :  { %v277_v51 = vpop.permute.xlu1 %276 }
  0x96   :  { %v272_v30 = vpop.permute.xlu0 %271 }
  0x9b   :  { %374 = vmatmul.mubr.msk.bf16.gmra.mrb[4].mxu0 %vm102_vm0, %v397_v58  ;;  %376 = vmatmul.mubr.msk.bf16.gmra.mrb[4].mxu1 %vm102_vm0, %v397_v58 }
 0x166   :  { %v143_v1 = vpop.f32.mrb[0].mxu0  ;;  %v196_v3 = vpop.f32.mrb[0].mxu1 }
 0x167   :  { %v239_v2 = vmul.f32 %v222_v59, %v143_v1  ;;  %v145_v4 = vpop.f32.mrb[1].mxu0  ;;  %v241_v5 = vmul.f32 %v222_v59, %v196_v3  ;;  %v198_v7 = vpop.f32.mrb[1].mxu1 }
 0x168   :  { %v240_v6 = vmul.f32 %v222_v59, %v145_v4  ;;  %v147_v0 = vpop.f32.mrb[2].mxu0  ;;  %v242_v9 = vmul.f32 %v222_v59, %v198_v7  ;;  %v200_v11 = vpop.f32.mrb[2].mxu1 }
 0x169   :  { %v279_v8 = vadd.f32 %v262_v63, %v239_v2  ;;  %v243_v10 = vmul.f32 %v227_v60, %v147_v0  ;;  %v149_v12 = vpop.f32.mrb[3].mxu0  ;;  %v281_v14 = vadd.f32 %v262_v63, %v241_v5  ;;  %v245_v16 = vmul.f32 %v227_v60, %v200_v11  ;;  %v202_v18 = vpop.f32.mrb[3].mxu1 }
 0x16a   :  { %v280_v15 = vadd.f32 %v262_v63, %v240_v6  ;;  %v244_v17 = vmul.f32 %v227_v60, %v149_v12  ;;  %v282_v20 = vadd.f32 %v262_v63, %v242_v9  ;;  %v246_v22 = vmul.f32 %v227_v60, %v202_v18 }
 0x16b   :  { %v295_v19 = vmax.f32 %v279_v8, 0.0  ;;  %v283_v21 = vadd.f32 %v267_v13, %v243_v10  ;;  %v297_v23 = vmax.f32 %v281_v14, 0.0  ;;  %v285_v25 = vadd.f32 %v267_v13, %v245_v16 }
 0x16c   :  { %v296_v24 = vmax.f32 %v280_v15, 0.0  ;;  %v284_v26 = vadd.f32 %v267_v13, %v244_v17  ;;  %v298_v27 = vmax.f32 %v282_v20, 0.0  ;;  %v286_v29 = vadd.f32 %v267_v13, %v246_v22 }
 0x16d   :  { %v299_v28 = vmax.f32 %v283_v21, 0.0  ;;  %v301_v32 = vmax.f32 %v285_v25, 0.0 }
 0x16e   :  { %v385_v31 = vpack.c.bf16 %v296_v24, %v295_v19  ;;  %v300_v33 = vmax.f32 %v284_v26, 0.0  ;;  %v153_v34 = vpop.f32.mrb[4].mxu0  ;;  %v386_v35 = vpack.c.bf16 %v298_v27, %v297_v23  ;;  %v302_v36 = vmax.f32 %v286_v29, 0.0  ;;  %v206_v38 = vpop.f32.mrb[4].mxu1 }
 0x16f   :  { %v247_v37 = vmul.f32 %v232_v61, %v153_v34  ;;  %v155_v39 = vpop.f32.mrb[5].mxu0  ;;  %v249_v41 = vmul.f32 %v232_v61, %v206_v38  ;;  %v208_v43 = vpop.f32.mrb[5].mxu1 }
 0x170   :  { %359 = vst [vmem:[%s530_s6] sm:$0xff] %v385_v31  ;;  %v387_v40 = vpack.c.bf16 %v300_v33, %v299_v28  ;;  %v248_v42 = vmul.f32 %v232_v61, %v155_v39  ;;  %v157_v44 = vpop.f32.mrb[6].mxu0  ;;  %360 = vst [vmem:[%s530_s6 + $0x8] sm:$0xff] %v386_v35  ;;  %v388_v45 = vpack.c.bf16 %v302_v36, %v301_v32  ;;  %v210_v49 = vpop.f32.mrb[6].mxu1 }
 0x171   :  { %v287_v46 = vadd.f32 %v272_v30, %v247_v37  ;;  %v250_v47 = vmul.f32 %v232_v61, %v208_v43  ;;  %v251_v48 = vmul.f32 %v494_v62, %v157_v44  ;;  %v159_v50 = vpop.f32.mrb[7].mxu0  ;;  %v289_v52 = vadd.f32 %v272_v30, %v249_v41  ;;  %v212_v56 = vpop.f32.mrb[7].mxu1 }
 0x172   :  { %361 = vst [vmem:[%s530_s6 + $0x10] sm:$0xff] %v387_v40  ;;  %v288_v53 = vadd.f32 %v272_v30, %v248_v42  ;;  %v253_v54 = vmul.f32 %v494_v62, %v210_v49  ;;  %v252_v55 = vmul.f32 %v494_v62, %v159_v50  ;;  %362 = vst [vmem:[%s530_s6 + $0x18] sm:$0xff] %v388_v45 }
 0x173   :  { %v303_v57 = vmax.f32 %v287_v46, 0.0  ;;  %v290_v58 = vadd.f32 %v272_v30, %v250_v47  ;;  %v291_v59 = vadd.f32 %v277_v51, %v251_v48  ;;  %v254_v60 = vmul.f32 %v494_v62, %v212_v56 }
 0x174   :  { %v305_v61 = vmax.f32 %v289_v52, 0.0  ;;  %v304_v63 = vmax.f32 %v288_v53, 0.0  ;;  %v293_v1 = vadd.f32 %v277_v51, %v253_v54  ;;  %v292_v2 = vadd.f32 %v277_v51, %v252_v55 }
 0x175   :  { %v306_v3 = vmax.f32 %v290_v58, 0.0  ;;  %v307_v4 = vmax.f32 %v291_v59, 0.0  ;;  %v294_v5 = vadd.f32 %v277_v51, %v254_v60 }
 0x176   :  { %v389_v6 = vpack.c.bf16 %v304_v63, %v303_v57  ;;  %v309_v7 = vmax.f32 %v293_v1, 0.0  ;;  %v308_v0 = vmax.f32 %v292_v2, 0.0 }
 0x177   :  { %v390_v8 = vpack.c.bf16 %v306_v3, %v305_v61  ;;  %v310_v9 = vmax.f32 %v294_v5, 0.0 }
 0x178   :  { %363 = vst [vmem:[%s530_s6 + $0x20] sm:$0xff] %v389_v6  ;;  %v391_v10 = vpack.c.bf16 %v308_v0, %v307_v4 }
 0x179   :  { %364 = vst [vmem:[%s530_s6 + $0x28] sm:$0xff] %v390_v8  ;;  %v392_v62 = vpack.c.bf16 %v310_v9, %v309_v7 }
 0x17a   :  { %365 = vst [vmem:[%s530_s6 + $0x30] sm:$0xff] %v391_v10 }
 0x17b   :  { %366 = vst [vmem:[%s530_s6 + $0x38] sm:$0xff] %v392_v62 }

// kernel: _lambda_.10
= control target key start
LH: loop header
LB: loop body
LE: loop exit
PB: predicated region body
PF: predicated region fallthrough
CT: control target
= control target key end

     0   :  { %v1802_v8 = vmov 0   ;;  %vm941_vm0 = vcmask 154624   ;;  %vm945_vm1 = vcmask 1040384   ;;  %vm946_vm2 = vcmask 1041408   ;;  %s2493_s0 = inlined_call_operand.vmem [shape: bf16[147,2048], index: 0, kind: input, shape index: {}]   ;;  %s2494_s1 = inlined_call_operand.vmem [shape: bf16[16,147], index: 1, kind: input, shape index: {}]   ;;  %s2495_s2 = inlined_call_operand.vmem [shape: f32[16,1], index: 2, kind: input, shape index: {}]   ;;  %s2496_s3 = inlined_call_operand.vmem [shape: f32[16,1], index: 3, kind: input, shape index: {}]   ;;  %s2497_s4 = inlined_call_operand.vmem [shape: bf16[16,2048], index: 4, kind: output, shape index: {}]  }
   0x1   :  { %v18_v0 = vld [vmem:[%s2493_s0] sm:$0xff]  ;;  %v19_v2 = vld [vmem:[%s2493_s0 + $0x8] sm:$0xff]  ;;  %1781 = vset.pattern.permute.xlu0 %v1802_v8  ;;  %1782 = vset.pattern.permute.xlu1 %v1802_v8 }
   0x2   :  { %v26_v1 = vld [vmem:[%s2493_s0 + $0x40] sm:$0xff]  ;;  %v27_v4 = vld [vmem:[%s2493_s0 + $0x48] sm:$0xff] }
   0x3   :  { %v1580_v3 = vcombine.high %v18_v0, %v26_v1  ;;  %v1579_v5 = vcombine.low %v18_v0, %v26_v1  ;;  %v34_v6 = vld [vmem:[%s2493_s0 + $0x80] sm:$0xff]  ;;  %v1582_v9 = vcombine.high %v19_v2, %v27_v4  ;;  %v1581_v10 = vcombine.low %v19_v2, %v27_v4  ;;  %v35_v12 = vld [vmem:[%s2493_s0 + $0x88] sm:$0xff] }
   0x4   :  { %v42_v7 = vld [vmem:[%s2493_s0 + $0xc0] sm:$0xff]  ;;  %v43_v13 = vld [vmem:[%s2493_s0 + $0xc8] sm:$0xff] }
   0x5   :  { %v1596_v11 = vcombine.high %v34_v6, %v42_v7  ;;  %v50_v14 = vld [vmem:[%s2493_s0 + $0x100] sm:$0xff]  ;;  %997 = vmatprep.subr.bf16.mxu0 %v1580_v3  ;;  %v1598_v15 = vcombine.high %v35_v12, %v43_v13  ;;  %v51_v17 = vld [vmem:[%s2493_s0 + $0x108] sm:$0xff]  ;;  %1040 = vmatprep.subr.bf16.mxu1 %v1582_v9  ;;  %v1595_v19 = vcombine.low %v34_v6, %v42_v7 }
   0x6   :  { %v58_v16 = vld [vmem:[%s2493_s0 + $0x140] sm:$0xff]  ;;  %v59_v18 = vld [vmem:[%s2493_s0 + $0x148] sm:$0xff]  ;;  %998 = vmatpush1.bf16.msra.mxu0 %v1579_v5  ;;  %1041 = vmatpush1.bf16.msra.mxu1 %v1581_v10  ;;  %v1597_v20 = vcombine.low %v35_v12, %v43_v13  ;;  %v1803_v5 = vmov 65535  }
   0x7   :  { %999 = vmatprep.subr.bf16.mxu0 %v1596_v11  ;;  %v1612_v21 = vcombine.high %v50_v14, %v58_v16  ;;  %1042 = vmatprep.subr.bf16.mxu1 %v1598_v15  ;;  %v1614_v22 = vcombine.high %v51_v17, %v59_v18  ;;  %v66_v23 = vld [vmem:[%s2493_s0 + $0x180] sm:$0xff]  ;;  %v67_v25 = vld [vmem:[%s2493_s0 + $0x188] sm:$0xff]  ;;  %v1611_v27 = vcombine.low %v50_v14, %v58_v16  ;;  %v947_v6 = vsel %vm945_vm1, 4294967295, %v1803_v5  ;;  %v84_v5 = vld [vmem:[%s2493_s0 + $0x210] sm:$0xff] }
   0x8   :  { %v74_v24 = vld [vmem:[%s2493_s0 + $0x1c0] sm:$0xff]  ;;  %v75_v26 = vld [vmem:[%s2493_s0 + $0x1c8] sm:$0xff]  ;;  %v1613_v28 = vcombine.low %v51_v17, %v59_v18  ;;  %v1952_v13 = vsel %vm946_vm2, %v947_v6, 0  ;;  %v92_v6 = vld [vmem:[%s2493_s0 + $0x250] sm:$0xff] }
   0x9   :  { %v1628_v29 = vcombine.high %v66_v23, %v74_v24  ;;  %v1630_v30 = vcombine.high %v67_v25, %v75_v26  ;;  %v82_v31 = vld [vmem:[%s2493_s0 + $0x200] sm:$0xff]  ;;  %v83_v33 = vld [vmem:[%s2493_s0 + $0x208] sm:$0xff]  ;;  %v1627_v35 = vcombine.low %v66_v23, %v74_v24  ;;  %v1629_v36 = vcombine.low %v67_v25, %v75_v26  ;;  %v21_v23 = vld [vmem:[%s2493_s0 + $0x18] sm:$0xff] }
   0xa   :  { %1000 = vmatpush1.bf16.msra.mxu0 %v1595_v19  ;;  %1043 = vmatpush1.bf16.msra.mxu1 %v1597_v20  ;;  %v90_v32 = vld [vmem:[%s2493_s0 + $0x240] sm:$0xff]  ;;  %v91_v34 = vld [vmem:[%s2493_s0 + $0x248] sm:$0xff]  ;;  %v29_v24 = vld [vmem:[%s2493_s0 + $0x58] sm:$0xff] }
   0xb   :  { %1001 = vmatprep.subr.bf16.mxu0 %v1612_v21  ;;  %1044 = vmatprep.subr.bf16.mxu1 %v1614_v22  ;;  %v1644_v37 = vcombine.high %v82_v31, %v90_v32  ;;  %v1892_v38 = vld [vmem:[%s2494_s1 + $0x4] ss:$8 sps:$4 sm:$0xff]   ;;  %v1646_v39 = vcombine.high %v83_v33, %v91_v34  ;;  %v1643_v44 = vcombine.low %v82_v31, %v90_v32  ;;  %v20_v21 = vld [vmem:[%s2493_s0 + $0x10] sm:$0xff] }
   0xc   :  { %v98_v40 = vld [vmem:[%s2493_s0 + $0x280] sm:$0xff]  ;;  %v99_v42 = vld [vmem:[%s2493_s0 + $0x288] sm:$0xff]  ;;  %1739 = vmatprep.mubr.msk.bf16.mxu0 %vm941_vm0, %v1892_v38  ;;  %1740 = vmatprep.mubr.msk.bf16.mxu1 %vm941_vm0, %v1892_v38  ;;  %v1645_v45 = vcombine.low %v83_v33, %v91_v34  ;;  %v28_v22 = vld [vmem:[%s2493_s0 + $0x50] sm:$0xff] }
   0xd   :  { %v106_v41 = vld [vmem:[%s2493_s0 + $0x2c0] sm:$0xff]  ;;  %v107_v43 = vld [vmem:[%s2493_s0 + $0x2c8] sm:$0xff]  ;;  %v44_v31 = vld [vmem:[%s2493_s0 + $0xd0] sm:$0xff] }
   0xe   :  { %1002 = vmatpush1.bf16.msra.mxu0 %v1611_v27  ;;  %1045 = vmatpush1.bf16.msra.mxu1 %v1613_v28  ;;  %v1660_v46 = vcombine.high %v98_v40, %v106_v41  ;;  %v1662_v47 = vcombine.high %v99_v42, %v107_v43  ;;  %v114_v48 = vld [vmem:[%s2493_s0 + $0x300] sm:$0xff]  ;;  %v115_v50 = vld [vmem:[%s2493_s0 + $0x308] sm:$0xff]  ;;  %v1659_v52 = vcombine.low %v98_v40, %v106_v41  ;;  %v37_v33 = vld [vmem:[%s2493_s0 + $0x98] sm:$0xff] }
   0xf   :  { %1003 = vmatprep.subr.bf16.mxu0 %v1628_v29  ;;  %1046 = vmatprep.subr.bf16.mxu1 %v1630_v30  ;;  %v122_v49 = vld [vmem:[%s2493_s0 + $0x340] sm:$0xff]  ;;  %v123_v51 = vld [vmem:[%s2493_s0 + $0x348] sm:$0xff]  ;;  %v1661_v53 = vcombine.low %v99_v42, %v107_v43  ;;  %v1584_v28 = vcombine.high %v20_v21, %v28_v22  ;;  %v1586_v29 = vcombine.high %v21_v23, %v29_v24  ;;  %v36_v30 = vld [vmem:[%s2493_s0 + $0x90] sm:$0xff] }
  0x10   :  { %v1676_v54 = vcombine.high %v114_v48, %v122_v49  ;;  %v1678_v55 = vcombine.high %v115_v50, %v123_v51  ;;  %v130_v56 = vld [vmem:[%s2493_s0 + $0x380] sm:$0xff]  ;;  %v131_v58 = vld [vmem:[%s2493_s0 + $0x388] sm:$0xff]  ;;  %v1675_v60 = vcombine.low %v114_v48, %v122_v49  ;;  %v1677_v61 = vcombine.low %v115_v50, %v123_v51  ;;  %v45_v34 = vld [vmem:[%s2493_s0 + $0xd8] sm:$0xff] }
  0x11   :  { %v138_v57 = vld [vmem:[%s2493_s0 + $0x3c0] sm:$0xff]  ;;  %v139_v59 = vld [vmem:[%s2493_s0 + $0x3c8] sm:$0xff]  ;;  %v1585_v40 = vcombine.low %v21_v23, %v29_v24  ;;  %v1602_v48 = vcombine.high %v37_v33, %v45_v34  ;;  %v52_v49 = vld [vmem:[%s2493_s0 + $0x110] sm:$0xff] }
  0x12   :  { %1004 = vmatpush1.bf16.msra.mxu0 %v1627_v35  ;;  %1047 = vmatpush1.bf16.msra.mxu1 %v1629_v36  ;;  %v1692_v62 = vcombine.high %v130_v56, %v138_v57  ;;  %v1694_v63 = vcombine.high %v131_v58, %v139_v59  ;;  %v146_v0 = vld [vmem:[%s2493_s0 + $0x400] sm:$0xff]  ;;  %v147_v3 = vld [vmem:[%s2493_s0 + $0x408] sm:$0xff]  ;;  %v1691_v8 = vcombine.low %v130_v56, %v138_v57  ;;  %v60_v50 = vld [vmem:[%s2493_s0 + $0x150] sm:$0xff] }
  0x13   :  { %1005 = vmatprep.subr.bf16.mxu0 %v1644_v37  ;;  %1048 = vmatprep.subr.bf16.mxu1 %v1646_v39  ;;  %v154_v1 = vld [vmem:[%s2493_s0 + $0x440] sm:$0xff]  ;;  %v155_v4 = vld [vmem:[%s2493_s0 + $0x448] sm:$0xff]  ;;  %v1693_v9 = vcombine.low %v131_v58, %v139_v59  ;;  %v1583_v39 = vcombine.low %v20_v21, %v28_v22  ;;  %v1601_v57 = vcombine.low %v37_v33, %v45_v34  ;;  %v101_v22 = vld [vmem:[%s2493_s0 + $0x298] sm:$0xff] }
  0x14   :  { %v162_v2 = vld [vmem:[%s2493_s0 + $0x480] sm:$0x33]  ;;  %v163_v7 = vld [vmem:[%s2493_s0 + $0x488] sm:$0x33]  ;;  %v1708_v10 = vcombine.high %v146_v0, %v154_v1  ;;  %v1710_v12 = vcombine.high %v147_v3, %v155_v4  ;;  %v1707_v15 = vcombine.low %v146_v0, %v154_v1  ;;  %v1709_v17 = vcombine.low %v147_v3, %v155_v4  ;;  %v77_v0 = vld [vmem:[%s2493_s0 + $0x1d8] sm:$0xff] }
  0x15   :  { %v1724_v11 = vcombine.high %v162_v2, %v162_v2  ;;  %v1726_v14 = vcombine.high %v163_v7, %v163_v7  ;;  %v1723_v16 = vcombine.low %v162_v2, %v162_v2  ;;  %v1725_v19 = vcombine.low %v163_v7, %v163_v7  ;;  %v1973_v27 = vld [vmem:[%s2494_s1] ss:$8 sps:$4 sm:$0xff]   ;;  %v85_v7 = vld [vmem:[%s2493_s0 + $0x218] sm:$0xff]  ;;  %v116_v33 = vld [vmem:[%s2493_s0 + $0x310] sm:$0xff] }
  0x16   :  { %1006 = vmatpush1.bf16.msra.mxu0 %v1643_v44  ;;  %1049 = vmatpush1.bf16.msra.mxu1 %v1645_v45  ;;  %v166_v32 = vld [vmem:[%s2493_s0 + $0x4a0] sm:$0x33]  ;;  %v167_v37 = vld [vmem:[%s2493_s0 + $0x4a8] sm:$0x33]  ;;  %v1600_v44 = vcombine.high %v36_v30, %v44_v31  ;;  %v1616_v58 = vcombine.high %v52_v49, %v60_v50  ;;  %v1615_v1 = vcombine.low %v52_v49, %v60_v50  ;;  %v109_v23 = vld [vmem:[%s2493_s0 + $0x2d8] sm:$0xff] }
  0x17   :  { %1007 = vmatprep.subr.bf16.mxu0 %v1660_v46  ;;  %1050 = vmatprep.subr.bf16.mxu1 %v1662_v47  ;;  %v953_v18 = vand.u32 %v1724_v11, %v1952_v13  ;;  %v959_v20 = vand.u32 %v1726_v14, %v1952_v13  ;;  %v950_v25 = vand.u32 %v1723_v16, %v1952_v13  ;;  %v1341_v43 = vld [vmem:[%s2495_s2] sm:$0xff]  ;;  %v1342_v56 = vld [vmem:[%s2495_s2 + $0x8] sm:$0xff]  ;;  %v124_v34 = vld [vmem:[%s2493_s0 + $0x350] sm:$0xff] }
  0x18   :  { %v956_v26 = vand.u32 %v1725_v19, %v1952_v13  ;;  %v1731_v35 = vcombine.low %v166_v32, %v166_v32  ;;  %v1732_v36 = vcombine.high %v166_v32, %v166_v32  ;;  %v1733_v41 = vcombine.low %v167_v37, %v167_v37  ;;  %v1385_v47 = vld [vmem:[%s2496_s3] sm:$0xff]  ;;  %1345 = vperm.xlu0 %1781, %v1341_v43   ;;  %v1386_v59 = vld [vmem:[%s2496_s3 + $0x8] sm:$0xff]  ;;  %v140_v43 = vld [vmem:[%s2493_s0 + $0x3d0] sm:$0xff] }
  0x19   :  { %v1734_v42 = vcombine.high %v167_v37, %v167_v37  ;;  %1389 = vperm.xlu1 %1782, %v1385_v47   ;;  %v1666_v32 = vcombine.high %v101_v22, %v109_v23  ;;  %v141_v47 = vld [vmem:[%s2493_s0 + $0x3d8] sm:$0xff] }
  0x1a   :  { %1008 = vmatpush1.bf16.msra.mxu0 %v1659_v52  ;;  %1051 = vmatpush1.bf16.msra.mxu1 %v1661_v53  ;;  %v1997_v45 = vand.u32 %v1732_v36, %v1952_v13  ;;  %v2000_v46 = vand.u32 %v1731_v35, %v1952_v13  ;;  %v2015_v52 = vand.u32 %v1733_v41, %v1952_v13  ;;  %v53_v53 = vld [vmem:[%s2493_s0 + $0x118] sm:$0xff] }
  0x1b   :  { %1009 = vmatprep.subr.bf16.mxu0 %v1676_v54  ;;  %1052 = vmatprep.subr.bf16.mxu1 %v1678_v55  ;;  %v2012_v51 = vand.u32 %v1734_v42, %v1952_v13  ;;  %v61_v54 = vld [vmem:[%s2493_s0 + $0x158] sm:$0xff]  ;;  %v1599_v55 = vcombine.low %v36_v30, %v44_v31  ;;  %v132_v42 = vld [vmem:[%s2493_s0 + $0x390] sm:$0xff] }
  0x1c   :  { %1350 = vperm.xlu0 %1781, %v1342_v56   ;;  %v1617_v2 = vcombine.low %v53_v53, %v61_v54  ;;  %v117_v35 = vld [vmem:[%s2493_s0 + $0x318] sm:$0xff]  ;;  %v1696_v50 = vcombine.high %v132_v42, %v140_v43  ;;  %v164_v56 = vld [vmem:[%s2493_s0 + $0x490] sm:$0x33] }
  0x1d   :  { %1394 = vperm.xlu1 %1782, %v1386_v59   ;;  %v125_v36 = vld [vmem:[%s2493_s0 + $0x358] sm:$0xff] }
  0x1e   :  { %1010 = vmatpush1.bf16.msra.mxu0 %v1675_v60  ;;  %1053 = vmatpush1.bf16.msra.mxu1 %v1677_v61  ;;  %v1618_v60 = vcombine.high %v53_v53, %v61_v54  ;;  %v68_v61 = vld [vmem:[%s2493_s0 + $0x190] sm:$0xff]  ;;  %v1682_v41 = vcombine.high %v117_v35, %v125_v36  ;;  %v1681_v49 = vcombine.low %v117_v35, %v125_v36  ;;  %v165_v59 = vld [vmem:[%s2493_s0 + $0x498] sm:$0x33] }
  0x1f   :  { %1011 = vmatprep.subr.bf16.mxu0 %v1692_v62  ;;  %1054 = vmatprep.subr.bf16.mxu1 %v1694_v63  ;;  %v76_v62 = vld [vmem:[%s2493_s0 + $0x1d0] sm:$0xff]  ;;  %v69_v63 = vld [vmem:[%s2493_s0 + $0x198] sm:$0xff] }
  0x20   :  { %v1632_v3 = vcombine.high %v68_v61, %v76_v62  ;;  %v1634_v4 = vcombine.high %v69_v63, %v77_v0  ;;  %v1633_v11 = vcombine.low %v69_v63, %v77_v0  ;;  %v148_v54 = vld [vmem:[%s2493_s0 + $0x410] sm:$0xff]  ;;  %v1728_v63 = vcombine.high %v164_v56, %v164_v56 }
  0x22   :  { %1012 = vmatpush1.bf16.msra.mxu0 %v1691_v8  ;;  %1055 = vmatpush1.bf16.msra.mxu1 %v1693_v9  ;;  %v93_v8 = vld [vmem:[%s2493_s0 + $0x258] sm:$0xff]  ;;  %v1631_v9 = vcombine.low %v68_v61, %v76_v62 }
  0x23   :  { %1013 = vmatprep.subr.bf16.mxu0 %v1708_v10  ;;  %1056 = vmatprep.subr.bf16.mxu1 %v1710_v12  ;;  %v168_v10 = vld [vmem:[%s2493_s0 + $0x4b0] sm:$0x33]  ;;  %v1648_v12 = vcombine.high %v84_v5, %v92_v6  ;;  %v1650_v16 = vcombine.high %v85_v7, %v93_v8  ;;  %v1649_v30 = vcombine.low %v85_v7, %v93_v8  ;;  %v22_v8 = vld [vmem:[%s2493_s0 + $0x20] sm:$0xff] }
  0x24   :  { %v1735_v14 = vcombine.low %v168_v10, %v168_v10  ;;  %v1736_v19 = vcombine.high %v168_v10, %v168_v10  ;;  %v23_v10 = vld [vmem:[%s2493_s0 + $0x28] sm:$0xff] }
  0x26   :  { %1014 = vmatpush1.bf16.msra.mxu0 %v1707_v15  ;;  %1057 = vmatpush1.bf16.msra.mxu1 %v1709_v17  ;;  %v169_v15 = vld [vmem:[%s2493_s0 + $0x4b8] sm:$0x33]  ;;  %v100_v17 = vld [vmem:[%s2493_s0 + $0x290] sm:$0xff]  ;;  %v2078_v24 = vand.u32 %v1735_v14, %v1952_v13 }
  0x27   :  { %1015 = vmatprep.subr.bf16.mxu0 %v953_v18  ;;  %1058 = vmatprep.subr.bf16.mxu1 %v959_v20  ;;  %v108_v18 = vld [vmem:[%s2493_s0 + $0x2d0] sm:$0xff]  ;;  %v1737_v20 = vcombine.low %v169_v15, %v169_v15  ;;  %v1738_v21 = vcombine.high %v169_v15, %v169_v15 }
  0x28   :  { %v1664_v31 = vcombine.high %v100_v17, %v108_v18  ;;  %v1663_v37 = vcombine.low %v100_v17, %v108_v18  ;;  %v38_v17 = vld [vmem:[%s2493_s0 + $0xa0] sm:$0xff] }
  0x29   :  { %v46_v18 = vld [vmem:[%s2493_s0 + $0xe0] sm:$0xff] }
  0x2a   :  { %1016 = vmatpush1.bf16.msra.mxu0 %v950_v25  ;;  %1059 = vmatpush1.bf16.msra.mxu1 %v956_v26  ;;  %v1647_v25 = vcombine.low %v84_v5, %v92_v6  ;;  %v2081_v26 = vand.u32 %v1736_v19, %v1952_v13  ;;  %v965_v5 = vand.u32 %v1728_v63, %v1952_v13  ;;  %v39_v19 = vld [vmem:[%s2493_s0 + $0xa8] sm:$0xff] }
  0x2b   :  { %1083 = vmatprep.subr.bf16.mxu0 %v1584_v28  ;;  %1126 = vmatprep.subr.bf16.mxu1 %v1586_v29  ;;  %v2084_v28 = vand.u32 %v1738_v21, %v1952_v13  ;;  %v2087_v29 = vand.u32 %v1737_v20, %v1952_v13  ;;  %v1729_v6 = vcombine.low %v165_v59, %v165_v59  ;;  %v47_v20 = vld [vmem:[%s2493_s0 + $0xe8] sm:$0xff] }
  0x2d   :  { %1030 = vmatmul.mubr.bf16.vlgmr.msra.gmra.mrb[0].mxu0 %v1973_v27  ;;  %1073 = vmatmul.mubr.bf16.vlgmr.msra.gmra.mrb[0].mxu1 %v1973_v27  ;;  %v968_v14 = vand.u32 %v1729_v6, %v1952_v13 }
  0x2e   :  { %1084 = vmatpush1.bf16.msra.mxu0 %v1583_v39  ;;  %1127 = vmatpush1.bf16.msra.mxu1 %v1585_v40  ;;  %v1665_v39 = vcombine.low %v101_v22, %v109_v23  ;;  %v1680_v40 = vcombine.high %v116_v33, %v124_v34  ;;  %v1604_v22 = vcombine.high %v38_v17, %v46_v18 }
  0x2f   :  { %1085 = vmatprep.subr.bf16.mxu0 %v1600_v44  ;;  %1128 = vmatprep.subr.bf16.mxu1 %v1602_v48  ;;  %v133_v44 = vld [vmem:[%s2493_s0 + $0x398] sm:$0xff]  ;;  %v1679_v48 = vcombine.low %v116_v33, %v124_v34  ;;  %v1606_v23 = vcombine.high %v39_v19, %v47_v20  ;;  %v1603_v33 = vcombine.low %v38_v17, %v46_v18 }
  0x30   :  { %1741 = vmatprep.mubr.msk.bf16.mxu0 %vm941_vm0, %v1892_v38  ;;  %1742 = vmatprep.mubr.msk.bf16.mxu1 %vm941_vm0, %v1892_v38  ;;  %v1698_v53 = vcombine.high %v133_v44, %v141_v47  ;;  %v1697_v61 = vcombine.low %v133_v44, %v141_v47  ;;  %v1605_v34 = vcombine.low %v39_v19, %v47_v20  ;;  %v150_v19 = vld [vmem:[%s2493_s0 + $0x420] sm:$0xff] }
  0x31   :  { %v158_v20 = vld [vmem:[%s2493_s0 + $0x460] sm:$0xff] }
  0x32   :  { %1086 = vmatpush1.bf16.msra.mxu0 %v1599_v55  ;;  %1129 = vmatpush1.bf16.msra.mxu1 %v1601_v57  ;;  %v156_v55 = vld [vmem:[%s2493_s0 + $0x450] sm:$0xff]  ;;  %v149_v57 = vld [vmem:[%s2493_s0 + $0x418] sm:$0xff] }
  0x33   :  { %1087 = vmatprep.subr.bf16.mxu0 %v1616_v58  ;;  %1130 = vmatprep.subr.bf16.mxu1 %v1618_v60  ;;  %v157_v58 = vld [vmem:[%s2493_s0 + $0x458] sm:$0xff]  ;;  %v1695_v60 = vcombine.low %v132_v42, %v140_v43  ;;  %v1712_v62 = vcombine.high %v148_v54, %v156_v55 }
  0x34   :  { %v1714_v0 = vcombine.high %v149_v57, %v157_v58 }
  0x36   :  { %1088 = vmatpush1.bf16.msra.mxu0 %v1615_v1  ;;  %1131 = vmatpush1.bf16.msra.mxu1 %v1617_v2  ;;  %v1730_v1 = vcombine.high %v165_v59, %v165_v59  ;;  %v1711_v2 = vcombine.low %v148_v54, %v156_v55  ;;  %v110_v59 = vld [vmem:[%s2493_s0 + $0x2e0] sm:$0xff] }
  0x37   :  { %1089 = vmatprep.subr.bf16.mxu0 %v1632_v3  ;;  %1132 = vmatprep.subr.bf16.mxu1 %v1634_v4  ;;  %v1727_v3 = vcombine.low %v164_v56, %v164_v56  ;;  %v1713_v4 = vcombine.low %v149_v57, %v157_v58  ;;  %v102_v58 = vld [vmem:[%s2493_s0 + $0x2a0] sm:$0xff] }
  0x38   :  { %v971_v7 = vand.u32 %v1730_v1, %v1952_v13  ;;  %v1667_v6 = vcombine.low %v102_v58, %v110_v59 }
  0x3a   :  { %1090 = vmatpush1.bf16.msra.mxu0 %v1631_v9  ;;  %1133 = vmatpush1.bf16.msra.mxu1 %v1633_v11  ;;  %v30_v9 = vld [vmem:[%s2493_s0 + $0x60] sm:$0xff]  ;;  %v31_v11 = vld [vmem:[%s2493_s0 + $0x68] sm:$0xff] }
  0x3b   :  { %1091 = vmatprep.subr.bf16.mxu0 %v1648_v12  ;;  %1134 = vmatprep.subr.bf16.mxu1 %v1650_v16  ;;  %v962_v12 = vand.u32 %v1727_v3, %v1952_v13  ;;  %v1588_v15 = vcombine.high %v22_v8, %v30_v9  ;;  %v1590_v16 = vcombine.high %v23_v10, %v31_v11  ;;  %v126_v3 = vld [vmem:[%s2493_s0 + $0x360] sm:$0xff] }
  0x3c   :  { %v1587_v13 = vcombine.low %v22_v8, %v30_v9  ;;  %v1589_v21 = vcombine.low %v23_v10, %v31_v11  ;;  %v134_v10 = vld [vmem:[%s2493_s0 + $0x3a0] sm:$0xff] }
  0x3d   :  { %v142_v11 = vld [vmem:[%s2493_s0 + $0x3e0] sm:$0xff] }
  0x3e   :  { %1092 = vmatpush1.bf16.msra.mxu0 %v1647_v25  ;;  %1135 = vmatpush1.bf16.msra.mxu1 %v1649_v30  ;;  %v54_v25 = vld [vmem:[%s2493_s0 + $0x120] sm:$0xff]  ;;  %v1700_v17 = vcombine.high %v134_v10, %v142_v11 }
  0x3f   :  { %1093 = vmatprep.subr.bf16.mxu0 %v1664_v31  ;;  %1136 = vmatprep.subr.bf16.mxu1 %v1666_v32  ;;  %v62_v30 = vld [vmem:[%s2493_s0 + $0x160] sm:$0xff]  ;;  %v55_v31 = vld [vmem:[%s2493_s0 + $0x128] sm:$0xff] }
  0x40   :  { %v63_v32 = vld [vmem:[%s2493_s0 + $0x168] sm:$0xff]  ;;  %v1620_v35 = vcombine.high %v54_v25, %v62_v30  ;;  %v1619_v42 = vcombine.low %v54_v25, %v62_v30  ;;  %v1716_v25 = vcombine.high %v150_v19, %v158_v20 }
  0x41   :  { %v1622_v36 = vcombine.high %v55_v31, %v63_v32  ;;  %v1621_v43 = vcombine.low %v55_v31, %v63_v32  ;;  %v1715_v31 = vcombine.low %v150_v19, %v158_v20  ;;  %v129_v19 = vld [vmem:[%s2493_s0 + $0x378] sm:$0xff] }
  0x42   :  { %1094 = vmatpush1.bf16.msra.mxu0 %v1663_v37  ;;  %1137 = vmatpush1.bf16.msra.mxu1 %v1665_v39  ;;  %v70_v37 = vld [vmem:[%s2493_s0 + $0x1a0] sm:$0xff] }
  0x43   :  { %1095 = vmatprep.subr.bf16.mxu0 %v1680_v40  ;;  %1138 = vmatprep.subr.bf16.mxu1 %v1682_v41  ;;  %v78_v39 = vld [vmem:[%s2493_s0 + $0x1e0] sm:$0xff]  ;;  %v71_v40 = vld [vmem:[%s2493_s0 + $0x1a8] sm:$0xff] }
  0x44   :  { %v79_v41 = vld [vmem:[%s2493_s0 + $0x1e8] sm:$0xff]  ;;  %v1636_v44 = vcombine.high %v70_v37, %v78_v39  ;;  %v1635_v54 = vcombine.low %v70_v37, %v78_v39 }
  0x45   :  { %v1638_v47 = vcombine.high %v71_v40, %v79_v41  ;;  %v1637_v55 = vcombine.low %v71_v40, %v79_v41  ;;  %v40_v40 = vld [vmem:[%s2493_s0 + $0xb0] sm:$0xff] }
  0x46   :  { %1096 = vmatpush1.bf16.msra.mxu0 %v1679_v48  ;;  %1139 = vmatpush1.bf16.msra.mxu1 %v1681_v49  ;;  %v86_v48 = vld [vmem:[%s2493_s0 + $0x220] sm:$0xff]  ;;  %v48_v41 = vld [vmem:[%s2493_s0 + $0xf0] sm:$0xff] }
  0x47   :  { %1097 = vmatprep.subr.bf16.mxu0 %v1696_v50  ;;  %1140 = vmatprep.subr.bf16.mxu1 %v1698_v53  ;;  %v94_v49 = vld [vmem:[%s2493_s0 + $0x260] sm:$0xff]  ;;  %v87_v50 = vld [vmem:[%s2493_s0 + $0x228] sm:$0xff] }
  0x48   :  { %v95_v53 = vld [vmem:[%s2493_s0 + $0x268] sm:$0xff]  ;;  %v1652_v56 = vcombine.high %v86_v48, %v94_v49 }
  0x49   :  { %v1654_v57 = vcombine.high %v87_v50, %v95_v53  ;;  %v1653_v63 = vcombine.low %v87_v50, %v95_v53  ;;  %v1607_v50 = vcombine.low %v40_v40, %v48_v41 }
  0x4a   :  { %1098 = vmatpush1.bf16.msra.mxu0 %v1695_v60  ;;  %1141 = vmatpush1.bf16.msra.mxu1 %v1697_v61  ;;  %v103_v60 = vld [vmem:[%s2493_s0 + $0x2a8] sm:$0xff] }
  0x4b   :  { %1099 = vmatprep.subr.bf16.mxu0 %v1712_v62  ;;  %1142 = vmatprep.subr.bf16.mxu1 %v1714_v0  ;;  %v111_v61 = vld [vmem:[%s2493_s0 + $0x2e8] sm:$0xff]  ;;  %v1651_v62 = vcombine.low %v86_v48, %v94_v49  ;;  %v1668_v0 = vcombine.high %v102_v58, %v110_v59  ;;  %v56_v48 = vld [vmem:[%s2493_s0 + $0x130] sm:$0xff]  ;;  %v73_v58 = vld [vmem:[%s2493_s0 + $0x1b8] sm:$0xff] }
  0x4c   :  { %v1670_v1 = vcombine.high %v103_v60, %v111_v61  ;;  %v64_v49 = vld [vmem:[%s2493_s0 + $0x170] sm:$0xff]  ;;  %v81_v59 = vld [vmem:[%s2493_s0 + $0x1f8] sm:$0xff] }
  0x4e   :  { %1100 = vmatpush1.bf16.msra.mxu0 %v1711_v2  ;;  %1143 = vmatpush1.bf16.msra.mxu1 %v1713_v4  ;;  %v118_v2 = vld [vmem:[%s2493_s0 + $0x320] sm:$0xff]  ;;  %v119_v4 = vld [vmem:[%s2493_s0 + $0x328] sm:$0xff] }
  0x4f   :  { %1101 = vmatprep.subr.bf16.mxu0 %v965_v5  ;;  %1144 = vmatprep.subr.bf16.mxu1 %v971_v7  ;;  %v127_v5 = vld [vmem:[%s2493_s0 + $0x368] sm:$0xff]  ;;  %v1669_v7 = vcombine.low %v103_v60, %v111_v61  ;;  %v1684_v8 = vcombine.high %v118_v2, %v126_v3  ;;  %v1623_v60 = vcombine.low %v56_v48, %v64_v49 }
  0x50   :  { %v1686_v9 = vcombine.high %v119_v4, %v127_v5 }
  0x52   :  { %1102 = vmatpush1.bf16.msra.mxu0 %v962_v12  ;;  %1145 = vmatpush1.bf16.msra.mxu1 %v968_v14  ;;  %v135_v12 = vld [vmem:[%s2493_s0 + $0x3a8] sm:$0xff] }
  0x53   :  { %1169 = vmatprep.subr.bf16.mxu0 %v1588_v15  ;;  %1212 = vmatprep.subr.bf16.mxu1 %v1590_v16  ;;  %v143_v14 = vld [vmem:[%s2493_s0 + $0x3e8] sm:$0xff]  ;;  %v1683_v15 = vcombine.low %v118_v2, %v126_v3  ;;  %v1685_v16 = vcombine.low %v119_v4, %v127_v5  ;;  %v97_v2 = vld [vmem:[%s2493_s0 + $0x278] sm:$0xff]  ;;  %v1641_v4 = vcombine.low %v73_v58, %v81_v59 }
  0x54   :  { %v1702_v18 = vcombine.high %v135_v12, %v143_v14 }
  0x55   :  { %1116 = vmatmul.mubr.bf16.vlgmr.msra.gmra.mrb[4].mxu0 %v1973_v27  ;;  %1159 = vmatmul.mubr.bf16.vlgmr.msra.gmra.mrb[4].mxu1 %v1973_v27 }
  0x56   :  { %1170 = vmatpush1.bf16.msra.mxu0 %v1587_v13  ;;  %1213 = vmatpush1.bf16.msra.mxu1 %v1589_v21  ;;  %v151_v13 = vld [vmem:[%s2493_s0 + $0x428] sm:$0xff] }
  0x57   :  { %1171 = vmatprep.subr.bf16.mxu0 %v1604_v22  ;;  %1214 = vmatprep.subr.bf16.mxu1 %v1606_v23  ;;  %v159_v21 = vld [vmem:[%s2493_s0 + $0x468] sm:$0xff]  ;;  %v1699_v22 = vcombine.low %v134_v10, %v142_v11  ;;  %v1701_v23 = vcombine.low %v135_v12, %v143_v14  ;;  %v113_v10 = vld [vmem:[%s2493_s0 + $0x2f8] sm:$0xff] }
  0x58   :  { %1743 = vmatprep.mubr.msk.bf16.mxu0 %vm941_vm0, %v1892_v38  ;;  %1744 = vmatprep.mubr.msk.bf16.mxu1 %vm941_vm0, %v1892_v38  ;;  %v1718_v30 = vcombine.high %v151_v13, %v159_v21  ;;  %v1717_v32 = vcombine.low %v151_v13, %v159_v21 }
  0x5a   :  { %1172 = vmatpush1.bf16.msra.mxu0 %v1603_v33  ;;  %1215 = vmatpush1.bf16.msra.mxu1 %v1605_v34  ;;  %v24_v33 = vld [vmem:[%s2493_s0 + $0x30] sm:$0xff] }
  0x5b   :  { %1173 = vmatprep.subr.bf16.mxu0 %v1620_v35  ;;  %1216 = vmatprep.subr.bf16.mxu1 %v1622_v36  ;;  %v32_v34 = vld [vmem:[%s2493_s0 + $0x70] sm:$0xff]  ;;  %v25_v35 = vld [vmem:[%s2493_s0 + $0x38] sm:$0xff] }
  0x5c   :  { %v33_v36 = vld [vmem:[%s2493_s0 + $0x78] sm:$0xff]  ;;  %v1592_v37 = vcombine.high %v24_v33, %v32_v34 }
  0x5d   :  { %v1594_v39 = vcombine.high %v25_v35, %v33_v36 }
  0x5e   :  { %1174 = vmatpush1.bf16.msra.mxu0 %v1619_v42  ;;  %1217 = vmatpush1.bf16.msra.mxu1 %v1621_v43  ;;  %v41_v42 = vld [vmem:[%s2493_s0 + $0xb8] sm:$0xff]  ;;  %v1593_v43 = vcombine.low %v25_v35, %v33_v36  ;;  %v152_v36 = vld [vmem:[%s2493_s0 + $0x430] sm:$0xff] }
  0x5f   :  { %1175 = vmatprep.subr.bf16.mxu0 %v1636_v44  ;;  %1218 = vmatprep.subr.bf16.mxu1 %v1638_v47  ;;  %v1608_v44 = vcombine.high %v40_v40, %v48_v41  ;;  %v161_v40 = vld [vmem:[%s2493_s0 + $0x478] sm:$0xff] }
  0x62   :  { %1176 = vmatpush1.bf16.msra.mxu0 %v1635_v54  ;;  %1219 = vmatpush1.bf16.msra.mxu1 %v1637_v55  ;;  %v1624_v54 = vcombine.high %v56_v48, %v64_v49 }
  0x63   :  { %1177 = vmatprep.subr.bf16.mxu0 %v1652_v56  ;;  %1220 = vmatprep.subr.bf16.mxu1 %v1654_v57  ;;  %v72_v56 = vld [vmem:[%s2493_s0 + $0x1b0] sm:$0xff] }
  0x64   :  { %v80_v57 = vld [vmem:[%s2493_s0 + $0x1f0] sm:$0xff] }
  0x65   :  { %v1639_v3 = vcombine.low %v72_v56, %v80_v57 }
  0x66   :  { %1178 = vmatpush1.bf16.msra.mxu0 %v1651_v62  ;;  %1221 = vmatpush1.bf16.msra.mxu1 %v1653_v63  ;;  %v1640_v62 = vcombine.high %v72_v56, %v80_v57  ;;  %v1642_v63 = vcombine.high %v73_v58, %v81_v59 }
  0x67   :  { %1179 = vmatprep.subr.bf16.mxu0 %v1668_v0  ;;  %1222 = vmatprep.subr.bf16.mxu1 %v1670_v1  ;;  %v88_v0 = vld [vmem:[%s2493_s0 + $0x230] sm:$0xff] }
  0x68   :  { %v96_v1 = vld [vmem:[%s2493_s0 + $0x270] sm:$0xff] }
  0x69   :  { %v1656_v5 = vcombine.high %v88_v0, %v96_v1  ;;  %v1655_v11 = vcombine.low %v88_v0, %v96_v1 }
  0x6a   :  { %1180 = vmatpush1.bf16.msra.mxu0 %v1667_v6  ;;  %1223 = vmatpush1.bf16.msra.mxu1 %v1669_v7  ;;  %v104_v7 = vld [vmem:[%s2493_s0 + $0x2b0] sm:$0xff] }
  0x6b   :  { %1181 = vmatprep.subr.bf16.mxu0 %v1684_v8  ;;  %1224 = vmatprep.subr.bf16.mxu1 %v1686_v9  ;;  %v112_v8 = vld [vmem:[%s2493_s0 + $0x2f0] sm:$0xff]  ;;  %v105_v9 = vld [vmem:[%s2493_s0 + $0x2b8] sm:$0xff] }
  0x6c   :  { %v1672_v14 = vcombine.high %v104_v7, %v112_v8  ;;  %v1671_v20 = vcombine.low %v104_v7, %v112_v8  ;;  %v1673_v13 = vcombine.low %v105_v9, %v113_v10 }
  0x6e   :  { %1182 = vmatpush1.bf16.msra.mxu0 %v1683_v15  ;;  %1225 = vmatpush1.bf16.msra.mxu1 %v1685_v16  ;;  %v1674_v15 = vcombine.high %v105_v9, %v113_v10  ;;  %v120_v16 = vld [vmem:[%s2493_s0 + $0x330] sm:$0xff] }
  0x6f   :  { %1183 = vmatprep.subr.bf16.mxu0 %v1700_v17  ;;  %1226 = vmatprep.subr.bf16.mxu1 %v1702_v18  ;;  %v128_v17 = vld [vmem:[%s2493_s0 + $0x370] sm:$0xff]  ;;  %v121_v18 = vld [vmem:[%s2493_s0 + $0x338] sm:$0xff] }
  0x70   :  { %v1688_v21 = vcombine.high %v120_v16, %v128_v17 }
  0x72   :  { %1184 = vmatpush1.bf16.msra.mxu0 %v1699_v22  ;;  %1227 = vmatpush1.bf16.msra.mxu1 %v1701_v23  ;;  %v1690_v22 = vcombine.high %v121_v18, %v129_v19  ;;  %v136_v23 = vld [vmem:[%s2493_s0 + $0x3b0] sm:$0xff] }
  0x73   :  { %1185 = vmatprep.subr.bf16.mxu0 %v1716_v25  ;;  %1228 = vmatprep.subr.bf16.mxu1 %v1718_v30  ;;  %v144_v25 = vld [vmem:[%s2493_s0 + $0x3f0] sm:$0xff]  ;;  %v137_v30 = vld [vmem:[%s2493_s0 + $0x3b8] sm:$0xff] }
  0x74   :  { %v1703_v41 = vcombine.low %v136_v23, %v144_v25 }
  0x76   :  { %1186 = vmatpush1.bf16.msra.mxu0 %v1715_v31  ;;  %1229 = vmatpush1.bf16.msra.mxu1 %v1717_v32  ;;  %v145_v31 = vld [vmem:[%s2493_s0 + $0x3f8] sm:$0xff]  ;;  %v1687_v32 = vcombine.low %v120_v16, %v128_v17 }
  0x77   :  { %1187 = vmatprep.subr.bf16.mxu0 %v1997_v45  ;;  %1230 = vmatprep.subr.bf16.mxu1 %v2012_v51  ;;  %v49_v45 = vld [vmem:[%s2493_s0 + $0xf8] sm:$0xff]  ;;  %v1591_v51 = vcombine.low %v24_v33, %v32_v34  ;;  %v1689_v33 = vcombine.low %v121_v18, %v129_v19  ;;  %v1704_v34 = vcombine.high %v136_v23, %v144_v25 }
  0x78   :  { %v1610_v47 = vcombine.high %v41_v42, %v49_v45  ;;  %v1609_v53 = vcombine.low %v41_v42, %v49_v45  ;;  %v1706_v35 = vcombine.high %v137_v30, %v145_v31  ;;  %v1705_v42 = vcombine.low %v137_v30, %v145_v31 }
  0x7a   :  { %1188 = vmatpush1.bf16.msra.mxu0 %v2000_v46  ;;  %1231 = vmatpush1.bf16.msra.mxu1 %v2015_v52  ;;  %v57_v46 = vld [vmem:[%s2493_s0 + $0x138] sm:$0xff] }
  0x7b   :  { %1255 = vmatprep.subr.bf16.mxu0 %v1592_v37  ;;  %1298 = vmatprep.subr.bf16.mxu1 %v1594_v39  ;;  %v65_v52 = vld [vmem:[%s2493_s0 + $0x178] sm:$0xff]  ;;  %v160_v37 = vld [vmem:[%s2493_s0 + $0x470] sm:$0xff] }
  0x7c   :  { %v1626_v55 = vcombine.high %v57_v46, %v65_v52  ;;  %v1625_v61 = vcombine.low %v57_v46, %v65_v52  ;;  %v153_v39 = vld [vmem:[%s2493_s0 + $0x438] sm:$0xff]  ;;  %v1720_v45 = vcombine.high %v152_v36, %v160_v37 }
  0x7d   :  { %1202 = vmatmul.mubr.bf16.vlgmr.msra.gmra.mrb[8].mxu0 %v1973_v27  ;;  %1245 = vmatmul.mubr.bf16.vlgmr.msra.gmra.mrb[8].mxu1 %v1973_v27 }
  0x7e   :  { %1256 = vmatpush1.bf16.msra.mxu0 %v1591_v51  ;;  %1299 = vmatpush1.bf16.msra.mxu1 %v1593_v43  ;;  %v1722_v51 = vcombine.high %v153_v39, %v161_v40  ;;  %v1719_v43 = vcombine.low %v152_v36, %v160_v37 }
  0x7f   :  { %1257 = vmatprep.subr.bf16.mxu0 %v1608_v44  ;;  %1300 = vmatprep.subr.bf16.mxu1 %v1610_v47  ;;  %v1721_v44 = vcombine.low %v153_v39, %v161_v40 }
  0x80   :  { %1745 = vmatprep.mubr.msk.bf16.mxu0 %vm941_vm0, %v1892_v38  ;;  %1746 = vmatprep.mubr.msk.bf16.mxu1 %vm941_vm0, %v1892_v38  ;;  %v89_v38 = vld [vmem:[%s2493_s0 + $0x238] sm:$0xff] }
  0x81   :  { %v1658_v6 = vcombine.high %v89_v38, %v97_v2  ;;  %v1657_v12 = vcombine.low %v89_v38, %v97_v2 }
  0x82   :  { %1258 = vmatpush1.bf16.msra.mxu0 %v1607_v50  ;;  %1301 = vmatpush1.bf16.msra.mxu1 %v1609_v53 }
  0x83   :  { %1259 = vmatprep.subr.bf16.mxu0 %v1624_v54  ;;  %1302 = vmatprep.subr.bf16.mxu1 %v1626_v55 }
  0x86   :  { %1260 = vmatpush1.bf16.msra.mxu0 %v1623_v60  ;;  %1303 = vmatpush1.bf16.msra.mxu1 %v1625_v61 }
  0x87   :  { %1261 = vmatprep.subr.bf16.mxu0 %v1640_v62  ;;  %1304 = vmatprep.subr.bf16.mxu1 %v1642_v63 }
  0x8a   :  { %1262 = vmatpush1.bf16.msra.mxu0 %v1639_v3  ;;  %1305 = vmatpush1.bf16.msra.mxu1 %v1641_v4 }
  0x8b   :  { %1263 = vmatprep.subr.bf16.mxu0 %v1656_v5  ;;  %1306 = vmatprep.subr.bf16.mxu1 %v1658_v6 }
  0x8e   :  { %1264 = vmatpush1.bf16.msra.mxu0 %v1655_v11  ;;  %1307 = vmatpush1.bf16.msra.mxu1 %v1657_v12 }
  0x8f   :  { %1265 = vmatprep.subr.bf16.mxu0 %v1672_v14  ;;  %1308 = vmatprep.subr.bf16.mxu1 %v1674_v15 }
  0x92   :  { %1266 = vmatpush1.bf16.msra.mxu0 %v1671_v20  ;;  %1309 = vmatpush1.bf16.msra.mxu1 %v1673_v13 }
  0x93   :  { %1267 = vmatprep.subr.bf16.mxu0 %v1688_v21  ;;  %1310 = vmatprep.subr.bf16.mxu1 %v1690_v22 }
  0x96   :  { %1268 = vmatpush1.bf16.msra.mxu0 %v1687_v32  ;;  %1311 = vmatpush1.bf16.msra.mxu1 %v1689_v33 }
  0x97   :  { %1269 = vmatprep.subr.bf16.mxu0 %v1704_v34  ;;  %1312 = vmatprep.subr.bf16.mxu1 %v1706_v35  ;;  %v2373_v47 = vpop.permute.xlu0 %1345 }
  0x98   :  { %v2375_v48 = vpop.permute.xlu1 %1389 }
  0x9a   :  { %1270 = vmatpush1.bf16.msra.mxu0 %v1703_v41  ;;  %1313 = vmatpush1.bf16.msra.mxu1 %v1705_v42 }
  0x9b   :  { %1271 = vmatprep.subr.bf16.mxu0 %v1720_v45  ;;  %1314 = vmatprep.subr.bf16.mxu1 %v1722_v51  ;;  %v2377_v49 = vpop.permute.xlu0 %1350 }
  0x9c   :  { %v2379_v52 = vpop.permute.xlu1 %1394 }
  0x9e   :  { %1272 = vmatpush1.bf16.msra.mxu0 %v1719_v43  ;;  %1315 = vmatpush1.bf16.msra.mxu1 %v1721_v44 }
  0x9f   :  { %1273 = vmatprep.subr.bf16.mxu0 %v2081_v26  ;;  %1316 = vmatprep.subr.bf16.mxu1 %v2084_v28 }
  0xa2   :  { %1274 = vmatpush1.bf16.msra.mxu0 %v2078_v24  ;;  %1317 = vmatpush1.bf16.msra.mxu1 %v2087_v29 }
  0xa5   :  { %1288 = vmatmul.mubr.bf16.vlgmr.msra.gmra.mrb[12].mxu0 %v1973_v27  ;;  %1331 = vmatmul.mubr.bf16.vlgmr.msra.gmra.mrb[12].mxu1 %v1973_v27 }
 0x100   :  { %v1031_v46 = vpop.f32.mrb[0].mxu0  ;;  %v1074_v28 = vpop.f32.mrb[0].mxu1 }
 0x101   :  { %v1353_v26 = vmul.f32 %v2373_v47, %v1031_v46  ;;  %v1033_v50 = vpop.f32.mrb[1].mxu0  ;;  %v1355_v24 = vmul.f32 %v2373_v47, %v1074_v28  ;;  %v1076_v53 = vpop.f32.mrb[1].mxu1 }
 0x102   :  { %v1354_v29 = vmul.f32 %v2373_v47, %v1033_v50  ;;  %v1035_v54 = vpop.f32.mrb[2].mxu0  ;;  %v1356_v55 = vmul.f32 %v2373_v47, %v1076_v53  ;;  %v1078_v57 = vpop.f32.mrb[2].mxu1 }
 0x103   :  { %v1397_v27 = vadd.f32 %v2375_v48, %v1353_v26  ;;  %v1369_v56 = vmul.f32 %v2377_v49, %v1035_v54  ;;  %v1037_v58 = vpop.f32.mrb[3].mxu0  ;;  %v1399_v59 = vadd.f32 %v2375_v48, %v1355_v24  ;;  %v1371_v61 = vmul.f32 %v2377_v49, %v1078_v57  ;;  %v1080_v63 = vpop.f32.mrb[3].mxu1 }
 0x104   :  { %v1398_v60 = vadd.f32 %v2375_v48, %v1354_v29  ;;  %v1370_v62 = vmul.f32 %v2377_v49, %v1037_v58  ;;  %v1400_v1 = vadd.f32 %v2375_v48, %v1356_v55  ;;  %v1372_v38 = vmul.f32 %v2377_v49, %v1080_v63 }
 0x105   :  { %v1429_v0 = vmax.f32 %v1397_v27, 0.0  ;;  %v1413_v2 = vadd.f32 %v2379_v52, %v1369_v56  ;;  %v1431_v3 = vmax.f32 %v1399_v59, 0.0  ;;  %v1415_v6 = vadd.f32 %v2379_v52, %v1371_v61 }
 0x106   :  { %v1430_v4 = vmax.f32 %v1398_v60, 0.0  ;;  %v1414_v5 = vadd.f32 %v2379_v52, %v1370_v62  ;;  %v1432_v7 = vmax.f32 %v1400_v1, 0.0  ;;  %v1416_v8 = vadd.f32 %v2379_v52, %v1372_v38 }
 0x107   :  { %v1445_v9 = vmax.f32 %v1413_v2, 0.0  ;;  %v1447_v12 = vmax.f32 %v1415_v6, 0.0 }
 0x108   :  { %v1763_v10 = vpack.c.bf16 %v1430_v4, %v1429_v0  ;;  %v1446_v11 = vmax.f32 %v1414_v5, 0.0  ;;  %v1764_v14 = vpack.c.bf16 %v1432_v7, %v1431_v3  ;;  %v1448_v15 = vmax.f32 %v1416_v8, 0.0 }
 0x10a   :  { %1557 = vst [vmem:[%s2497_s4] sm:$0xff] %v1763_v10  ;;  %v1771_v16 = vpack.c.bf16 %v1446_v11, %v1445_v9  ;;  %1558 = vst [vmem:[%s2497_s4 + $0x8] sm:$0xff] %v1764_v14  ;;  %v1772_v17 = vpack.c.bf16 %v1448_v15, %v1447_v12 }
 0x10c   :  { %1565 = vst [vmem:[%s2497_s4 + $0x40] sm:$0xff] %v1771_v16  ;;  %1566 = vst [vmem:[%s2497_s4 + $0x48] sm:$0xff] %v1772_v17 }
 0x128   :  { %v1117_v18 = vpop.f32.mrb[4].mxu0  ;;  %v1160_v20 = vpop.f32.mrb[4].mxu1 }
 0x129   :  { %v1357_v19 = vmul.f32 %v2373_v47, %v1117_v18  ;;  %v1119_v13 = vpop.f32.mrb[5].mxu0  ;;  %v1359_v21 = vmul.f32 %v2373_v47, %v1160_v20  ;;  %v1162_v23 = vpop.f32.mrb[5].mxu1 }
 0x12a   :  { %v1358_v22 = vmul.f32 %v2373_v47, %v1119_v13  ;;  %v1121_v25 = vpop.f32.mrb[6].mxu0  ;;  %v1360_v31 = vmul.f32 %v2373_v47, %v1162_v23  ;;  %v1164_v33 = vpop.f32.mrb[6].mxu1 }
 0x12b   :  { %v1401_v30 = vadd.f32 %v2375_v48, %v1357_v19  ;;  %v1373_v32 = vmul.f32 %v2377_v49, %v1121_v25  ;;  %v1123_v34 = vpop.f32.mrb[7].mxu0  ;;  %v1403_v35 = vadd.f32 %v2375_v48, %v1359_v21  ;;  %v1375_v37 = vmul.f32 %v2377_v49, %v1164_v33  ;;  %v1166_v40 = vpop.f32.mrb[7].mxu1 }
 0x12c   :  { %v1402_v36 = vadd.f32 %v2375_v48, %v1358_v22  ;;  %v1374_v39 = vmul.f32 %v2377_v49, %v1123_v34  ;;  %v1404_v42 = vadd.f32 %v2375_v48, %v1360_v31  ;;  %v1376_v51 = vmul.f32 %v2377_v49, %v1166_v40 }
 0x12d   :  { %v1433_v41 = vmax.f32 %v1401_v30, 0.0  ;;  %v1417_v45 = vadd.f32 %v2379_v52, %v1373_v32  ;;  %v1435_v43 = vmax.f32 %v1403_v35, 0.0  ;;  %v1419_v46 = vadd.f32 %v2379_v52, %v1375_v37 }
 0x12e   :  { %v1434_v44 = vmax.f32 %v1402_v36, 0.0  ;;  %v1418_v26 = vadd.f32 %v2379_v52, %v1374_v39  ;;  %v1436_v28 = vmax.f32 %v1404_v42, 0.0  ;;  %v1420_v24 = vadd.f32 %v2379_v52, %v1376_v51 }
 0x12f   :  { %v1449_v50 = vmax.f32 %v1417_v45, 0.0  ;;  %v1451_v53 = vmax.f32 %v1419_v46, 0.0 }
 0x130   :  { %v1765_v29 = vpack.c.bf16 %v1434_v44, %v1433_v41  ;;  %v1450_v54 = vmax.f32 %v1418_v26, 0.0  ;;  %v1766_v27 = vpack.c.bf16 %v1436_v28, %v1435_v43  ;;  %v1452_v55 = vmax.f32 %v1420_v24, 0.0 }
 0x132   :  { %1559 = vst [vmem:[%s2497_s4 + $0x10] sm:$0xff] %v1765_v29  ;;  %v1773_v56 = vpack.c.bf16 %v1450_v54, %v1449_v50  ;;  %1560 = vst [vmem:[%s2497_s4 + $0x18] sm:$0xff] %v1766_v27  ;;  %v1774_v57 = vpack.c.bf16 %v1452_v55, %v1451_v53 }
 0x134   :  { %1567 = vst [vmem:[%s2497_s4 + $0x50] sm:$0xff] %v1773_v56  ;;  %1568 = vst [vmem:[%s2497_s4 + $0x58] sm:$0xff] %v1774_v57 }
 0x150   :  { %v1203_v58 = vpop.f32.mrb[8].mxu0  ;;  %v1246_v60 = vpop.f32.mrb[8].mxu1 }
 0x151   :  { %v1361_v59 = vmul.f32 %v2373_v47, %v1203_v58  ;;  %v1205_v61 = vpop.f32.mrb[9].mxu0  ;;  %v1363_v62 = vmul.f32 %v2373_v47, %v1246_v60  ;;  %v1248_v0 = vpop.f32.mrb[9].mxu1 }
 0x152   :  { %v1362_v63 = vmul.f32 %v2373_v47, %v1205_v61  ;;  %v1207_v1 = vpop.f32.mrb[10].mxu0  ;;  %v1364_v2 = vmul.f32 %v2373_v47, %v1248_v0  ;;  %v1250_v4 = vpop.f32.mrb[10].mxu1 }
 0x153   :  { %v1405_v38 = vadd.f32 %v2375_v48, %v1361_v59  ;;  %v1377_v3 = vmul.f32 %v2377_v49, %v1207_v1  ;;  %v1209_v5 = vpop.f32.mrb[11].mxu0  ;;  %v1407_v6 = vadd.f32 %v2375_v48, %v1363_v62  ;;  %v1379_v8 = vmul.f32 %v2377_v49, %v1250_v4  ;;  %v1252_v10 = vpop.f32.mrb[11].mxu1 }
 0x154   :  { %v1406_v7 = vadd.f32 %v2375_v48, %v1362_v63  ;;  %v1378_v9 = vmul.f32 %v2377_v49, %v1209_v5  ;;  %v1408_v12 = vadd.f32 %v2375_v48, %v1364_v2  ;;  %v1380_v15 = vmul.f32 %v2377_v49, %v1252_v10 }
 0x155   :  { %v1437_v11 = vmax.f32 %v1405_v38, 0.0  ;;  %v1421_v14 = vadd.f32 %v2379_v52, %v1377_v3  ;;  %v1439_v16 = vmax.f32 %v1407_v6, 0.0  ;;  %v1423_v18 = vadd.f32 %v2379_v52, %v1379_v8 }
 0x156   :  { %v1438_v17 = vmax.f32 %v1406_v7, 0.0  ;;  %v1422_v19 = vadd.f32 %v2379_v52, %v1378_v9  ;;  %v1440_v20 = vmax.f32 %v1408_v12, 0.0  ;;  %v1424_v21 = vadd.f32 %v2379_v52, %v1380_v15 }
 0x157   :  { %v1453_v13 = vmax.f32 %v1421_v14, 0.0  ;;  %v1455_v23 = vmax.f32 %v1423_v18, 0.0 }
 0x158   :  { %v1767_v22 = vpack.c.bf16 %v1438_v17, %v1437_v11  ;;  %v1454_v25 = vmax.f32 %v1422_v19, 0.0  ;;  %v1768_v30 = vpack.c.bf16 %v1440_v20, %v1439_v16  ;;  %v1456_v31 = vmax.f32 %v1424_v21, 0.0 }
 0x15a   :  { %1561 = vst [vmem:[%s2497_s4 + $0x20] sm:$0xff] %v1767_v22  ;;  %v1775_v32 = vpack.c.bf16 %v1454_v25, %v1453_v13  ;;  %1562 = vst [vmem:[%s2497_s4 + $0x28] sm:$0xff] %v1768_v30  ;;  %v1776_v33 = vpack.c.bf16 %v1456_v31, %v1455_v23 }
 0x15c   :  { %1569 = vst [vmem:[%s2497_s4 + $0x60] sm:$0xff] %v1775_v32  ;;  %1570 = vst [vmem:[%s2497_s4 + $0x68] sm:$0xff] %v1776_v33 }
 0x178   :  { %v1289_v34 = vpop.f32.mrb[12].mxu0  ;;  %v1332_v36 = vpop.f32.mrb[12].mxu1 }
 0x179   :  { %v1365_v35 = vmul.f32 %v2373_v47, %v1289_v34  ;;  %v1291_v37 = vpop.f32.mrb[13].mxu0  ;;  %v1367_v39 = vmul.f32 %v2373_v47, %v1332_v36  ;;  %v1334_v41 = vpop.f32.mrb[13].mxu1 }
 0x17a   :  { %v1366_v40 = vmul.f32 %v2373_v47, %v1291_v37  ;;  %v1293_v42 = vpop.f32.mrb[14].mxu0  ;;  %v1368_v51 = vmul.f32 %v2373_v47, %v1334_v41  ;;  %v1336_v44 = vpop.f32.mrb[14].mxu1 }
 0x17b   :  { %v1409_v45 = vadd.f32 %v2375_v48, %v1365_v35  ;;  %v1381_v43 = vmul.f32 %v2377_v49, %v1293_v42  ;;  %v1295_v46 = vpop.f32.mrb[15].mxu0  ;;  %v1411_v26 = vadd.f32 %v2375_v48, %v1367_v39  ;;  %v1383_v50 = vmul.f32 %v2377_v49, %v1336_v44  ;;  %v1338_v29 = vpop.f32.mrb[15].mxu1 }
 0x17c   :  { %v1410_v28 = vadd.f32 %v2375_v48, %v1366_v40  ;;  %v1382_v24 = vmul.f32 %v2377_v49, %v1295_v46  ;;  %v1412_v54 = vadd.f32 %v2375_v48, %v1368_v51  ;;  %v1384_v47 = vmul.f32 %v2377_v49, %v1338_v29 }
 0x17d   :  { %v1441_v53 = vmax.f32 %v1409_v45, 0.0  ;;  %v1425_v27 = vadd.f32 %v2379_v52, %v1381_v43  ;;  %v1443_v55 = vmax.f32 %v1411_v26, 0.0  ;;  %v1427_v57 = vadd.f32 %v2379_v52, %v1383_v50 }
 0x17e   :  { %v1442_v56 = vmax.f32 %v1410_v28, 0.0  ;;  %v1426_v58 = vadd.f32 %v2379_v52, %v1382_v24  ;;  %v1444_v59 = vmax.f32 %v1412_v54, 0.0  ;;  %v1428_v61 = vadd.f32 %v2379_v52, %v1384_v47 }
 0x17f   :  { %v1457_v60 = vmax.f32 %v1425_v27, 0.0  ;;  %v1459_v63 = vmax.f32 %v1427_v57, 0.0 }
 0x180   :  { %v1769_v62 = vpack.c.bf16 %v1442_v56, %v1441_v53  ;;  %v1458_v0 = vmax.f32 %v1426_v58, 0.0  ;;  %v1770_v1 = vpack.c.bf16 %v1444_v59, %v1443_v55  ;;  %v1460_v38 = vmax.f32 %v1428_v61, 0.0 }
 0x182   :  { %1563 = vst [vmem:[%s2497_s4 + $0x30] sm:$0xff] %v1769_v62  ;;  %v1777_v48 = vpack.c.bf16 %v1458_v0, %v1457_v60  ;;  %1564 = vst [vmem:[%s2497_s4 + $0x38] sm:$0xff] %v1770_v1  ;;  %v1778_v49 = vpack.c.bf16 %v1460_v38, %v1459_v63 }
 0x184   :  { %1571 = vst [vmem:[%s2497_s4 + $0x70] sm:$0xff] %v1777_v48  ;;  %1572 = vst [vmem:[%s2497_s4 + $0x78] sm:$0xff] %v1778_v49 }

// kernel: _lambda_.12
= control target key start
LH: loop header
LB: loop body
LE: loop exit
PB: predicated region body
PF: predicated region fallthrough
CT: control target
= control target key end

     0   :  { %vm463_vm0 = vcmask 261120   ;;  %s1114_s0 = inlined_call_operand.vmem [shape: bf16[288,512], index: 0, kind: input, shape index: {}]   ;;  %s1115_s1 = inlined_call_operand.vmem [shape: bf16[16,288], index: 1, kind: input, shape index: {}]   ;;  %s1116_s2 = inlined_call_operand.vmem [shape: f32[16,512], index: 2, kind: output, shape index: {}]  }
   0x1   :  { %v737_v0 = vld [vmem:[%s1114_s0 + $0x4] ss:$16 sps:$4 sm:$0xff]   ;;  %v739_v1 = vld [vmem:[%s1114_s0 + $0xc] ss:$16 sps:$4 sm:$0xff]   ;;  %v741_v2 = vld [vmem:[%s1114_s0] ss:$16 sps:$4 sm:$0xff]  }
   0x2   :  { %467 = vmatprep.subr.bf16.mxu0 %v737_v0  ;;  %v742_v3 = vld [vmem:[%s1114_s0 + $0x8] ss:$16 sps:$4 sm:$0xff]   ;;  %553 = vmatprep.subr.bf16.mxu1 %v739_v1  ;;  %v743_v4 = vld [vmem:[%s1114_s0 + $0x24] ss:$16 sps:$4 sm:$0xff]   ;;  %v745_v5 = vld [vmem:[%s1114_s0 + $0x2c] ss:$16 sps:$4 sm:$0xff]  }
   0x3   :  { %468 = vmatpush1.bf16.msra.mxu0 %v741_v2  ;;  %554 = vmatpush1.bf16.msra.mxu1 %v742_v3  ;;  %v747_v6 = vld [vmem:[%s1114_s0 + $0x20] ss:$16 sps:$4 sm:$0xff]   ;;  %v748_v7 = vld [vmem:[%s1114_s0 + $0x28] ss:$16 sps:$4 sm:$0xff]   ;;  %v749_v8 = vld [vmem:[%s1114_s0 + $0x44] ss:$16 sps:$4 sm:$0xff]  }
   0x4   :  { %469 = vmatprep.subr.bf16.mxu0 %v743_v4  ;;  %555 = vmatprep.subr.bf16.mxu1 %v745_v5  ;;  %v751_v9 = vld [vmem:[%s1114_s0 + $0x4c] ss:$16 sps:$4 sm:$0xff]   ;;  %v753_v10 = vld [vmem:[%s1114_s0 + $0x40] ss:$16 sps:$4 sm:$0xff]   ;;  %v754_v11 = vld [vmem:[%s1114_s0 + $0x48] ss:$16 sps:$4 sm:$0xff]  }
   0x5   :  { %v755_v12 = vld [vmem:[%s1114_s0 + $0x64] ss:$16 sps:$4 sm:$0xff]   ;;  %v757_v13 = vld [vmem:[%s1114_s0 + $0x6c] ss:$16 sps:$4 sm:$0xff]   ;;  %v759_v14 = vld [vmem:[%s1114_s0 + $0x60] ss:$16 sps:$4 sm:$0xff]  }
   0x6   :  { %v760_v15 = vld [vmem:[%s1114_s0 + $0x68] ss:$16 sps:$4 sm:$0xff]   ;;  %v761_v16 = vld [vmem:[%s1114_s0 + $0x84] ss:$16 sps:$4 sm:$0xff]   ;;  %v763_v17 = vld [vmem:[%s1114_s0 + $0x8c] ss:$16 sps:$4 sm:$0xff]  }
   0x7   :  { %470 = vmatpush1.bf16.msra.mxu0 %v747_v6  ;;  %556 = vmatpush1.bf16.msra.mxu1 %v748_v7  ;;  %v765_v18 = vld [vmem:[%s1114_s0 + $0x80] ss:$16 sps:$4 sm:$0xff]   ;;  %v766_v19 = vld [vmem:[%s1114_s0 + $0x88] ss:$16 sps:$4 sm:$0xff]   ;;  %v767_v20 = vld [vmem:[%s1114_s0 + $0xa4] ss:$16 sps:$4 sm:$0xff]  }
   0x8   :  { %471 = vmatprep.subr.bf16.mxu0 %v749_v8  ;;  %557 = vmatprep.subr.bf16.mxu1 %v751_v9  ;;  %v769_v21 = vld [vmem:[%s1114_s0 + $0xac] ss:$16 sps:$4 sm:$0xff]   ;;  %v771_v22 = vld [vmem:[%s1114_s0 + $0xa0] ss:$16 sps:$4 sm:$0xff]   ;;  %v772_v23 = vld [vmem:[%s1114_s0 + $0xa8] ss:$16 sps:$4 sm:$0xff]  }
   0x9   :  { %v773_v24 = vld [vmem:[%s1114_s0 + $0xc4] ss:$16 sps:$4 sm:$0xff]   ;;  %v775_v25 = vld [vmem:[%s1114_s0 + $0xcc] ss:$16 sps:$4 sm:$0xff]   ;;  %v777_v26 = vld [vmem:[%s1114_s0 + $0xc0] ss:$16 sps:$4 sm:$0xff]  }
   0xa   :  { %v778_v27 = vld [vmem:[%s1114_s0 + $0xc8] ss:$16 sps:$4 sm:$0xff]   ;;  %v779_v28 = vld [vmem:[%s1114_s0 + $0xe4] ss:$16 sps:$4 sm:$0xff]   ;;  %v781_v29 = vld [vmem:[%s1114_s0 + $0xec] ss:$16 sps:$4 sm:$0xff]  }
   0xb   :  { %472 = vmatpush1.bf16.msra.mxu0 %v753_v10  ;;  %558 = vmatpush1.bf16.msra.mxu1 %v754_v11  ;;  %v783_v30 = vld [vmem:[%s1114_s0 + $0xe0] ss:$16 sps:$4 sm:$0xff]   ;;  %v784_v31 = vld [vmem:[%s1114_s0 + $0xe8] ss:$16 sps:$4 sm:$0xff]   ;;  %v785_v32 = vld [vmem:[%s1114_s0 + $0x104] ss:$16 sps:$4 sm:$0xff]  }
   0xc   :  { %473 = vmatprep.subr.bf16.mxu0 %v755_v12  ;;  %559 = vmatprep.subr.bf16.mxu1 %v757_v13  ;;  %v787_v33 = vld [vmem:[%s1114_s0 + $0x10c] ss:$16 sps:$4 sm:$0xff]   ;;  %v789_v34 = vld [vmem:[%s1114_s0 + $0x100] ss:$16 sps:$4 sm:$0xff]   ;;  %v790_v35 = vld [vmem:[%s1114_s0 + $0x108] ss:$16 sps:$4 sm:$0xff]  }
   0xd   :  { %v791_v36 = vld [vmem:[%s1114_s0 + $0x124] ss:$16 sps:$4 sm:$0xff]   ;;  %v793_v37 = vld [vmem:[%s1114_s0 + $0x12c] ss:$16 sps:$4 sm:$0xff]   ;;  %v795_v38 = vld [vmem:[%s1114_s0 + $0x120] ss:$16 sps:$4 sm:$0xff]  }
   0xe   :  { %v796_v39 = vld [vmem:[%s1114_s0 + $0x128] ss:$16 sps:$4 sm:$0xff]   ;;  %v797_v40 = vld [vmem:[%s1114_s0 + $0x144] ss:$16 sps:$4 sm:$0xff]   ;;  %v799_v41 = vld [vmem:[%s1114_s0 + $0x14c] ss:$16 sps:$4 sm:$0xff]  }
   0xf   :  { %474 = vmatpush1.bf16.msra.mxu0 %v759_v14  ;;  %560 = vmatpush1.bf16.msra.mxu1 %v760_v15  ;;  %v801_v42 = vld [vmem:[%s1114_s0 + $0x140] ss:$16 sps:$4 sm:$0xff]   ;;  %v802_v43 = vld [vmem:[%s1114_s0 + $0x148] ss:$16 sps:$4 sm:$0xff]   ;;  %v803_v44 = vld [vmem:[%s1114_s0 + $0x164] ss:$16 sps:$4 sm:$0xff]  }
  0x10   :  { %475 = vmatprep.subr.bf16.mxu0 %v761_v16  ;;  %561 = vmatprep.subr.bf16.mxu1 %v763_v17  ;;  %v805_v45 = vld [vmem:[%s1114_s0 + $0x16c] ss:$16 sps:$4 sm:$0xff]   ;;  %v807_v46 = vld [vmem:[%s1114_s0 + $0x160] ss:$16 sps:$4 sm:$0xff]   ;;  %v808_v47 = vld [vmem:[%s1114_s0 + $0x168] ss:$16 sps:$4 sm:$0xff]  }
  0x11   :  { %v809_v48 = vld [vmem:[%s1114_s0 + $0x184] ss:$16 sps:$4 sm:$0xff]   ;;  %v811_v50 = vld [vmem:[%s1114_s0 + $0x18c] ss:$16 sps:$4 sm:$0xff]   ;;  %v813_v51 = vld [vmem:[%s1114_s0 + $0x180] ss:$16 sps:$4 sm:$0xff]  }
  0x12   :  { %v835_v49 = vld [vmem:[%s1115_s1 + $0x4] ss:$12 sps:$4 sm:$0xff]   ;;  %v814_v52 = vld [vmem:[%s1114_s0 + $0x188] ss:$16 sps:$4 sm:$0xff]   ;;  %v817_v54 = vld [vmem:[%s1114_s0 + $0x1ac] ss:$16 sps:$4 sm:$0xff]  }
  0x13   :  { %476 = vmatpush1.bf16.msra.mxu0 %v765_v18  ;;  %562 = vmatpush1.bf16.msra.mxu1 %v766_v19  ;;  %v815_v53 = vld [vmem:[%s1114_s0 + $0x1a4] ss:$16 sps:$4 sm:$0xff]   ;;  %v819_v55 = vld [vmem:[%s1114_s0 + $0x1a0] ss:$16 sps:$4 sm:$0xff]   ;;  %v820_v56 = vld [vmem:[%s1114_s0 + $0x1a8] ss:$16 sps:$4 sm:$0xff]  }
  0x14   :  { %477 = vmatprep.subr.bf16.mxu0 %v767_v20  ;;  %563 = vmatprep.subr.bf16.mxu1 %v769_v21  ;;  %v821_v57 = vld [vmem:[%s1114_s0 + $0x1c4] ss:$16 sps:$4 sm:$0xff]   ;;  %v823_v58 = vld [vmem:[%s1114_s0 + $0x1cc] ss:$16 sps:$4 sm:$0xff]   ;;  %v825_v59 = vld [vmem:[%s1114_s0 + $0x1c0] ss:$16 sps:$4 sm:$0xff]  }
  0x15   :  { %499 = vmatprep.mubr.bf16.mxu0 %v835_v49  ;;  %585 = vmatprep.mubr.bf16.mxu1 %v835_v49  ;;  %v826_v60 = vld [vmem:[%s1114_s0 + $0x1c8] ss:$16 sps:$4 sm:$0xff]   ;;  %v827_v61 = vld [vmem:[%s1114_s0 + $0x1e4] ss:$16 sps:$4 sm:$0xff]   ;;  %v829_v62 = vld [vmem:[%s1114_s0 + $0x1ec] ss:$16 sps:$4 sm:$0xff]  }
  0x16   :  { %v831_v63 = vld [vmem:[%s1114_s0 + $0x1e0] ss:$16 sps:$4 sm:$0xff]   ;;  %v832_v0 = vld [vmem:[%s1114_s0 + $0x1e8] ss:$16 sps:$4 sm:$0xff]   ;;  %v839_v1 = vld [vmem:[%s1114_s0 + $0x204] ss:$16 sps:$4 sm:$0xff]  }
  0x17   :  { %478 = vmatpush1.bf16.msra.mxu0 %v771_v22  ;;  %564 = vmatpush1.bf16.msra.mxu1 %v772_v23  ;;  %v842_v2 = vld [vmem:[%s1114_s0 + $0x20c] ss:$16 sps:$4 sm:$0xff]   ;;  %v837_v4 = vld [vmem:[%s1114_s0 + $0x200] ss:$16 sps:$4 sm:$0xff]   ;;  %v840_v5 = vld [vmem:[%s1114_s0 + $0x208] ss:$16 sps:$4 sm:$0xff]  }
  0x18   :  { %479 = vmatprep.subr.bf16.mxu0 %v773_v24  ;;  %565 = vmatprep.subr.bf16.mxu1 %v775_v25  ;;  %v833_v3 = vld [vmem:[%s1115_s1] ss:$12 sps:$4 sm:$0xff]   ;;  %v845_v6 = vld [vmem:[%s1114_s0 + $0x224] ss:$16 sps:$4 sm:$0xff]   ;;  %v846_v9 = vld [vmem:[%s1114_s0 + $0x228] ss:$16 sps:$4 sm:$0xff]  }
  0x19   :  { %v848_v7 = vld [vmem:[%s1114_s0 + $0x22c] ss:$16 sps:$4 sm:$0xff]   ;;  %v843_v8 = vld [vmem:[%s1114_s0 + $0x220] ss:$16 sps:$4 sm:$0xff]   ;;  %v849_v10 = vmov 0  }
  0x1a   :  { %v836_v11 = vld [vmem:[%s1115_s1 + $0x8] ss:$12 sps:$4 sm:$0xff]  }
  0x1b   :  { %480 = vmatpush1.bf16.msra.mxu0 %v777_v26  ;;  %566 = vmatpush1.bf16.msra.mxu1 %v778_v27 }
  0x1c   :  { %481 = vmatprep.subr.bf16.mxu0 %v779_v28  ;;  %567 = vmatprep.subr.bf16.mxu1 %v781_v29 }
  0x1f   :  { %482 = vmatpush1.bf16.msra.mxu0 %v783_v30  ;;  %568 = vmatpush1.bf16.msra.mxu1 %v784_v31 }
  0x20   :  { %483 = vmatprep.subr.bf16.mxu0 %v785_v32  ;;  %569 = vmatprep.subr.bf16.mxu1 %v787_v33 }
  0x23   :  { %484 = vmatpush1.bf16.msra.mxu0 %v789_v34  ;;  %570 = vmatpush1.bf16.msra.mxu1 %v790_v35 }
  0x24   :  { %485 = vmatprep.subr.bf16.mxu0 %v791_v36  ;;  %571 = vmatprep.subr.bf16.mxu1 %v793_v37 }
  0x27   :  { %486 = vmatpush1.bf16.msra.mxu0 %v795_v38  ;;  %572 = vmatpush1.bf16.msra.mxu1 %v796_v39 }
  0x28   :  { %487 = vmatprep.subr.bf16.mxu0 %v797_v40  ;;  %573 = vmatprep.subr.bf16.mxu1 %v799_v41 }
  0x2b   :  { %488 = vmatpush1.bf16.msra.mxu0 %v801_v42  ;;  %574 = vmatpush1.bf16.msra.mxu1 %v802_v43 }
  0x2c   :  { %489 = vmatprep.subr.bf16.mxu0 %v803_v44  ;;  %575 = vmatprep.subr.bf16.mxu1 %v805_v45 }
  0x2f   :  { %490 = vmatpush1.bf16.msra.mxu0 %v807_v46  ;;  %576 = vmatpush1.bf16.msra.mxu1 %v808_v47 }
  0x30   :  { %491 = vmatprep.subr.bf16.mxu0 %v809_v48  ;;  %577 = vmatprep.subr.bf16.mxu1 %v811_v50 }
  0x33   :  { %492 = vmatpush1.bf16.msra.mxu0 %v813_v51  ;;  %578 = vmatpush1.bf16.msra.mxu1 %v814_v52 }
  0x34   :  { %493 = vmatprep.subr.bf16.mxu0 %v815_v53  ;;  %579 = vmatprep.subr.bf16.mxu1 %v817_v54 }
  0x37   :  { %494 = vmatpush1.bf16.msra.mxu0 %v819_v55  ;;  %580 = vmatpush1.bf16.msra.mxu1 %v820_v56 }
  0x38   :  { %495 = vmatprep.subr.bf16.mxu0 %v821_v57  ;;  %581 = vmatprep.subr.bf16.mxu1 %v823_v58 }
  0x3b   :  { %496 = vmatpush1.bf16.msra.mxu0 %v825_v59  ;;  %582 = vmatpush1.bf16.msra.mxu1 %v826_v60 }
  0x3c   :  { %497 = vmatprep.subr.bf16.mxu0 %v827_v61  ;;  %583 = vmatprep.subr.bf16.mxu1 %v829_v62 }
  0x3f   :  { %498 = vmatpush1.bf16.msra.mxu0 %v831_v63  ;;  %584 = vmatpush1.bf16.msra.mxu1 %v832_v0 }
  0x40   :  { %510 = vmatprep.subr.bf16.mxu0 %v839_v1  ;;  %596 = vmatprep.subr.bf16.mxu1 %v842_v2 }
  0x42   :  { %500 = vmatmul.mubr.bf16.vlgmr.msra.gmra.mrb[0].mxu0 %v833_v3  ;;  %586 = vmatmul.mubr.bf16.vlgmr.msra.gmra.mrb[0].mxu1 %v833_v3 }
  0x43   :  { %511 = vmatpush1.bf16.msra.mxu0 %v837_v4  ;;  %597 = vmatpush1.bf16.msra.mxu1 %v840_v5 }
  0x44   :  { %512 = vmatprep.subr.bf16.mxu0 %v845_v6  ;;  %598 = vmatprep.subr.bf16.mxu1 %v848_v7 }
  0x45   :  { %542 = vmatprep.mubr.bf16.mxu0 %v849_v10  ;;  %628 = vmatprep.mubr.bf16.mxu1 %v849_v10 }
  0x47   :  { %513 = vmatpush1.bf16.msra.mxu0 %v843_v8  ;;  %599 = vmatpush1.bf16.msra.mxu1 %v846_v9 }
  0x4e   :  { %726 = vmatmul.mubr.msk.bf16.vlgmr.msra.gmra.mrb[0].mxu0 %vm463_vm0, %v836_v11  ;;  %727 = vmatmul.mubr.msk.bf16.vlgmr.msra.gmra.mrb[0].mxu1 %vm463_vm0, %v836_v11 }
 0x121   :  { %v544_v12 = vpop.f32.mrb[0].mxu0  ;;  %v630_v13 = vpop.f32.mrb[0].mxu1 }
 0x122   :  { %639 = vst [vmem:[%s1116_s2] sm:$0xff] %v544_v12  ;;  %641 = vst [vmem:[%s1116_s2 + $0x10] sm:$0xff] %v630_v13  ;;  %v546_v14 = vpop.f32.mrb[1].mxu0  ;;  %v632_v15 = vpop.f32.mrb[1].mxu1 }
 0x123   :  { %640 = vst [vmem:[%s1116_s2 + $0x8] sm:$0xff] %v546_v14  ;;  %642 = vst [vmem:[%s1116_s2 + $0x18] sm:$0xff] %v632_v15  ;;  %v548_v16 = vpop.f32.mrb[2].mxu0  ;;  %v634_v17 = vpop.f32.mrb[2].mxu1 }
 0x124   :  { %643 = vst [vmem:[%s1116_s2 + $0x20] sm:$0xff] %v548_v16  ;;  %645 = vst [vmem:[%s1116_s2 + $0x30] sm:$0xff] %v634_v17  ;;  %v550_v18 = vpop.f32.mrb[3].mxu0  ;;  %v636_v19 = vpop.f32.mrb[3].mxu1 }
 0x125   :  { %644 = vst [vmem:[%s1116_s2 + $0x28] sm:$0xff] %v550_v18  ;;  %646 = vst [vmem:[%s1116_s2 + $0x38] sm:$0xff] %v636_v19 }

// kernel: _lambda_.15
= control target key start
LH: loop header
LB: loop body
LE: loop exit
PB: predicated region body
PF: predicated region fallthrough
CT: control target
= control target key end

     0   :  { %vm47_vm0 = vcmask 392192   ;;  %s196_s0 = inlined_call_operand.vmem [shape: bf16[48,128], index: 0, kind: input, shape index: {}]   ;;  %s197_s1 = inlined_call_operand.vmem [shape: bf16[24,48], index: 1, kind: input, shape index: {}]   ;;  %s198_s2 = inlined_call_operand.vmem [shape: bf16[24,128], index: 2, kind: output, shape index: {}]  }
   0x1   :  { %v155_v0 = vld [vmem:[%s196_s0] sm:$0xff]   ;;  %v156_v1 = vld [vmem:[%s196_s0 + $0x8] sm:$0xff]   ;;  %v157_v2 = vld [vmem:[%s196_s0 + $0x10] sm:$0xff]  }
   0x2   :  { %145 = vmatprep.subr.bf16.mxu0 %v155_v0  ;;  %v158_v3 = vld [vmem:[%s197_s1] sm:$0xff]   ;;  %v159_v4 = vld [vmem:[%s197_s1 + $0x8] ss:$0 sps:$4 sm:$0xff]  }
   0x3   :  { %146 = vmatpush3.bf16.msra.mxu0 %v155_v0  ;;  %151 = vmatprep.mubr.msk.bf16.mxu0 %vm47_vm0, %v158_v3 }
   0x4   :  { %147 = vmatprep.subr.bf16.mxu0 %v156_v1 }
   0x7   :  { %148 = vmatpush3.bf16.msra.mxu0 %v156_v1 }
   0x8   :  { %149 = vmatprep.subr.bf16.mxu0 %v157_v2 }
   0xb   :  { %150 = vmatpush3.bf16.msra.mxu0 %v157_v2 }
   0xe   :  { %152 = vmatmul.mubr.msk.bf16.vlgmr.msra.gmra.mrb[0].mxu0 %vm47_vm0, %v159_v4 }
  0xe1   :  { %v153_v5 = vpop.f32.mrb[0].mxu0 }
  0xe2   :  { %v134_v6 = vpack.c.bf16 %v153_v5, %v153_v5  ;;  %v88_v7 = vpop.f32.mrb[1].mxu0 }
  0xe3   :  { %v154_v8 = vpop.f32.mrb[2].mxu0 }
  0xe4   :  { %117 = vst [vmem:[%s198_s2 + $0x8] sm:$0xf] %v134_v6  ;;  %v91_v9 = vpop.f32.mrb[3].mxu0 }
  0xe5   :  { %v138_v10 = vpack.c.bf16 %v91_v9, %v88_v7 }
  0xe7   :  { %139 = vst [vmem:[%s198_s2] sm:$0xff] %v138_v10  }

// kernel: _lambda_.13
= control target key start
LH: loop header
LB: loop body
LE: loop exit
PB: predicated region body
PF: predicated region fallthrough
CT: control target
= control target key end

     0   :  { %v462_v0 = vmov 0   ;;  %vm166_vm0 = vcmask 261120   ;;  %s612_s3 = inlined_call_operand.vmem [shape: f32[32,1], index: 3, kind: input, shape index: {}, may-alias: {3,5}]   ;;  %s613_s2 = inlined_call_operand.vmem [shape: f32[32,1], index: 2, kind: input, shape index: {}, may-alias: {2,4}]   ;;  %s614_s4 = inlined_call_operand.vmem [shape: f32[32,1], index: 4, kind: input, shape index: {}, may-alias: {2,4}]   ;;  %s615_s5 = inlined_call_operand.vmem [shape: f32[32,1], index: 5, kind: input, shape index: {}, may-alias: {3,5}]   ;;  %s616_s1 = inlined_call_operand.vmem [shape: bf16[32,32], index: 1, kind: input, shape index: {}]   ;;  %s617_s0 = inlined_call_operand.vmem [shape: bf16[48,512], index: 0, kind: input, shape index: {}]   ;;  %s618_s6 = inlined_call_operand.vmem [shape: bf16[32,512], index: 6, kind: output, shape index: {}]  }
   0x1   :  { %459 = vset.pattern.permute.xlu1 %v462_v0  ;;  %458 = vset.pattern.permute.xlu0 %v462_v0  ;;  %v88_v1 = vld [vmem:[%s612_s3] sm:$0xff]  ;;  %v89_v3 = vld [vmem:[%s612_s3 + $0x8] sm:$0xff]  ;;  %v51_v5 = vld [vmem:[%s613_s2 + $0x18] sm:$0xff] }
   0x2   :  { %v48_v2 = vld [vmem:[%s613_s2] sm:$0xff]  ;;  %94 = vperm.xlu1 %459, %v88_v1   ;;  %v49_v4 = vld [vmem:[%s613_s2 + $0x8] sm:$0xff]  ;;  %205 = vmatprep.mubr.bf16.mxu0 %v462_v0  ;;  %v50_v6 = vld [vmem:[%s613_s2 + $0x10] sm:$0xff] }
   0x3   :  { %54 = vperm.xlu0 %458, %v48_v2   ;;  %258 = vmatprep.mubr.bf16.mxu1 %v462_v0  ;;  %v91_v7 = vld [vmem:[%s612_s3 + $0x18] sm:$0xff]  ;;  %v90_v8 = vld [vmem:[%s612_s3 + $0x10] sm:$0xff]  ;;  %v280_v9 = vld [vmem:[%s614_s4 + $0x8] sm:$0xff] }
   0x4   :  { %v279_v10 = vld [vmem:[%s614_s4] sm:$0xff]  ;;  %v282_v11 = vld [vmem:[%s614_s4 + $0x18] sm:$0xff]  ;;  %v281_v12 = vld [vmem:[%s614_s4 + $0x10] sm:$0xff] }
   0x5   :  { %v320_v13 = vld [vmem:[%s615_s5 + $0x8] sm:$0xff]  ;;  %v319_v14 = vld [vmem:[%s615_s5] sm:$0xff]  ;;  %v322_v15 = vld [vmem:[%s615_s5 + $0x18] sm:$0xff] }
   0x6   :  { %99 = vperm.xlu1 %459, %v89_v3   ;;  %v321_v16 = vld [vmem:[%s615_s5 + $0x10] sm:$0xff]  ;;  %v24_v17 = vld [vmem:[%s617_s0] sm:$0xff]  ;;  %v25_v18 = vld [vmem:[%s617_s0 + $0x8] sm:$0xff] }
   0x7   :  { %59 = vperm.xlu0 %458, %v49_v4   ;;  %v32_v19 = vunpack.c.l.bf16 %v24_v17  ;;  %v34_v20 = vunpack.c.l.bf16 %v25_v18  ;;  %v26_v21 = vld [vmem:[%s617_s0 + $0x10] sm:$0xff]  ;;  %v27_v22 = vld [vmem:[%s617_s0 + $0x18] sm:$0xff]  ;;  %v33_v23 = vunpack.c.h.bf16 %v24_v17  ;;  %v35_v24 = vunpack.c.h.bf16 %v25_v18  ;;  %v28_v40 = vld [vmem:[%s617_s0 + $0x20] sm:$0xff] }
   0x8   :  { %v36_v27 = vunpack.c.l.bf16 %v26_v21  ;;  %v38_v28 = vunpack.c.l.bf16 %v27_v22  ;;  %v37_v29 = vunpack.c.h.bf16 %v26_v21  ;;  %v30_v32 = vld [vmem:[%s617_s0 + $0x30] sm:$0xff]  ;;  %v39_v35 = vunpack.c.h.bf16 %v27_v22  ;;  %v31_v36 = vld [vmem:[%s617_s0 + $0x38] sm:$0xff]  ;;  %v29_v46 = vld [vmem:[%s617_s0 + $0x28] sm:$0xff] }
   0x9   :  { %v44_v39 = vunpack.c.l.bf16 %v30_v32  ;;  %v45_v49 = vunpack.c.h.bf16 %v30_v32  ;;  %v46_v50 = vunpack.c.l.bf16 %v31_v36  ;;  %v47_v51 = vunpack.c.h.bf16 %v31_v36 }
   0xa   :  { %69 = vperm.xlu1 %459, %v51_v5   ;;  %v40_v53 = vunpack.c.l.bf16 %v28_v40  ;;  %v41_v59 = vunpack.c.h.bf16 %v28_v40  ;;  %v42_v60 = vunpack.c.l.bf16 %v29_v46  ;;  %v43_v61 = vunpack.c.h.bf16 %v29_v46 }
   0xb   :  { %64 = vperm.xlu0 %458, %v50_v6  }
   0xe   :  { %109 = vperm.xlu1 %459, %v91_v7  }
   0xf   :  { %104 = vperm.xlu0 %458, %v90_v8  }
  0x12   :  { %290 = vperm.xlu1 %459, %v280_v9  }
  0x13   :  { %285 = vperm.xlu0 %458, %v279_v10  }
  0x16   :  { %300 = vperm.xlu1 %459, %v282_v11  }
  0x17   :  { %295 = vperm.xlu0 %458, %v281_v12  }
  0x1a   :  { %330 = vperm.xlu1 %459, %v320_v13  }
  0x1b   :  { %325 = vperm.xlu0 %458, %v319_v14  }
  0x1e   :  { %340 = vperm.xlu1 %459, %v322_v15  }
  0x1f   :  { %335 = vperm.xlu0 %458, %v321_v16  }
  0x81   :  { %v95_v25 = vpop.permute.xlu1 %94 }
  0x82   :  { %v55_v26 = vpop.permute.xlu0 %54 }
  0x83   :  { %v72_v30 = vmul.f32 %v55_v26, %v32_v19  ;;  %v74_v31 = vmul.f32 %v55_v26, %v34_v20  ;;  %v73_v33 = vmul.f32 %v55_v26, %v33_v23  ;;  %v75_v34 = vmul.f32 %v55_v26, %v35_v24 }
  0x85   :  { %v100_v37 = vpop.permute.xlu1 %99  ;;  %v113_v41 = vadd.f32 %v95_v25, %v73_v33  ;;  %v115_v42 = vadd.f32 %v95_v25, %v75_v34  ;;  %v112_v43 = vadd.f32 %v95_v25, %v72_v30  ;;  %v114_v48 = vadd.f32 %v95_v25, %v74_v31 }
  0x86   :  { %v60_v38 = vpop.permute.xlu0 %59 }
  0x87   :  { %v76_v44 = vmul.f32 %v60_v38, %v36_v27  ;;  %v78_v45 = vmul.f32 %v60_v38, %v38_v28  ;;  %v77_v47 = vmul.f32 %v60_v38, %v37_v29  ;;  %v79_v52 = vmul.f32 %v60_v38, %v39_v35 }
  0x88   :  { %v129_v63 = vmax.f32 %v113_v41, 0.0  ;;  %v131_v1 = vmax.f32 %v115_v42, 0.0  ;;  %v128_v2 = vmax.f32 %v112_v43, 0.0  ;;  %v130_v3 = vmax.f32 %v114_v48, 0.0  ;;  %v460_v42 = vld [vmem:[%s616_s1] sm:$0xff]   ;;  %v461_v43 = vld [vmem:[%s616_s1 + $0x8] sm:$0xff]  }
  0x89   :  { %v117_v54 = vadd.f32 %v100_v37, %v77_v47  ;;  %v116_v55 = vadd.f32 %v100_v37, %v76_v44  ;;  %v118_v56 = vadd.f32 %v100_v37, %v78_v45  ;;  %v70_v57 = vpop.permute.xlu1 %69  ;;  %v119_v62 = vadd.f32 %v100_v37, %v79_v52 }
  0x8a   :  { %v65_v58 = vpop.permute.xlu0 %64  ;;  %v84_v4 = vmul.f32 %v70_v57, %v44_v39  ;;  %v85_v5 = vmul.f32 %v70_v57, %v45_v49  ;;  %v86_v6 = vmul.f32 %v70_v57, %v46_v50  ;;  %v87_v7 = vmul.f32 %v70_v57, %v47_v51 }
  0x8b   :  { %v133_v8 = vmax.f32 %v117_v54, 0.0  ;;  %v135_v9 = vmax.f32 %v119_v62, 0.0  ;;  %v132_v10 = vmax.f32 %v116_v55, 0.0  ;;  %v134_v11 = vmax.f32 %v118_v56, 0.0 }
  0x8c   :  { %v80_v12 = vmul.f32 %v65_v58, %v40_v53  ;;  %v81_v13 = vmul.f32 %v65_v58, %v41_v59  ;;  %v82_v14 = vmul.f32 %v65_v58, %v42_v60  ;;  %v83_v15 = vmul.f32 %v65_v58, %v43_v61 }
  0x8d   :  { %v110_v16 = vpop.permute.xlu1 %109  ;;  %v149_v26 = vpack.c.bf16 %v133_v8, %v129_v63  ;;  %v151_v27 = vpack.c.bf16 %v135_v9, %v131_v1  ;;  %v148_v28 = vpack.c.bf16 %v132_v10, %v128_v2  ;;  %v150_v29 = vpack.c.bf16 %v134_v11, %v130_v3 }
  0x8e   :  { %v105_v17 = vpop.permute.xlu0 %104  ;;  %v124_v18 = vadd.f32 %v110_v16, %v84_v4  ;;  %v125_v19 = vadd.f32 %v110_v16, %v85_v5  ;;  %v126_v20 = vadd.f32 %v110_v16, %v86_v6  ;;  %v127_v21 = vadd.f32 %v110_v16, %v87_v7 }
  0x8f   :  { %v120_v22 = vadd.f32 %v105_v17, %v80_v12  ;;  %v121_v23 = vadd.f32 %v105_v17, %v81_v13  ;;  %v122_v24 = vadd.f32 %v105_v17, %v82_v14  ;;  %v123_v25 = vadd.f32 %v105_v17, %v83_v15  ;;  %173 = vmatprep.subr.bf16.mxu0 %v149_v26 }
  0x90   :  { %v141_v31 = vmax.f32 %v125_v19, 0.0  ;;  %v143_v33 = vmax.f32 %v127_v21, 0.0  ;;  %226 = vmatprep.subr.bf16.mxu1 %v151_v27  ;;  %v140_v35 = vmax.f32 %v124_v18, 0.0  ;;  %v142_v37 = vmax.f32 %v126_v20, 0.0  ;;  %174 = vmatpush1.bf16.msra.mxu0 %v148_v28 }
  0x91   :  { %v137_v30 = vmax.f32 %v121_v23, 0.0  ;;  %v139_v32 = vmax.f32 %v123_v25, 0.0  ;;  %v136_v34 = vmax.f32 %v120_v22, 0.0  ;;  %v138_v36 = vmax.f32 %v122_v24, 0.0  ;;  %227 = vmatpush1.bf16.msra.mxu1 %v150_v29  ;;  %v291_v45 = vpop.permute.xlu1 %290 }
  0x92   :  { %v286_v44 = vpop.permute.xlu0 %285 }
  0x93   :  { %v153_v38 = vpack.c.bf16 %v141_v31, %v137_v30  ;;  %v155_v39 = vpack.c.bf16 %v143_v33, %v139_v32  ;;  %v152_v40 = vpack.c.bf16 %v140_v35, %v136_v34  ;;  %v154_v41 = vpack.c.bf16 %v142_v37, %v138_v36 }
  0x95   :  { %175 = vmatprep.subr.bf16.mxu0 %v153_v38  ;;  %228 = vmatprep.subr.bf16.mxu1 %v155_v39  ;;  %v582_v47 = vpop.permute.xlu1 %300 }
  0x96   :  { %176 = vmatpush1.bf16.msra.mxu0 %v152_v40  ;;  %229 = vmatpush1.bf16.msra.mxu1 %v154_v41  ;;  %v296_v46 = vpop.permute.xlu0 %295 }
  0x99   :  { %437 = vmatmul.mubr.msk.bf16.vlgmr.msra.gmra.mrb[0].mxu0 %vm166_vm0, %v460_v42  ;;  %439 = vmatmul.mubr.msk.bf16.vlgmr.msra.gmra.mrb[0].mxu1 %vm166_vm0, %v460_v42  ;;  %v331_v1 = vpop.permute.xlu1 %330 }
  0x9a   :  { %215 = vmatprep.mubr.bf16.mxu0 %v462_v0  ;;  %268 = vmatprep.mubr.bf16.mxu1 %v462_v0  ;;  %v326_v48 = vpop.permute.xlu0 %325 }
  0x9d   :  { %v341_v39 = vpop.permute.xlu1 %340 }
  0x9e   :  { %v336_v14 = vpop.permute.xlu0 %335 }
  0xa1   :  { %438 = vmatmul.mubr.msk.bf16.gmra.mrb[4].mxu0 %vm166_vm0, %v461_v43  ;;  %440 = vmatmul.mubr.msk.bf16.gmra.mrb[4].mxu1 %vm166_vm0, %v461_v43 }
 0x16c   :  { %v207_v49 = vpop.f32.mrb[0].mxu0  ;;  %v260_v50 = vpop.f32.mrb[0].mxu1 }
 0x16d   :  { %v303_v51 = vmul.f32 %v286_v44, %v207_v49  ;;  %v305_v52 = vmul.f32 %v286_v44, %v260_v50  ;;  %v209_v53 = vpop.f32.mrb[1].mxu0  ;;  %v262_v54 = vpop.f32.mrb[1].mxu1 }
 0x16e   :  { %v304_v55 = vmul.f32 %v286_v44, %v209_v53  ;;  %v306_v0 = vmul.f32 %v286_v44, %v262_v54  ;;  %v211_v56 = vpop.f32.mrb[2].mxu0  ;;  %v264_v57 = vpop.f32.mrb[2].mxu1 }
 0x16f   :  { %v343_v58 = vadd.f32 %v326_v48, %v303_v51  ;;  %v345_v59 = vadd.f32 %v326_v48, %v305_v52  ;;  %v307_v60 = vmul.f32 %v291_v45, %v211_v56  ;;  %v309_v61 = vmul.f32 %v291_v45, %v264_v57  ;;  %v213_v62 = vpop.f32.mrb[3].mxu0  ;;  %v266_v63 = vpop.f32.mrb[3].mxu1 }
 0x170   :  { %v344_v2 = vadd.f32 %v326_v48, %v304_v55  ;;  %v346_v3 = vadd.f32 %v326_v48, %v306_v0  ;;  %v308_v4 = vmul.f32 %v291_v45, %v213_v62  ;;  %v310_v5 = vmul.f32 %v291_v45, %v266_v63 }
 0x171   :  { %v359_v6 = vmax.f32 %v343_v58, 0.0  ;;  %v361_v7 = vmax.f32 %v345_v59, 0.0  ;;  %v347_v8 = vadd.f32 %v331_v1, %v307_v60  ;;  %v349_v9 = vadd.f32 %v331_v1, %v309_v61 }
 0x172   :  { %v360_v10 = vmax.f32 %v344_v2, 0.0  ;;  %v362_v11 = vmax.f32 %v346_v3, 0.0  ;;  %v348_v12 = vadd.f32 %v331_v1, %v308_v4  ;;  %v350_v13 = vadd.f32 %v331_v1, %v310_v5 }
 0x173   :  { %v363_v15 = vmax.f32 %v347_v8, 0.0  ;;  %v365_v16 = vmax.f32 %v349_v9, 0.0 }
 0x174   :  { %v449_v17 = vpack.c.bf16 %v360_v10, %v359_v6  ;;  %v450_v18 = vpack.c.bf16 %v362_v11, %v361_v7  ;;  %v364_v19 = vmax.f32 %v348_v12, 0.0  ;;  %v366_v20 = vmax.f32 %v350_v13, 0.0  ;;  %v217_v21 = vpop.f32.mrb[4].mxu0  ;;  %v270_v22 = vpop.f32.mrb[4].mxu1 }
 0x175   :  { %v311_v23 = vmul.f32 %v296_v46, %v217_v21  ;;  %v313_v24 = vmul.f32 %v296_v46, %v270_v22  ;;  %v219_v25 = vpop.f32.mrb[5].mxu0  ;;  %v272_v26 = vpop.f32.mrb[5].mxu1 }
 0x176   :  { %423 = vst [vmem:[%s618_s6] sm:$0xff] %v449_v17  ;;  %424 = vst [vmem:[%s618_s6 + $0x8] sm:$0xff] %v450_v18  ;;  %v451_v27 = vpack.c.bf16 %v364_v19, %v363_v15  ;;  %v452_v28 = vpack.c.bf16 %v366_v20, %v365_v16  ;;  %v312_v29 = vmul.f32 %v296_v46, %v219_v25  ;;  %v221_v31 = vpop.f32.mrb[6].mxu0  ;;  %v274_v32 = vpop.f32.mrb[6].mxu1 }
 0x177   :  { %v314_v30 = vmul.f32 %v296_v46, %v272_v26  ;;  %v351_v33 = vadd.f32 %v336_v14, %v311_v23  ;;  %v353_v34 = vadd.f32 %v336_v14, %v313_v24  ;;  %v315_v35 = vmul.f32 %v582_v47, %v221_v31  ;;  %v223_v37 = vpop.f32.mrb[7].mxu0  ;;  %v276_v38 = vpop.f32.mrb[7].mxu1 }
 0x178   :  { %v317_v36 = vmul.f32 %v582_v47, %v274_v32  ;;  %425 = vst [vmem:[%s618_s6 + $0x10] sm:$0xff] %v451_v27  ;;  %426 = vst [vmem:[%s618_s6 + $0x18] sm:$0xff] %v452_v28  ;;  %v352_v40 = vadd.f32 %v336_v14, %v312_v29  ;;  %v316_v42 = vmul.f32 %v582_v47, %v223_v37 }
 0x179   :  { %v354_v41 = vadd.f32 %v336_v14, %v314_v30  ;;  %v318_v43 = vmul.f32 %v582_v47, %v276_v38  ;;  %v367_v44 = vmax.f32 %v351_v33, 0.0  ;;  %v369_v45 = vmax.f32 %v353_v34, 0.0 }
 0x17a   :  { %v355_v46 = vadd.f32 %v341_v39, %v315_v35  ;;  %v357_v48 = vadd.f32 %v341_v39, %v317_v36  ;;  %v368_v49 = vmax.f32 %v352_v40, 0.0  ;;  %v356_v51 = vadd.f32 %v341_v39, %v316_v42 }
 0x17b   :  { %v370_v50 = vmax.f32 %v354_v41, 0.0  ;;  %v358_v52 = vadd.f32 %v341_v39, %v318_v43 }
 0x17c   :  { %v371_v53 = vmax.f32 %v355_v46, 0.0  ;;  %v373_v54 = vmax.f32 %v357_v48, 0.0  ;;  %v453_v55 = vpack.c.bf16 %v368_v49, %v367_v44  ;;  %v372_v56 = vmax.f32 %v356_v51, 0.0 }
 0x17d   :  { %v454_v0 = vpack.c.bf16 %v370_v50, %v369_v45  ;;  %v374_v57 = vmax.f32 %v358_v52, 0.0 }
 0x17e   :  { %427 = vst [vmem:[%s618_s6 + $0x20] sm:$0xff] %v453_v55  ;;  %v455_v47 = vpack.c.bf16 %v372_v56, %v371_v53 }
 0x17f   :  { %428 = vst [vmem:[%s618_s6 + $0x28] sm:$0xff] %v454_v0  ;;  %v456_v58 = vpack.c.bf16 %v374_v57, %v373_v54 }
 0x180   :  { %429 = vst [vmem:[%s618_s6 + $0x30] sm:$0xff] %v455_v47 }
 0x181   :  { %430 = vst [vmem:[%s618_s6 + $0x38] sm:$0xff] %v456_v58 }

// kernel: _lambda_.16
= control target key start
LH: loop header
LB: loop body
LE: loop exit
PB: predicated region body
PF: predicated region fallthrough
CT: control target
= control target key end

     0   :  { %v280_v0 = vmov 0   ;;  %vm91_vm0 = vcmask 195584   ;;  %vm98_vm1 = vcmask 1043456   ;;  %s378_s3 = inlined_call_operand.vmem [shape: f32[24,1], index: 3, kind: input, shape index: {}]   ;;  %s379_s2 = inlined_call_operand.vmem [shape: f32[24,1], index: 2, kind: input, shape index: {}]   ;;  %s380_s4 = inlined_call_operand.vmem [shape: f32[32,1], index: 4, kind: input, shape index: {}]   ;;  %s381_s5 = inlined_call_operand.vmem [shape: f32[32,1], index: 5, kind: input, shape index: {}]   ;;  %s382_s1 = inlined_call_operand.vmem [shape: bf16[32,24], index: 1, kind: input, shape index: {}]   ;;  %s383_s0 = inlined_call_operand.vmem [shape: bf16[56,128], index: 0, kind: input, shape index: {}]   ;;  %s384_s6 = inlined_call_operand.vmem [shape: bf16[32,128], index: 6, kind: output, shape index: {}]  }
   0x1   :  { %277 = vset.pattern.permute.xlu1 %v280_v0  ;;  %276 = vset.pattern.permute.xlu0 %v280_v0  ;;  %v51_v1 = vld [vmem:[%s378_s3] sm:$0xff]  ;;  %v52_v3 = vld [vmem:[%s378_s3 + $0x8] sm:$0xff]  ;;  %v53_v5 = vld [vmem:[%s378_s3 + $0x10] sm:$0xff] }
   0x2   :  { %v30_v2 = vld [vmem:[%s379_s2] sm:$0xff]  ;;  %56 = vperm.xlu1 %277, %v51_v1   ;;  %v31_v4 = vld [vmem:[%s379_s2 + $0x8] sm:$0xff]  ;;  %v32_v6 = vld [vmem:[%s379_s2 + $0x10] sm:$0xff] }
   0x3   :  { %35 = vperm.xlu0 %276, %v30_v2   ;;  %v152_v7 = vld [vmem:[%s380_s4 + $0x8] sm:$0xff]  ;;  %v151_v8 = vld [vmem:[%s380_s4] sm:$0xff]  ;;  %v154_v9 = vld [vmem:[%s380_s4 + $0x18] sm:$0xff] }
   0x4   :  { %v153_v10 = vld [vmem:[%s380_s4 + $0x10] sm:$0xff]  ;;  %v180_v11 = vld [vmem:[%s381_s5 + $0x8] sm:$0xff]  ;;  %v179_v12 = vld [vmem:[%s381_s5] sm:$0xff] }
   0x5   :  { %v278_v13 = vld [vmem:[%s382_s1] sm:$0xff]   ;;  %v182_v14 = vld [vmem:[%s381_s5 + $0x18] sm:$0xff]  ;;  %v181_v15 = vld [vmem:[%s381_s5 + $0x10] sm:$0xff] }
   0x6   :  { %61 = vperm.xlu1 %277, %v52_v3   ;;  %270 = vmatprep.mubr.msk.bf16.mxu0 %vm91_vm0, %v278_v13  ;;  %v248_v16 = vld [vmem:[%s383_s0] sm:$0xff]   ;;  %v26_v22 = vld [vmem:[%s383_s0 + $0x8] sm:$0xf] }
   0x7   :  { %40 = vperm.xlu0 %276, %v31_v4   ;;  %v249_v17 = vunpack.c.l.bf16 %v248_v16  ;;  %v250_v21 = vunpack.c.h.bf16 %v248_v16  ;;  %v29_v27 = vunpack.c.l.bf16 %v26_v22  ;;  %v279_v39 = vld [vmem:[%s382_s1 + $0x8] sm:$0xff]  }
   0xa   :  { %66 = vperm.xlu1 %277, %v53_v5  }
   0xb   :  { %45 = vperm.xlu0 %276, %v32_v6  }
   0xe   :  { %162 = vperm.xlu1 %277, %v152_v7  }
   0xf   :  { %157 = vperm.xlu0 %276, %v151_v8  }
  0x12   :  { %172 = vperm.xlu1 %277, %v154_v9  }
  0x13   :  { %167 = vperm.xlu0 %276, %v153_v10  }
  0x16   :  { %190 = vperm.xlu1 %277, %v180_v11  }
  0x17   :  { %185 = vperm.xlu0 %276, %v179_v12  }
  0x1a   :  { %200 = vperm.xlu1 %277, %v182_v14  }
  0x1b   :  { %195 = vperm.xlu0 %276, %v181_v15  }
  0x81   :  { %v57_v18 = vpop.permute.xlu1 %56 }
  0x82   :  { %v36_v19 = vpop.permute.xlu0 %35 }
  0x83   :  { %v48_v20 = vmul.f32 %v249_v17, %v36_v19 }
  0x85   :  { %v62_v23 = vpop.permute.xlu1 %61  ;;  %v69_v25 = vadd.f32 %v57_v18, %v48_v20 }
  0x86   :  { %v41_v24 = vpop.permute.xlu0 %40 }
  0x87   :  { %v49_v26 = vmul.f32 %v250_v21, %v41_v24  ;;  %v72_v30 = vmax.f32 %v69_v25, 0.0 }
  0x89   :  { %v70_v28 = vadd.f32 %v62_v23, %v49_v26  ;;  %v67_v33 = vpop.permute.xlu1 %66 }
  0x8a   :  { %v46_v29 = vpop.permute.xlu0 %45 }
  0x8b   :  { %v73_v31 = vmax.f32 %v70_v28, 0.0  ;;  %v50_v32 = vmul.f32 %v46_v29, %v29_v27 }
  0x8d   :  { %v71_v34 = vadd.f32 %v67_v33, %v50_v32  ;;  %v79_v35 = vpack.c.bf16 %v73_v31, %v72_v30  ;;  %v163_v41 = vpop.permute.xlu1 %162 }
  0x8e   :  { %v158_v40 = vpop.permute.xlu0 %157 }
  0x8f   :  { %v74_v36 = vmax.f32 %v71_v34, 0.0  ;;  %266 = vmatprep.subr.bf16.mxu0 %v79_v35 }
  0x90   :  { %267 = vmatpush3.bf16.msra.mxu0 %v79_v35 }
  0x91   :  { %v80_v37 = vpack.c.bf16 %v74_v36, %v74_v36  ;;  %v173_v43 = vpop.permute.xlu1 %172 }
  0x92   :  { %v168_v42 = vpop.permute.xlu0 %167 }
  0x93   :  { %274 = vmatprep.subr.msk.bf16.mxu0 %vm98_vm1, %v80_v37  ;;  %v100_v38 = vsel %vm98_vm1, %v80_v37, 0 }
  0x94   :  { %269 = vmatpush3.bf16.msra.mxu0 %v100_v38 }
  0x95   :  { %v191_v45 = vpop.permute.xlu1 %190 }
  0x96   :  { %v186_v44 = vpop.permute.xlu0 %185 }
  0x97   :  { %271 = vmatmul.mubr.msk.bf16.vlgmr.msra.gmra.mrb[0].mxu0 %vm91_vm0, %v279_v39 }
  0x99   :  { %v201_v55 = vpop.permute.xlu1 %200 }
  0x9a   :  { %v196_v49 = vpop.permute.xlu0 %195 }
 0x16a   :  { %v272_v46 = vpop.f32.mrb[0].mxu0 }
 0x16b   :  { %v177_v47 = vmul.f32 %v272_v46, %v168_v42  ;;  %v136_v48 = vpop.f32.mrb[1].mxu0 }
 0x16c   :  { %v175_v50 = vmul.f32 %v158_v40, %v136_v48  ;;  %v273_v51 = vpop.f32.mrb[2].mxu0 }
 0x16d   :  { %v205_v52 = vadd.f32 %v196_v49, %v177_v47  ;;  %v178_v53 = vmul.f32 %v273_v51, %v173_v43  ;;  %v139_v54 = vpop.f32.mrb[3].mxu0 }
 0x16e   :  { %v203_v56 = vadd.f32 %v186_v44, %v175_v50  ;;  %v176_v57 = vmul.f32 %v163_v41, %v139_v54 }
 0x16f   :  { %v206_v58 = vadd.f32 %v201_v55, %v178_v53  ;;  %v209_v60 = vmax.f32 %v205_v52, 0.0 }
 0x170   :  { %v204_v59 = vadd.f32 %v191_v45, %v176_v57  ;;  %v207_v62 = vmax.f32 %v203_v56, 0.0 }
 0x171   :  { %v210_v61 = vmax.f32 %v206_v58, 0.0 }
 0x172   :  { %v208_v63 = vmax.f32 %v204_v59, 0.0 }
 0x173   :  { %v259_v0 = vpack.c.bf16 %v210_v61, %v209_v60 }
 0x174   :  { %v254_v1 = vpack.c.bf16 %v208_v63, %v207_v62 }
 0x175   :  { %261 = vst [vmem:[%s384_s6 + $0x8] sm:$0xff] %v259_v0  }
 0x176   :  { %255 = vst [vmem:[%s384_s6] sm:$0xff] %v254_v1  }

// kernel: _lambda_.17
= control target key start
LH: loop header
LB: loop body
LE: loop exit
PB: predicated region body
PF: predicated region fallthrough
CT: control target
= control target key end

     0   :  { %v346_v1 = vmov 0.0   ;;  %vm347_vm0 = vmmov 0   ;;  %vm175_vm1 = vcmask 261120   ;;  %s432_s0 = inlined_call_operand.vmem [shape: bf16[288,128], index: 0, kind: input, shape index: {}]   ;;  %s433_s1 = inlined_call_operand.vmem [shape: bf16[16,288], index: 1, kind: input, shape index: {}]   ;;  %s434_s2 = inlined_call_operand.vmem [shape: f32[16,128], index: 2, kind: output, shape index: {}]  }
   0x1   :  { %v324_v0 = vld [vmem:[%s432_s0 + $0x40] sm:$0xff]   ;;  %314 = vmatprep.subr.bf16.mxu1 %v346_v1  ;;  %318 = vmatprep.mubr.msk.bf16.mxu1 %vm347_vm0, %v346_v1  ;;  %v326_v3 = vld [vmem:[%s432_s0 + $0x48] sm:$0xff]   ;;  %v328_v5 = vld [vmem:[%s432_s0 + $0x50] sm:$0xff]  }
   0x2   :  { %v325_v2 = vld [vmem:[%s432_s0] sm:$0xff]   ;;  %289 = vmatprep.subr.bf16.mxu0 %v324_v0  ;;  %v327_v4 = vld [vmem:[%s432_s0 + $0x8] sm:$0xff]   ;;  %v329_v6 = vld [vmem:[%s432_s0 + $0x10] sm:$0xff]  }
   0x3   :  { %290 = vmatpush3.bf16.msra.mxu0 %v325_v2  ;;  %v330_v7 = vld [vmem:[%s432_s0 + $0x58] sm:$0xff]   ;;  %v332_v9 = vld [vmem:[%s432_s0 + $0x60] sm:$0xff]   ;;  %v334_v12 = vld [vmem:[%s432_s0 + $0x68] sm:$0xff]  }
   0x4   :  { %291 = vmatprep.subr.bf16.mxu0 %v326_v3  ;;  %v331_v8 = vld [vmem:[%s432_s0 + $0x18] sm:$0xff]   ;;  %v338_v10 = vld [vmem:[%s432_s0 + $0x80] sm:$0xff]   ;;  %v341_v13 = vld [vmem:[%s432_s0 + $0x88] sm:$0xff]  }
   0x5   :  { %v333_v11 = vld [vmem:[%s432_s0 + $0x20] sm:$0xff]   ;;  %315 = vmatpush3.bf16.msra.mxu1 %v338_v10  ;;  %v335_v14 = vld [vmem:[%s432_s0 + $0x28] sm:$0xff]   ;;  %v336_v16 = vld [vmem:[%s432_s0 + $0x70] sm:$0xff]  }
   0x6   :  { %316 = vmatprep.subr.bf16.mxu1 %v346_v1  ;;  %v344_v15 = vld [vmem:[%s433_s1 + $0x4] ss:$12 sps:$4 sm:$0xff]   ;;  %v345_v17 = vld [vmem:[%s433_s1 + $0x8] ss:$12 sps:$4 sm:$0xff]   ;;  %v339_v19 = vld [vmem:[%s432_s0 + $0x78] sm:$0xff]  }
   0x7   :  { %292 = vmatpush3.bf16.msra.mxu0 %v327_v4  ;;  %211 = vmatprep.mubr.bf16.mxu0 %v344_v15  ;;  %v337_v18 = vld [vmem:[%s432_s0 + $0x30] sm:$0xff]   ;;  %v340_v20 = vld [vmem:[%s432_s0 + $0x38] sm:$0xff]   ;;  %v342_v21 = vld [vmem:[%s433_s1] ss:$12 sps:$4 sm:$0xff]  }
   0x8   :  { %293 = vmatprep.subr.bf16.mxu0 %v328_v5 }
   0x9   :  { %317 = vmatpush3.bf16.msra.mxu1 %v341_v13 }
   0xb   :  { %294 = vmatpush3.bf16.msra.mxu0 %v329_v6 }
   0xc   :  { %295 = vmatprep.subr.bf16.mxu0 %v330_v7  ;;  %319 = vmatmul.mubr.msk.bf16.vlgmr.msra.gmra.mrb[0].mxu1 %vm175_vm1, %v345_v17 }
   0xf   :  { %296 = vmatpush3.bf16.msra.mxu0 %v331_v8 }
  0x10   :  { %297 = vmatprep.subr.bf16.mxu0 %v332_v9 }
  0x13   :  { %298 = vmatpush3.bf16.msra.mxu0 %v333_v11 }
  0x14   :  { %299 = vmatprep.subr.bf16.mxu0 %v334_v12 }
  0x17   :  { %300 = vmatpush3.bf16.msra.mxu0 %v335_v14 }
  0x18   :  { %301 = vmatprep.subr.bf16.mxu0 %v336_v16 }
  0x1b   :  { %302 = vmatpush3.bf16.msra.mxu0 %v337_v18 }
  0x1c   :  { %303 = vmatprep.subr.bf16.mxu0 %v339_v19 }
  0x1f   :  { %304 = vmatpush3.bf16.msra.mxu0 %v340_v20 }
  0x22   :  { %212 = vmatmul.mubr.bf16.vlgmr.msra.gmra.mrb[0].mxu0 %v342_v21 }
  0xdf   :  { %v254_v22 = vpop.f32.mrb[0].mxu1 }
  0xe0   :  { %v320_v23 = vpop.f32.mrb[1].mxu1 }
  0xe1   :  { %v257_v24 = vpop.f32.mrb[2].mxu1 }
  0xe2   :  { %v321_v25 = vpop.f32.mrb[3].mxu1 }
  0xf5   :  { %v305_v26 = vpop.f32.mrb[0].mxu0 }
  0xf6   :  { %v306_v27 = vpop.f32.mrb[1].mxu0 }
  0xf7   :  { %v307_v28 = vadd.f32 %v306_v27, %v305_v26  ;;  %v308_v29 = vpop.f32.mrb[2].mxu0 }
  0xf8   :  { %v309_v30 = vpop.f32.mrb[3].mxu0 }
  0xf9   :  { %v255_v31 = vadd.f32 %v307_v28, %v254_v22  ;;  %v310_v32 = vadd.f32 %v309_v30, %v308_v29 }
  0xfb   :  { %261 = vst [vmem:[%s434_s2] sm:$0xff] %v255_v31  ;;  %v258_v33 = vadd.f32 %v310_v32, %v257_v24 }
  0xfd   :  { %262 = vst [vmem:[%s434_s2 + $0x8] sm:$0xff] %v258_v33 }

// kernel: _lambda_.18
= control target key start
LH: loop header
LB: loop body
LE: loop exit
PB: predicated region body
PF: predicated region fallthrough
CT: control target
= control target key end

     0   :  { %v323_v0 = vmov 0   ;;  %vm126_vm0 = vcmask 326656   ;;  %vm133_vm1 = vcmask 1043456   ;;  %s436_s3 = inlined_call_operand.vmem [shape: f32[40,1], index: 3, kind: input, shape index: {}]   ;;  %s437_s2 = inlined_call_operand.vmem [shape: f32[40,1], index: 2, kind: input, shape index: {}]   ;;  %s438_s4 = inlined_call_operand.vmem [shape: f32[32,1], index: 4, kind: input, shape index: {}]   ;;  %s439_s5 = inlined_call_operand.vmem [shape: f32[32,1], index: 5, kind: input, shape index: {}]   ;;  %s440_s1 = inlined_call_operand.vmem [shape: bf16[32,40], index: 1, kind: input, shape index: {}]   ;;  %s441_s0 = inlined_call_operand.vmem [shape: bf16[56,128], index: 0, kind: input, shape index: {}]   ;;  %s442_s6 = inlined_call_operand.vmem [shape: bf16[32,128], index: 6, kind: output, shape index: {}]  }
   0x1   :  { %320 = vset.pattern.permute.xlu1 %v323_v0  ;;  %319 = vset.pattern.permute.xlu0 %v323_v0  ;;  %v69_v1 = vld [vmem:[%s436_s3] sm:$0xff]  ;;  %v70_v3 = vld [vmem:[%s436_s3 + $0x8] sm:$0xff]  ;;  %v37_v5 = vld [vmem:[%s437_s2 + $0x18] sm:$0xff] }
   0x2   :  { %v34_v2 = vld [vmem:[%s437_s2] sm:$0xff]  ;;  %76 = vperm.xlu1 %320, %v69_v1   ;;  %v35_v4 = vld [vmem:[%s437_s2 + $0x8] sm:$0xff]  ;;  %v36_v6 = vld [vmem:[%s437_s2 + $0x10] sm:$0xff] }
   0x3   :  { %41 = vperm.xlu0 %319, %v34_v2   ;;  %v72_v7 = vld [vmem:[%s436_s3 + $0x18] sm:$0xff]  ;;  %v71_v8 = vld [vmem:[%s436_s3 + $0x10] sm:$0xff]  ;;  %v73_v9 = vld [vmem:[%s436_s3 + $0x20] sm:$0xff] }
   0x4   :  { %v38_v10 = vld [vmem:[%s437_s2 + $0x20] sm:$0xff]  ;;  %v187_v11 = vld [vmem:[%s438_s4 + $0x8] sm:$0xff]  ;;  %v189_v13 = vld [vmem:[%s438_s4 + $0x18] sm:$0xff] }
   0x5   :  { %v186_v12 = vld [vmem:[%s438_s4] sm:$0xff]  ;;  %v188_v14 = vld [vmem:[%s438_s4 + $0x10] sm:$0xff]  ;;  %v215_v15 = vld [vmem:[%s439_s5 + $0x8] sm:$0xff] }
   0x6   :  { %81 = vperm.xlu1 %320, %v70_v3   ;;  %v214_v16 = vld [vmem:[%s439_s5] sm:$0xff]  ;;  %v217_v18 = vld [vmem:[%s439_s5 + $0x18] sm:$0xff]  ;;  %v216_v19 = vld [vmem:[%s439_s5 + $0x10] sm:$0xff] }
   0x7   :  { %46 = vperm.xlu0 %319, %v35_v4   ;;  %v321_v17 = vld [vmem:[%s440_s1] sm:$0xff]   ;;  %v300_v28 = vld [vmem:[%s441_s0 + $0x8] sm:$0xff]   ;;  %v28_v38 = vld [vmem:[%s441_s0 + $0x10] sm:$0xf] }
   0x8   :  { %313 = vmatprep.mubr.msk.bf16.mxu0 %vm126_vm0, %v321_v17  ;;  %v283_v20 = vld [vmem:[%s441_s0] sm:$0xff]   ;;  %v289_v32 = vunpack.c.h.bf16 %v300_v28  ;;  %v288_v33 = vunpack.c.l.bf16 %v300_v28  ;;  %v33_v46 = vunpack.c.l.bf16 %v28_v38  ;;  %v322_v57 = vld [vmem:[%s440_s1 + $0x8] sm:$0xff]  }
   0x9   :  { %v284_v21 = vunpack.c.l.bf16 %v283_v20  ;;  %v285_v25 = vunpack.c.h.bf16 %v283_v20 }
   0xa   :  { %56 = vperm.xlu1 %320, %v37_v5  }
   0xb   :  { %51 = vperm.xlu0 %319, %v36_v6  }
   0xe   :  { %91 = vperm.xlu1 %320, %v72_v7  }
   0xf   :  { %86 = vperm.xlu0 %319, %v71_v8  }
  0x12   :  { %96 = vperm.xlu1 %320, %v73_v9  }
  0x13   :  { %61 = vperm.xlu0 %319, %v38_v10  }
  0x16   :  { %197 = vperm.xlu1 %320, %v187_v11  }
  0x17   :  { %192 = vperm.xlu0 %319, %v186_v12  }
  0x1a   :  { %207 = vperm.xlu1 %320, %v189_v13  }
  0x1b   :  { %202 = vperm.xlu0 %319, %v188_v14  }
  0x1e   :  { %225 = vperm.xlu1 %320, %v215_v15  }
  0x1f   :  { %220 = vperm.xlu0 %319, %v214_v16  }
  0x22   :  { %235 = vperm.xlu1 %320, %v217_v18  }
  0x23   :  { %230 = vperm.xlu0 %319, %v216_v19  }
  0x81   :  { %v77_v22 = vpop.permute.xlu1 %76 }
  0x82   :  { %v42_v23 = vpop.permute.xlu0 %41 }
  0x83   :  { %v64_v24 = vmul.f32 %v284_v21, %v42_v23 }
  0x85   :  { %v82_v26 = vpop.permute.xlu1 %81  ;;  %v99_v29 = vadd.f32 %v77_v22, %v64_v24 }
  0x86   :  { %v47_v27 = vpop.permute.xlu0 %46 }
  0x87   :  { %v65_v30 = vmul.f32 %v285_v25, %v47_v27  ;;  %v104_v36 = vmax.f32 %v99_v29, 0.0 }
  0x89   :  { %v100_v31 = vadd.f32 %v82_v26, %v65_v30  ;;  %v57_v34 = vpop.permute.xlu1 %56 }
  0x8a   :  { %v52_v35 = vpop.permute.xlu0 %51  ;;  %v67_v39 = vmul.f32 %v289_v32, %v57_v34 }
  0x8b   :  { %v105_v37 = vmax.f32 %v100_v31, 0.0  ;;  %v66_v40 = vmul.f32 %v288_v33, %v52_v35 }
  0x8d   :  { %v113_v41 = vpack.c.bf16 %v105_v37, %v104_v36  ;;  %v92_v42 = vpop.permute.xlu1 %91 }
  0x8e   :  { %v87_v43 = vpop.permute.xlu0 %86  ;;  %v102_v44 = vadd.f32 %v92_v42, %v67_v39 }
  0x8f   :  { %v101_v45 = vadd.f32 %v87_v43, %v66_v40  ;;  %307 = vmatprep.subr.bf16.mxu0 %v113_v41 }
  0x90   :  { %308 = vmatpush3.bf16.msra.mxu0 %v113_v41  ;;  %v107_v47 = vmax.f32 %v102_v44, 0.0 }
  0x91   :  { %v106_v48 = vmax.f32 %v101_v45, 0.0  ;;  %v97_v52 = vpop.permute.xlu1 %96 }
  0x92   :  { %v62_v49 = vpop.permute.xlu0 %61 }
  0x93   :  { %v114_v50 = vpack.c.bf16 %v107_v47, %v106_v48  ;;  %v68_v51 = vmul.f32 %v62_v49, %v33_v46 }
  0x95   :  { %v103_v53 = vadd.f32 %v97_v52, %v68_v51  ;;  %309 = vmatprep.subr.bf16.mxu0 %v114_v50  ;;  %v198_v59 = vpop.permute.xlu1 %197 }
  0x96   :  { %310 = vmatpush3.bf16.msra.mxu0 %v114_v50  ;;  %v193_v58 = vpop.permute.xlu0 %192 }
  0x97   :  { %v108_v54 = vmax.f32 %v103_v53, 0.0 }
  0x99   :  { %v115_v55 = vpack.c.bf16 %v108_v54, %v108_v54  ;;  %v208_v61 = vpop.permute.xlu1 %207 }
  0x9a   :  { %v203_v60 = vpop.permute.xlu0 %202 }
  0x9b   :  { %317 = vmatprep.subr.msk.bf16.mxu0 %vm133_vm1, %v115_v55  ;;  %v135_v56 = vsel %vm133_vm1, %v115_v55, 0 }
  0x9c   :  { %312 = vmatpush3.bf16.msra.mxu0 %v135_v56 }
  0x9d   :  { %v226_v63 = vpop.permute.xlu1 %225 }
  0x9e   :  { %v221_v62 = vpop.permute.xlu0 %220 }
  0x9f   :  { %314 = vmatmul.mubr.msk.bf16.vlgmr.msra.gmra.mrb[0].mxu0 %vm126_vm0, %v322_v57 }
  0xa1   :  { %v236_v9 = vpop.permute.xlu1 %235 }
  0xa2   :  { %v231_v3 = vpop.permute.xlu0 %230 }
 0x172   :  { %v315_v0 = vpop.f32.mrb[0].mxu0 }
 0x173   :  { %v212_v1 = vmul.f32 %v315_v0, %v203_v60  ;;  %v171_v2 = vpop.f32.mrb[1].mxu0 }
 0x174   :  { %v210_v4 = vmul.f32 %v193_v58, %v171_v2  ;;  %v316_v5 = vpop.f32.mrb[2].mxu0 }
 0x175   :  { %v240_v6 = vadd.f32 %v231_v3, %v212_v1  ;;  %v213_v7 = vmul.f32 %v316_v5, %v208_v61  ;;  %v174_v8 = vpop.f32.mrb[3].mxu0 }
 0x176   :  { %v238_v10 = vadd.f32 %v221_v62, %v210_v4  ;;  %v211_v11 = vmul.f32 %v198_v59, %v174_v8 }
 0x177   :  { %v241_v12 = vadd.f32 %v236_v9, %v213_v7  ;;  %v244_v14 = vmax.f32 %v240_v6, 0.0 }
 0x178   :  { %v239_v13 = vadd.f32 %v226_v63, %v211_v11  ;;  %v242_v16 = vmax.f32 %v238_v10, 0.0 }
 0x179   :  { %v245_v15 = vmax.f32 %v241_v12, 0.0 }
 0x17a   :  { %v243_v17 = vmax.f32 %v239_v13, 0.0 }
 0x17b   :  { %v298_v18 = vpack.c.bf16 %v245_v15, %v244_v14 }
 0x17c   :  { %v293_v19 = vpack.c.bf16 %v243_v17, %v242_v16 }
 0x17d   :  { %301 = vst [vmem:[%s442_s6 + $0x8] sm:$0xff] %v298_v18  }
 0x17e   :  { %294 = vst [vmem:[%s442_s6] sm:$0xff] %v293_v19  }

</bundles_post_ra>
